<compile_context>
chip_gen: v5e
topology: v5e:2x2
jax: 0.10.0
libtpu: 0.0.40
codegen_flags: <defaults>
</compile_context>

<pallas_src>
import functools

import numpy as np
import jax
import jax.numpy as jnp
from jax import lax
from jax.experimental import pallas as pl
from jax.experimental.pallas import tpu as pltpu


# -----------------------------------------------------------------------------
# Trace-time weight re-layout helpers (run in the wrapper, not in the kernel)
# -----------------------------------------------------------------------------
def _band_matrices(wt, W_in, in_step):
    """Fold a 3x3 SAME conv's dx taps + W zero-padding into per-dy band matrices.

    wt: (3, 3, Cin, Cout) HWIO conv weight.
    Input rows use lane index = (in_step * w_in) * Cin + ci (in_step=2 means valid
    data sits at even spatial lane positions; odd positions are ignored garbage
    from the deferred pool compaction and get all-zero rows here).
    Returns (3, W_in*in_step*Cin, 2*W_in*Cout) bf16:
      columns [:W_in*Cout]  -> conv output at spatial w      (lane = w*Cout + co)
      columns [W_in*Cout:]  -> conv output at spatial w + 1  (the W max-pool partner)
    """
    Cin, Cout = int(wt.shape[2]), int(wt.shape[3])
    Wl = W_in * in_step
    halves = []
    for shift in (0, 1):
        ind = np.zeros((3, Wl, W_in), np.float32)
        for dx in range(3):
            for w in range(W_in):
                wp = w + shift                       # output spatial position
                if wp >= W_in:
                    continue                         # shifted column falls off the edge
                win = wp + dx - 1                    # input spatial position (pad = 1)
                if 0 <= win < W_in:
                    ind[dx, in_step * win, w] = 1.0
        halves.append(jnp.asarray(ind))
    mats = []
    for dy in range(3):
        cols = [jnp.einsum("xaw,xio->aiwo", h, wt[dy]).reshape(Wl * Cin, W_in * Cout)
                for h in halves]
        mats.append(jnp.concatenate(cols, axis=1))
    return jnp.stack(mats, axis=0).astype(jnp.bfloat16)


def _fc1_blocks(fw1, nc):
    """Re-layout fc1's (4*4*4nc, hid) weight (PyTorch flatten order c,h,w) into
    4 per-h2 blocks of shape (8*4nc, hid) indexed by lane (w, c) of the stage-3
    pooled activation (valid data at even w; odd-w rows are zero)."""
    hid = 4 * nc
    f = fw1.reshape(4 * nc, 4, 4, hid)                      # (c, h2, w2, hid)
    blk = jnp.transpose(f, (1, 2, 0, 3))                    # (h2, w2, c, hid)
    wide = jnp.stack([blk, jnp.zeros_like(blk)], axis=2)    # (h2, w2, 2, c, hid)
    return wide.reshape(4, 8 * 4 * nc, hid).astype(jnp.bfloat16)


# -----------------------------------------------------------------------------
# Fused whole-network kernel
# -----------------------------------------------------------------------------
def _net_kernel(x_ref,
                w1_ref, s1_ref, b1_ref,
                w2_ref, s2_ref, b2_ref,
                w3_ref, s3_ref, b3_ref,
                fw1_ref, fs1_ref, fb1_ref, fw2_ref, fb2_ref,
                out_ref,
                pad1, pad2, pad3, hp, p3,
                *, NB, nc):
    L = 32 * nc            # lane width of every stage's conv output (= 128 at nc=4)

    def conv_bn_pool_relu(pad, wb, s, b, H):
        """conv3x3(SAME) + folded BN + 2x2 maxpool + relu, fully lane-dense."""
        rows = NB * H
        in_lanes = pad.shape[2]
        acc = None
        for dy in range(3):                          # 3 MXU matmuls, K = in_lanes
            a = pad[:, dy:dy + H, :].reshape(rows, in_lanes).astype(jnp.bfloat16)
            d = jnp.dot(a, wb[dy], preferred_element_type=jnp.float32)
            acc = d if acc is None else acc + d
        y0 = acc[:, :L] * s[...] + b[...]            # conv output at spatial w   (+BN)
        y1 = acc[:, L:] * s[...] + b[...]            # conv output at spatial w+1 (+BN)
        hp[0:rows, :] = jnp.maximum(y0, y1)          # W-direction pool pair (valid @ even w)
        half = rows // 2
        ze = hp[pl.ds(0, half, 2), :]                # rows (n, 2*h2)
        zo = hp[pl.ds(1, half, 2), :]                # rows (n, 2*h2 + 1)
        return jnp.maximum(jnp.maximum(ze, zo), 0.0)  # relu(maxpool(.,2)); (NB*H/2, L)

    # ---- stage 1: (NB,32,32,3) -> (NB,16,16,nc) ----
    z96 = jnp.zeros((NB, 1, 96), jnp.float32)
    pad1[:, 0:1, :] = z96                            # zero only the H halo rows
    pad1[:, 33:34, :] = z96
    pad1[:, 1:33, :] = x_ref[...]
    a1 = conv_bn_pool_relu(pad1, w1_ref, s1_ref, b1_ref, 32)

    # ---- stage 2: -> (NB,8,8,2nc) ----
    zL = jnp.zeros((NB, 1, L), jnp.float32)
    pad2[:, 0:1, :] = zL
    pad2[:, 17:18, :] = zL
    pad2[:, 1:17, :] = a1.reshape(NB, 16, L)
    a2 = conv_bn_pool_relu(pad2, w2_ref, s2_ref, b2_ref, 16)

    # ---- stage 3: -> (NB,4,4,4nc) ----
    pad3[:, 0:1, :] = zL
    pad3[:, 9:10, :] = zL
    pad3[:, 1:9, :] = a2.reshape(NB, 8, L)
    a3 = conv_bn_pool_relu(pad3, w3_ref, s3_ref, b3_ref, 8)

    # ---- fc1 (+ folded fcbn1) + relu, then fc2 ----
    # PyTorch's view(-1, 4*4*4nc) flatten order is folded into fw1's blocks, so
    # fc1 is 4 accumulating dots of K = L over the h2 row-slabs of a3.
    p3[...] = a3                                     # (NB*4, L), rows ordered (n, h2)
    accf = None
    for h2 in range(4):
        xs = p3[pl.ds(h2, NB, 4), :].astype(jnp.bfloat16)
        d = jnp.dot(xs, fw1_ref[h2], preferred_element_type=jnp.float32)
        accf = d if accf is None else accf + d
    h = jnp.maximum(accf * fs1_ref[...] + fb1_ref[...], 0.0)
    # TODO(synk): dropout is identity at inference time; not implemented in-kernel.
    out_ref[...] = jnp.dot(h.astype(jnp.bfloat16), fw2_ref[...],
                           preferred_element_type=jnp.float32) + fb2_ref[...]


# -----------------------------------------------------------------------------
# Wrapper
# -----------------------------------------------------------------------------
def net_forward(x_nchw, p, *, block_n=None):
    nc = int(p["s1"].shape[0])
    hid = 4 * nc
    L = 32 * nc
    N = x_nchw.shape[0]
    if block_n is None:
        block_n = 8 if N % 8 == 0 else N
    assert N % block_n == 0, "batch must be divisible by the batch tile"
    NB = block_n

    # NCHW -> rows (n, h), lanes (w, c)
    x = jnp.transpose(x_nchw.astype(jnp.float32), (0, 2, 3, 1)).reshape(N, 32, 32 * 3)

    w1b = _band_matrices(p["w1"], W_in=32, in_step=1)        # (3,  96, 2L)
    w2b = _band_matrices(p["w2"], W_in=16, in_step=2)        # (3,   L, 2L)
    w3b = _band_matrices(p["w3"], W_in=8,  in_step=2)        # (3,   L, 2L)
    s1 = jnp.tile(p["s1"], 32).reshape(1, L)
    b1 = jnp.tile(p["bb1"], 32).reshape(1, L)
    s2 = jnp.tile(p["s2"], 16).reshape(1, L)
    b2 = jnp.tile(p["bb2"], 16).reshape(1, L)
    s3 = jnp.tile(p["s3"], 8).reshape(1, L)
    b3 = jnp.tile(p["bb3"], 8).reshape(1, L)
    fw1b = _fc1_blocks(p["fw1"], nc)                         # (4, L, hid) bf16
    fs1 = p["fs1"].reshape(1, hid)
    fb1 = p["fb1"].reshape(1, hid)
    fw2 = p["fw2"].astype(jnp.bfloat16)                      # (hid, 10)
    fb2 = p["fb2"].reshape(1, 10)

    def full(a):
        return pl.BlockSpec(a.shape, lambda i: (0,) * a.ndim)

    grid_spec = pltpu.PrefetchScalarGridSpec(
        num_scalar_prefetch=0,
        grid=(N // NB,),
        in_specs=[
            pl.BlockSpec((NB, 32, 96), lambda i: (i, 0, 0)),
            full(w1b), full(s1), full(b1),
            full(w2b), full(s2), full(b2),
            full(w3b), full(s3), full(b3),
            full(fw1b), full(fs1), full(fb1), full(fw2), full(fb2),
        ],
        out_specs=pl.BlockSpec((NB, 10), lambda i: (i, 0)),
        scratch_shapes=[
            pltpu.VMEM((NB, 34, 96), jnp.float32),    # pad1 (H halo only)
            pltpu.VMEM((NB, 18, L), jnp.float32),     # pad2
            pltpu.VMEM((NB, 10, L), jnp.float32),     # pad3
            pltpu.VMEM((NB * 32, L), jnp.float32),    # hp: W-pooled rows (shared by all stages)
            pltpu.VMEM((NB * 4, L), jnp.float32),     # p3: stage-3 pooled activations
        ],
    )
    kernel = functools.partial(_net_kernel, NB=NB, nc=nc)
    return pl.pallas_call(
        kernel,
        out_shape=jax.ShapeDtypeStruct((N, 10), jnp.float32),
        grid_spec=grid_spec,
        compiler_params=pltpu.CompilerParams(dimension_semantics=("parallel",)),
    )(x, w1b, s1, b1, w2b, s2, b2, w3b, s3, b3, fw1b, fs1, fb1, fw2, fb2)


# -----------------------------------------------------------------------------
# Pure-JAX reference (same bf16-operand / f32-accumulate matmul rounding as the
# kernel; BN fold, pooling and relu stay in f32)
# -----------------------------------------------------------------------------
def net_forward_ref(x_nchw, p):
    x = jnp.transpose(x_nchw.astype(jnp.float32), (0, 2, 3, 1))

    def block(t, w, s, b):
        y = lax.conv_general_dilated(
            t.astype(jnp.bfloat16), w.astype(jnp.bfloat16),
            window_strides=(1, 1), padding="SAME",
            dimension_numbers=("NHWC", "HWIO", "NHWC"),
            preferred_element_type=jnp.float32)
        y = y * s + b
        n, hh, ww, c = y.shape
        y = y.reshape(n, hh // 2, 2, ww // 2, 2, c).max(axis=(2, 4))
        return jnp.maximum(y, 0.0)

    t = block(x, p["w1"], p["s1"], p["bb1"])
    t = block(t, p["w2"], p["s2"], p["bb2"])
    t = block(t, p["w3"], p["s3"], p["bb3"])
    t = jnp.transpose(t, (0, 3, 1, 2)).reshape(t.shape[0], -1)      # PyTorch flatten
    h = jnp.dot(t.astype(jnp.bfloat16), p["fw1"].astype(jnp.bfloat16),
                preferred_element_type=jnp.float32) * p["fs1"] + p["fb1"]
    h = jnp.maximum(h, 0.0)
    return jnp.dot(h.astype(jnp.bfloat16), p["fw2"].astype(jnp.bfloat16),
                   preferred_element_type=jnp.float32) + p["fb2"]


# -----------------------------------------------------------------------------
# Parameter construction (deterministic, synthetic)
# -----------------------------------------------------------------------------
def _fold_bn(gamma, beta, running_mean, running_var, conv_bias, eps=1e-5):
    scale = gamma / jnp.sqrt(running_var + eps)
    bias = beta + scale * (conv_bias - running_mean)
    return scale, bias


def init_params(key, num_channels):
    nc = num_channels
    ks = jax.random.split(key, 16)

    def conv_w(k, cin, cout):
        return jax.random.normal(k, (3, 3, cin, cout), jnp.float32) / jnp.sqrt(9.0 * cin)

    def lin_w(k, fin, fout):
        return jax.random.normal(k, (fin, fout), jnp.float32) / jnp.sqrt(float(fin))

    def bn_params(k, c):
        g = 1.0 + 0.1 * jax.random.normal(k, (c,), jnp.float32)                     # gamma
        b = 0.1 * jax.random.normal(jax.random.fold_in(k, 1), (c,), jnp.float32)    # beta
        rm = jnp.zeros((c,), jnp.float32)                                           # running mean
        rv = jnp.ones((c,), jnp.float32)                                            # running var
        return g, b, rm, rv

    p = {}
    chans = [(3, nc), (nc, 2 * nc), (2 * nc, 4 * nc)]
    for i, (cin, cout) in enumerate(chans, start=1):
        w = conv_w(ks[3 * i - 3], cin, cout)
        cb = 0.1 * jax.random.normal(ks[3 * i - 2], (cout,), jnp.float32)
        g, b, rm, rv = bn_params(ks[3 * i - 1], cout)
        s, bb = _fold_bn(g, b, rm, rv, cb)
        p[f"w{i}"], p[f"s{i}"], p[f"bb{i}"] = w, s, bb

    flat = 4 * 4 * 4 * nc
    hid = 4 * nc
    p["fw1"] = lin_w(ks[9], flat, hid)
    fb1_lin = 0.1 * jax.random.normal(ks[10], (hid,), jnp.float32)
    g, b, rm, rv = bn_params(ks[11], hid)
    p["fs1"], p["fb1"] = _fold_bn(g, b, rm, rv, fb1_lin)
    p["fw2"] = lin_w(ks[12], hid, 10)
    p["fb2"] = 0.1 * jax.random.normal(ks[13], (10,), jnp.float32)
    return p


if __name__ == "__main__":
    num_channels = 4          # params.num_channels
    key = jax.random.PRNGKey(0)
    k_x, k_p = jax.random.split(key)

    # Input must be 32x32 so three 2x2 maxpools give the 4x4 spatial grid fc1 expects.
    batch = 16                # batch tile = 8 -> grid of 2 "parallel" steps
    x = jax.random.normal(k_x, (batch, 3, 32, 32), jnp.float32)
    params = init_params(k_p, num_channels)

    out = jax.jit(net_forward)(x, params)
    out = jax.block_until_ready(out)
    assert out.shape == (batch, 10), out.shape
    assert bool(jnp.all(jnp.isfinite(out)))

    ref = net_forward_ref(x, params)
    err = float(jnp.max(jnp.abs(out - ref)))
    assert bool(jnp.allclose(out, ref, rtol=1e-2, atol=1e-2)), f"max abs err {err}"

    print("KERNEL_OK")
</pallas_src>

<mosaic_0001>
module attributes {stable_mosaic.version = 11 : i64} {
  func.func @_net_kernel(%arg0: i32, %arg1: memref<8x32x96xf32, #tpu.memory_space<vmem>>, %arg2: memref<3x96x256xbf16, #tpu.memory_space<vmem>>, %arg3: memref<1x128xf32, #tpu.memory_space<vmem>>, %arg4: memref<1x128xf32, #tpu.memory_space<vmem>>, %arg5: memref<3x128x256xbf16, #tpu.memory_space<vmem>>, %arg6: memref<1x128xf32, #tpu.memory_space<vmem>>, %arg7: memref<1x128xf32, #tpu.memory_space<vmem>>, %arg8: memref<3x128x256xbf16, #tpu.memory_space<vmem>>, %arg9: memref<1x128xf32, #tpu.memory_space<vmem>>, %arg10: memref<1x128xf32, #tpu.memory_space<vmem>>, %arg11: memref<4x128x16xbf16, #tpu.memory_space<vmem>>, %arg12: memref<1x16xf32, #tpu.memory_space<vmem>>, %arg13: memref<1x16xf32, #tpu.memory_space<vmem>>, %arg14: memref<16x10xbf16, #tpu.memory_space<vmem>>, %arg15: memref<1x10xf32, #tpu.memory_space<vmem>>, %arg16: memref<8x10xf32, #tpu.memory_space<vmem>>, %arg17: memref<8x34x96xf32, #tpu.memory_space<vmem>>, %arg18: memref<8x18x128xf32, #tpu.memory_space<vmem>>, %arg19: memref<8x10x128xf32, #tpu.memory_space<vmem>>, %arg20: memref<256x128xf32, #tpu.memory_space<vmem>>, %arg21: memref<32x128xf32, #tpu.memory_space<vmem>>) attributes {dimension_semantics = [#tpu.dimension_semantics<parallel>], iteration_bounds = array<i64: 2>, scalar_prefetch = 0 : i64, scratch_operands = 5 : i64, tpu.core_type = #tpu.core_type<tc>, window_params = [{transform_indices = @transform_0, window_bounds = array<i64: 8, 32, 96>}, {pipeline_mode = #tpu.pipeline_mode<synchronous>, transform_indices = @transform_1, window_bounds = array<i64: 3, 96, 256>}, {pipeline_mode = #tpu.pipeline_mode<synchronous>, transform_indices = @transform_2, window_bounds = array<i64: 1, 128>}, {pipeline_mode = #tpu.pipeline_mode<synchronous>, transform_indices = @transform_3, window_bounds = array<i64: 1, 128>}, {pipeline_mode = #tpu.pipeline_mode<synchronous>, transform_indices = @transform_4, window_bounds = array<i64: 3, 128, 256>}, {pipeline_mode = #tpu.pipeline_mode<synchronous>, transform_indices = @transform_5, window_bounds = array<i64: 1, 128>}, {pipeline_mode = #tpu.pipeline_mode<synchronous>, transform_indices = @transform_6, window_bounds = array<i64: 1, 128>}, {pipeline_mode = #tpu.pipeline_mode<synchronous>, transform_indices = @transform_7, window_bounds = array<i64: 3, 128, 256>}, {pipeline_mode = #tpu.pipeline_mode<synchronous>, transform_indices = @transform_8, window_bounds = array<i64: 1, 128>}, {pipeline_mode = #tpu.pipeline_mode<synchronous>, transform_indices = @transform_9, window_bounds = array<i64: 1, 128>}, {pipeline_mode = #tpu.pipeline_mode<synchronous>, transform_indices = @transform_10, window_bounds = array<i64: 4, 128, 16>}, {pipeline_mode = #tpu.pipeline_mode<synchronous>, transform_indices = @transform_11, window_bounds = array<i64: 1, 16>}, {pipeline_mode = #tpu.pipeline_mode<synchronous>, transform_indices = @transform_12, window_bounds = array<i64: 1, 16>}, {pipeline_mode = #tpu.pipeline_mode<synchronous>, transform_indices = @transform_13, window_bounds = array<i64: 16, 10>}, {pipeline_mode = #tpu.pipeline_mode<synchronous>, transform_indices = @transform_14, window_bounds = array<i64: 1, 10>}, {transform_indices = @transform_15, window_bounds = array<i64: 8, 10>}]} {
    %cst = arith.constant 0.000000e+00 : f32
    %0 = vector.broadcast %cst : f32 to vector<8x1x96xf32>
    %c0 = arith.constant 0 : index
    %c0_0 = arith.constant 0 : index
    %c0_1 = arith.constant 0 : index
    %1 = vector.load %arg17[%c0, %c0_0, %c0_1] : memref<8x34x96xf32, #tpu.memory_space<vmem>>, vector<8x1x96xf32>
    tpu.vector_store %arg17[%c0, %c0_0, %c0_1], %0 {strides = array<i32>} : memref<8x34x96xf32, #tpu.memory_space<vmem>>, vector<8x1x96xf32>,
    %c0_2 = arith.constant 0 : index
    %c33 = arith.constant 33 : index
    %c0_3 = arith.constant 0 : index
    %2 = vector.load %arg17[%c0_2, %c33, %c0_3] : memref<8x34x96xf32, #tpu.memory_space<vmem>>, vector<8x1x96xf32>
    tpu.vector_store %arg17[%c0_2, %c33, %c0_3], %0 {strides = array<i32>} : memref<8x34x96xf32, #tpu.memory_space<vmem>>, vector<8x1x96xf32>,
    %c0_4 = arith.constant 0 : index
    %c0_5 = arith.constant 0 : index
    %c0_6 = arith.constant 0 : index
    %3 = vector.load %arg1[%c0_4, %c0_5, %c0_6] : memref<8x32x96xf32, #tpu.memory_space<vmem>>, vector<8x32x96xf32>
    %c0_7 = arith.constant 0 : index
    %c1 = arith.constant 1 : index
    %c0_8 = arith.constant 0 : index
    %4 = vector.load %arg17[%c0_7, %c1, %c0_8] : memref<8x34x96xf32, #tpu.memory_space<vmem>>, vector<8x32x96xf32>
    tpu.vector_store %arg17[%c0_7, %c1, %c0_8], %3 {strides = array<i32>} : memref<8x34x96xf32, #tpu.memory_space<vmem>>, vector<8x32x96xf32>,
    %c0_9 = arith.constant 0 : index
    %c0_10 = arith.constant 0 : index
    %c0_11 = arith.constant 0 : index
    %5 = vector.load %arg17[%c0_9, %c0_10, %c0_11] : memref<8x34x96xf32, #tpu.memory_space<vmem>>, vector<8x32x96xf32>
    %6 = vector.shape_cast %5 : vector<8x32x96xf32> to vector<256x96xf32>
    %7 = arith.truncf %6 : vector<256x96xf32> to vector<256x96xbf16>
    %c0_12 = arith.constant 0 : index
    %c0_13 = arith.constant 0 : index
    %c0_14 = arith.constant 0 : index
    %8 = vector.load %arg2[%c0_12, %c0_13, %c0_14] : memref<3x96x256xbf16, #tpu.memory_space<vmem>>, vector<1x96x256xbf16>
    %9 = vector.shape_cast %8 : vector<1x96x256xbf16> to vector<96x256xbf16>
    %cst_15 = arith.constant dense<0.000000e+00> : vector<256x256xf32>
    %10 = tpu.matmul %7, %9, %cst_15 {dimension_numbers = #tpu.dot_dimension_numbers<[1], [0], [0], [1], [0, 0, 1, 1], [], []>} : vector<256x96xbf16>, vector<96x256xbf16>, vector<256x256xf32> -> vector<256x256xf32>
    %c0_16 = arith.constant 0 : index
    %c1_17 = arith.constant 1 : index
    %c0_18 = arith.constant 0 : index
    %11 = vector.load %arg17[%c0_16, %c1_17, %c0_18] : memref<8x34x96xf32, #tpu.memory_space<vmem>>, vector<8x32x96xf32>
    %12 = vector.shape_cast %11 : vector<8x32x96xf32> to vector<256x96xf32>
    %13 = arith.truncf %12 : vector<256x96xf32> to vector<256x96xbf16>
    %c1_19 = arith.constant 1 : index
    %c0_20 = arith.constant 0 : index
    %c0_21 = arith.constant 0 : index
    %14 = vector.load %arg2[%c1_19, %c0_20, %c0_21] : memref<3x96x256xbf16, #tpu.memory_space<vmem>>, vector<1x96x256xbf16>
    %15 = vector.shape_cast %14 : vector<1x96x256xbf16> to vector<96x256xbf16>
    %cst_22 = arith.constant dense<0.000000e+00> : vector<256x256xf32>
    %16 = tpu.matmul %13, %15, %cst_22 {dimension_numbers = #tpu.dot_dimension_numbers<[1], [0], [0], [1], [0, 0, 1, 1], [], []>} : vector<256x96xbf16>, vector<96x256xbf16>, vector<256x256xf32> -> vector<256x256xf32>
    %17 = arith.addf %10, %16 : vector<256x256xf32>
    %c0_23 = arith.constant 0 : index
    %c2 = arith.constant 2 : index
    %c0_24 = arith.constant 0 : index
    %18 = vector.load %arg17[%c0_23, %c2, %c0_24] : memref<8x34x96xf32, #tpu.memory_space<vmem>>, vector<8x32x96xf32>
    %19 = vector.shape_cast %18 : vector<8x32x96xf32> to vector<256x96xf32>
    %20 = arith.truncf %19 : vector<256x96xf32> to vector<256x96xbf16>
    %c2_25 = arith.constant 2 : index
    %c0_26 = arith.constant 0 : index
    %c0_27 = arith.constant 0 : index
    %21 = vector.load %arg2[%c2_25, %c0_26, %c0_27] : memref<3x96x256xbf16, #tpu.memory_space<vmem>>, vector<1x96x256xbf16>
    %22 = vector.shape_cast %21 : vector<1x96x256xbf16> to vector<96x256xbf16>
    %cst_28 = arith.constant dense<0.000000e+00> : vector<256x256xf32>
    %23 = tpu.matmul %20, %22, %cst_28 {dimension_numbers = #tpu.dot_dimension_numbers<[1], [0], [0], [1], [0, 0, 1, 1], [], []>} : vector<256x96xbf16>, vector<96x256xbf16>, vector<256x256xf32> -> vector<256x256xf32>
    %24 = arith.addf %17, %23 : vector<256x256xf32>
    %25 = vector.extract_strided_slice %24 {offsets = [0, 0], sizes = [256, 128], strides = [1, 1]} : vector<256x256xf32> to vector<256x128xf32>
    %c0_29 = arith.constant 0 : index
    %c0_30 = arith.constant 0 : index
    %26 = vector.load %arg3[%c0_29, %c0_30] : memref<1x128xf32, #tpu.memory_space<vmem>>, vector<1x128xf32>
    %27 = vector.broadcast %26 : vector<1x128xf32> to vector<256x128xf32>
    %28 = arith.mulf %25, %27 : vector<256x128xf32>
    %c0_31 = arith.constant 0 : index
    %c0_32 = arith.constant 0 : index
    %29 = vector.load %arg4[%c0_31, %c0_32] : memref<1x128xf32, #tpu.memory_space<vmem>>, vector<1x128xf32>
    %30 = vector.broadcast %29 : vector<1x128xf32> to vector<256x128xf32>
    %31 = arith.addf %28, %30 : vector<256x128xf32>
    %32 = vector.extract_strided_slice %24 {offsets = [0, 128], sizes = [256, 128], strides = [1, 1]} : vector<256x256xf32> to vector<256x128xf32>
    %c0_33 = arith.constant 0 : index
    %c0_34 = arith.constant 0 : index
    %33 = vector.load %arg3[%c0_33, %c0_34] : memref<1x128xf32, #tpu.memory_space<vmem>>, vector<1x128xf32>
    %34 = vector.broadcast %33 : vector<1x128xf32> to vector<256x128xf32>
    %35 = arith.mulf %32, %34 : vector<256x128xf32>
    %c0_35 = arith.constant 0 : index
    %c0_36 = arith.constant 0 : index
    %36 = vector.load %arg4[%c0_35, %c0_36] : memref<1x128xf32, #tpu.memory_space<vmem>>, vector<1x128xf32>
    %37 = vector.broadcast %36 : vector<1x128xf32> to vector<256x128xf32>
    %38 = arith.addf %35, %37 : vector<256x128xf32>
    %39 = arith.maximumf %31, %38 : vector<256x128xf32>
    %c0_37 = arith.constant 0 : index
    %c0_38 = arith.constant 0 : index
    %40 = vector.load %arg20[%c0_37, %c0_38] : memref<256x128xf32, #tpu.memory_space<vmem>>, vector<256x128xf32>
    tpu.vector_store %arg20[%c0_37, %c0_38], %39 {strides = array<i32>} : memref<256x128xf32, #tpu.memory_space<vmem>>, vector<256x128xf32>,
    %c0_39 = arith.constant 0 : index
    %c0_40 = arith.constant 0 : index
    %41 = tpu.strided_load %arg20[%c0_39, %c0_40] {strides = array<i32: 2, 1>} : memref<256x128xf32, #tpu.memory_space<vmem>>, vector<128x128xf32>
    %c1_41 = arith.constant 1 : index
    %c0_42 = arith.constant 0 : index
    %42 = tpu.strided_load %arg20[%c1_41, %c0_42] {strides = array<i32: 2, 1>} : memref<256x128xf32, #tpu.memory_space<vmem>>, vector<128x128xf32>
    %43 = arith.maximumf %41, %42 : vector<128x128xf32>
    %cst_43 = arith.constant 0.000000e+00 : f32
    %44 = vector.broadcast %cst_43 : f32 to vector<128x128xf32>
    %45 = arith.maximumf %43, %44 : vector<128x128xf32>
    %cst_44 = arith.constant 0.000000e+00 : f32
    %46 = vector.broadcast %cst_44 : f32 to vector<8x1x128xf32>
    %c0_45 = arith.constant 0 : index
    %c0_46 = arith.constant 0 : index
    %c0_47 = arith.constant 0 : index
    %47 = vector.load %arg18[%c0_45, %c0_46, %c0_47] : memref<8x18x128xf32, #tpu.memory_space<vmem>>, vector<8x1x128xf32>
    tpu.vector_store %arg18[%c0_45, %c0_46, %c0_47], %46 {strides = array<i32>} : memref<8x18x128xf32, #tpu.memory_space<vmem>>, vector<8x1x128xf32>,
    %c0_48 = arith.constant 0 : index
    %c17 = arith.constant 17 : index
    %c0_49 = arith.constant 0 : index
    %48 = vector.load %arg18[%c0_48, %c17, %c0_49] : memref<8x18x128xf32, #tpu.memory_space<vmem>>, vector<8x1x128xf32>
    tpu.vector_store %arg18[%c0_48, %c17, %c0_49], %46 {strides = array<i32>} : memref<8x18x128xf32, #tpu.memory_space<vmem>>, vector<8x1x128xf32>,
    %49 = vector.shape_cast %45 : vector<128x128xf32> to vector<8x16x128xf32>
    %c0_50 = arith.constant 0 : index
    %c1_51 = arith.constant 1 : index
    %c0_52 = arith.constant 0 : index
    %50 = vector.load %arg18[%c0_50, %c1_51, %c0_52] : memref<8x18x128xf32, #tpu.memory_space<vmem>>, vector<8x16x128xf32>
    tpu.vector_store %arg18[%c0_50, %c1_51, %c0_52], %49 {strides = array<i32>} : memref<8x18x128xf32, #tpu.memory_space<vmem>>, vector<8x16x128xf32>,
    %c0_53 = arith.constant 0 : index
    %c0_54 = arith.constant 0 : index
    %c0_55 = arith.constant 0 : index
    %51 = vector.load %arg18[%c0_53, %c0_54, %c0_55] : memref<8x18x128xf32, #tpu.memory_space<vmem>>, vector<8x16x128xf32>
    %52 = vector.shape_cast %51 : vector<8x16x128xf32> to vector<128x128xf32>
    %53 = arith.truncf %52 : vector<128x128xf32> to vector<128x128xbf16>
    %c0_56 = arith.constant 0 : index
    %c0_57 = arith.constant 0 : index
    %c0_58 = arith.constant 0 : index
    %54 = vector.load %arg5[%c0_56, %c0_57, %c0_58] : memref<3x128x256xbf16, #tpu.memory_space<vmem>>, vector<1x128x256xbf16>
    %55 = vector.shape_cast %54 : vector<1x128x256xbf16> to vector<128x256xbf16>
    %cst_59 = arith.constant dense<0.000000e+00> : vector<128x256xf32>
    %56 = tpu.matmul %53, %55, %cst_59 {dimension_numbers = #tpu.dot_dimension_numbers<[1], [0], [0], [1], [0, 0, 1, 1], [], []>} : vector<128x128xbf16>, vector<128x256xbf16>, vector<128x256xf32> -> vector<128x256xf32>
    %c0_60 = arith.constant 0 : index
    %c1_61 = arith.constant 1 : index
    %c0_62 = arith.constant 0 : index
    %57 = vector.load %arg18[%c0_60, %c1_61, %c0_62] : memref<8x18x128xf32, #tpu.memory_space<vmem>>, vector<8x16x128xf32>
    %58 = vector.shape_cast %57 : vector<8x16x128xf32> to vector<128x128xf32>
    %59 = arith.truncf %58 : vector<128x128xf32> to vector<128x128xbf16>
    %c1_63 = arith.constant 1 : index
    %c0_64 = arith.constant 0 : index
    %c0_65 = arith.constant 0 : index
    %60 = vector.load %arg5[%c1_63, %c0_64, %c0_65] : memref<3x128x256xbf16, #tpu.memory_space<vmem>>, vector<1x128x256xbf16>
    %61 = vector.shape_cast %60 : vector<1x128x256xbf16> to vector<128x256xbf16>
    %cst_66 = arith.constant dense<0.000000e+00> : vector<128x256xf32>
    %62 = tpu.matmul %59, %61, %cst_66 {dimension_numbers = #tpu.dot_dimension_numbers<[1], [0], [0], [1], [0, 0, 1, 1], [], []>} : vector<128x128xbf16>, vector<128x256xbf16>, vector<128x256xf32> -> vector<128x256xf32>
    %63 = arith.addf %56, %62 : vector<128x256xf32>
    %c0_67 = arith.constant 0 : index
    %c2_68 = arith.constant 2 : index
    %c0_69 = arith.constant 0 : index
    %64 = vector.load %arg18[%c0_67, %c2_68, %c0_69] : memref<8x18x128xf32, #tpu.memory_space<vmem>>, vector<8x16x128xf32>
    %65 = vector.shape_cast %64 : vector<8x16x128xf32> to vector<128x128xf32>
    %66 = arith.truncf %65 : vector<128x128xf32> to vector<128x128xbf16>
    %c2_70 = arith.constant 2 : index
    %c0_71 = arith.constant 0 : index
    %c0_72 = arith.constant 0 : index
    %67 = vector.load %arg5[%c2_70, %c0_71, %c0_72] : memref<3x128x256xbf16, #tpu.memory_space<vmem>>, vector<1x128x256xbf16>
    %68 = vector.shape_cast %67 : vector<1x128x256xbf16> to vector<128x256xbf16>
    %cst_73 = arith.constant dense<0.000000e+00> : vector<128x256xf32>
    %69 = tpu.matmul %66, %68, %cst_73 {dimension_numbers = #tpu.dot_dimension_numbers<[1], [0], [0], [1], [0, 0, 1, 1], [], []>} : vector<128x128xbf16>, vector<128x256xbf16>, vector<128x256xf32> -> vector<128x256xf32>
    %70 = arith.addf %63, %69 : vector<128x256xf32>
    %71 = vector.extract_strided_slice %70 {offsets = [0, 0], sizes = [128, 128], strides = [1, 1]} : vector<128x256xf32> to vector<128x128xf32>
    %c0_74 = arith.constant 0 : index
    %c0_75 = arith.constant 0 : index
    %72 = vector.load %arg6[%c0_74, %c0_75] : memref<1x128xf32, #tpu.memory_space<vmem>>, vector<1x128xf32>
    %73 = vector.broadcast %72 : vector<1x128xf32> to vector<128x128xf32>
    %74 = arith.mulf %71, %73 : vector<128x128xf32>
    %c0_76 = arith.constant 0 : index
    %c0_77 = arith.constant 0 : index
    %75 = vector.load %arg7[%c0_76, %c0_77] : memref<1x128xf32, #tpu.memory_space<vmem>>, vector<1x128xf32>
    %76 = vector.broadcast %75 : vector<1x128xf32> to vector<128x128xf32>
    %77 = arith.addf %74, %76 : vector<128x128xf32>
    %78 = vector.extract_strided_slice %70 {offsets = [0, 128], sizes = [128, 128], strides = [1, 1]} : vector<128x256xf32> to vector<128x128xf32>
    %c0_78 = arith.constant 0 : index
    %c0_79 = arith.constant 0 : index
    %79 = vector.load %arg6[%c0_78, %c0_79] : memref<1x128xf32, #tpu.memory_space<vmem>>, vector<1x128xf32>
    %80 = vector.broadcast %79 : vector<1x128xf32> to vector<128x128xf32>
    %81 = arith.mulf %78, %80 : vector<128x128xf32>
    %c0_80 = arith.constant 0 : index
    %c0_81 = arith.constant 0 : index
    %82 = vector.load %arg7[%c0_80, %c0_81] : memref<1x128xf32, #tpu.memory_space<vmem>>, vector<1x128xf32>
    %83 = vector.broadcast %82 : vector<1x128xf32> to vector<128x128xf32>
    %84 = arith.addf %81, %83 : vector<128x128xf32>
    %85 = arith.maximumf %77, %84 : vector<128x128xf32>
    %c0_82 = arith.constant 0 : index
    %c0_83 = arith.constant 0 : index
    %86 = vector.load %arg20[%c0_82, %c0_83] : memref<256x128xf32, #tpu.memory_space<vmem>>, vector<128x128xf32>
    tpu.vector_store %arg20[%c0_82, %c0_83], %85 {strides = array<i32>} : memref<256x128xf32, #tpu.memory_space<vmem>>, vector<128x128xf32>,
    %c0_84 = arith.constant 0 : index
    %c0_85 = arith.constant 0 : index
    %87 = tpu.strided_load %arg20[%c0_84, %c0_85] {strides = array<i32: 2, 1>} : memref<256x128xf32, #tpu.memory_space<vmem>>, vector<64x128xf32>
    %c1_86 = arith.constant 1 : index
    %c0_87 = arith.constant 0 : index
    %88 = tpu.strided_load %arg20[%c1_86, %c0_87] {strides = array<i32: 2, 1>} : memref<256x128xf32, #tpu.memory_space<vmem>>, vector<64x128xf32>
    %89 = arith.maximumf %87, %88 : vector<64x128xf32>
    %cst_88 = arith.constant 0.000000e+00 : f32
    %90 = vector.broadcast %cst_88 : f32 to vector<64x128xf32>
    %91 = arith.maximumf %89, %90 : vector<64x128xf32>
    %c0_89 = arith.constant 0 : index
    %c0_90 = arith.constant 0 : index
    %c0_91 = arith.constant 0 : index
    %92 = vector.load %arg19[%c0_89, %c0_90, %c0_91] : memref<8x10x128xf32, #tpu.memory_space<vmem>>, vector<8x1x128xf32>
    tpu.vector_store %arg19[%c0_89, %c0_90, %c0_91], %46 {strides = array<i32>} : memref<8x10x128xf32, #tpu.memory_space<vmem>>, vector<8x1x128xf32>,
    %c0_92 = arith.constant 0 : index
    %c9 = arith.constant 9 : index
    %c0_93 = arith.constant 0 : index
    %93 = vector.load %arg19[%c0_92, %c9, %c0_93] : memref<8x10x128xf32, #tpu.memory_space<vmem>>, vector<8x1x128xf32>
    tpu.vector_store %arg19[%c0_92, %c9, %c0_93], %46 {strides = array<i32>} : memref<8x10x128xf32, #tpu.memory_space<vmem>>, vector<8x1x128xf32>,
    %94 = vector.shape_cast %91 : vector<64x128xf32> to vector<8x8x128xf32>
    %c0_94 = arith.constant 0 : index
    %c1_95 = arith.constant 1 : index
    %c0_96 = arith.constant 0 : index
    %95 = vector.load %arg19[%c0_94, %c1_95, %c0_96] : memref<8x10x128xf32, #tpu.memory_space<vmem>>, vector<8x8x128xf32>
    tpu.vector_store %arg19[%c0_94, %c1_95, %c0_96], %94 {strides = array<i32>} : memref<8x10x128xf32, #tpu.memory_space<vmem>>, vector<8x8x128xf32>,
    %c0_97 = arith.constant 0 : index
    %c0_98 = arith.constant 0 : index
    %c0_99 = arith.constant 0 : index
    %96 = vector.load %arg19[%c0_97, %c0_98, %c0_99] : memref<8x10x128xf32, #tpu.memory_space<vmem>>, vector<8x8x128xf32>
    %97 = vector.shape_cast %96 : vector<8x8x128xf32> to vector<64x128xf32>
    %98 = arith.truncf %97 : vector<64x128xf32> to vector<64x128xbf16>
    %c0_100 = arith.constant 0 : index
    %c0_101 = arith.constant 0 : index
    %c0_102 = arith.constant 0 : index
    %99 = vector.load %arg8[%c0_100, %c0_101, %c0_102] : memref<3x128x256xbf16, #tpu.memory_space<vmem>>, vector<1x128x256xbf16>
    %100 = vector.shape_cast %99 : vector<1x128x256xbf16> to vector<128x256xbf16>
    %cst_103 = arith.constant dense<0.000000e+00> : vector<64x256xf32>
    %101 = tpu.matmul %98, %100, %cst_103 {dimension_numbers = #tpu.dot_dimension_numbers<[1], [0], [0], [1], [0, 0, 1, 1], [], []>} : vector<64x128xbf16>, vector<128x256xbf16>, vector<64x256xf32> -> vector<64x256xf32>
    %c0_104 = arith.constant 0 : index
    %c1_105 = arith.constant 1 : index
    %c0_106 = arith.constant 0 : index
    %102 = vector.load %arg19[%c0_104, %c1_105, %c0_106] : memref<8x10x128xf32, #tpu.memory_space<vmem>>, vector<8x8x128xf32>
    %103 = vector.shape_cast %102 : vector<8x8x128xf32> to vector<64x128xf32>
    %104 = arith.truncf %103 : vector<64x128xf32> to vector<64x128xbf16>
    %c1_107 = arith.constant 1 : index
    %c0_108 = arith.constant 0 : index
    %c0_109 = arith.constant 0 : index
    %105 = vector.load %arg8[%c1_107, %c0_108, %c0_109] : memref<3x128x256xbf16, #tpu.memory_space<vmem>>, vector<1x128x256xbf16>
    %106 = vector.shape_cast %105 : vector<1x128x256xbf16> to vector<128x256xbf16>
    %cst_110 = arith.constant dense<0.000000e+00> : vector<64x256xf32>
    %107 = tpu.matmul %104, %106, %cst_110 {dimension_numbers = #tpu.dot_dimension_numbers<[1], [0], [0], [1], [0, 0, 1, 1], [], []>} : vector<64x128xbf16>, vector<128x256xbf16>, vector<64x256xf32> -> vector<64x256xf32>
    %108 = arith.addf %101, %107 : vector<64x256xf32>
    %c0_111 = arith.constant 0 : index
    %c2_112 = arith.constant 2 : index
    %c0_113 = arith.constant 0 : index
    %109 = vector.load %arg19[%c0_111, %c2_112, %c0_113] : memref<8x10x128xf32, #tpu.memory_space<vmem>>, vector<8x8x128xf32>
    %110 = vector.shape_cast %109 : vector<8x8x128xf32> to vector<64x128xf32>
    %111 = arith.truncf %110 : vector<64x128xf32> to vector<64x128xbf16>
    %c2_114 = arith.constant 2 : index
    %c0_115 = arith.constant 0 : index
    %c0_116 = arith.constant 0 : index
    %112 = vector.load %arg8[%c2_114, %c0_115, %c0_116] : memref<3x128x256xbf16, #tpu.memory_space<vmem>>, vector<1x128x256xbf16>
    %113 = vector.shape_cast %112 : vector<1x128x256xbf16> to vector<128x256xbf16>
    %cst_117 = arith.constant dense<0.000000e+00> : vector<64x256xf32>
    %114 = tpu.matmul %111, %113, %cst_117 {dimension_numbers = #tpu.dot_dimension_numbers<[1], [0], [0], [1], [0, 0, 1, 1], [], []>} : vector<64x128xbf16>, vector<128x256xbf16>, vector<64x256xf32> -> vector<64x256xf32>
    %115 = arith.addf %108, %114 : vector<64x256xf32>
    %116 = vector.extract_strided_slice %115 {offsets = [0, 0], sizes = [64, 128], strides = [1, 1]} : vector<64x256xf32> to vector<64x128xf32>
    %c0_118 = arith.constant 0 : index
    %c0_119 = arith.constant 0 : index
    %117 = vector.load %arg9[%c0_118, %c0_119] : memref<1x128xf32, #tpu.memory_space<vmem>>, vector<1x128xf32>
    %118 = vector.broadcast %117 : vector<1x128xf32> to vector<64x128xf32>
    %119 = arith.mulf %116, %118 : vector<64x128xf32>
    %c0_120 = arith.constant 0 : index
    %c0_121 = arith.constant 0 : index
    %120 = vector.load %arg10[%c0_120, %c0_121] : memref<1x128xf32, #tpu.memory_space<vmem>>, vector<1x128xf32>
    %121 = vector.broadcast %120 : vector<1x128xf32> to vector<64x128xf32>
    %122 = arith.addf %119, %121 : vector<64x128xf32>
    %123 = vector.extract_strided_slice %115 {offsets = [0, 128], sizes = [64, 128], strides = [1, 1]} : vector<64x256xf32> to vector<64x128xf32>
    %c0_122 = arith.constant 0 : index
    %c0_123 = arith.constant 0 : index
    %124 = vector.load %arg9[%c0_122, %c0_123] : memref<1x128xf32, #tpu.memory_space<vmem>>, vector<1x128xf32>
    %125 = vector.broadcast %124 : vector<1x128xf32> to vector<64x128xf32>
    %126 = arith.mulf %123, %125 : vector<64x128xf32>
    %c0_124 = arith.constant 0 : index
    %c0_125 = arith.constant 0 : index
    %127 = vector.load %arg10[%c0_124, %c0_125] : memref<1x128xf32, #tpu.memory_space<vmem>>, vector<1x128xf32>
    %128 = vector.broadcast %127 : vector<1x128xf32> to vector<64x128xf32>
    %129 = arith.addf %126, %128 : vector<64x128xf32>
    %130 = arith.maximumf %122, %129 : vector<64x128xf32>
    %c0_126 = arith.constant 0 : index
    %c0_127 = arith.constant 0 : index
    %131 = vector.load %arg20[%c0_126, %c0_127] : memref<256x128xf32, #tpu.memory_space<vmem>>, vector<64x128xf32>
    tpu.vector_store %arg20[%c0_126, %c0_127], %130 {strides = array<i32>} : memref<256x128xf32, #tpu.memory_space<vmem>>, vector<64x128xf32>,
    %c0_128 = arith.constant 0 : index
    %c0_129 = arith.constant 0 : index
    %132 = tpu.strided_load %arg20[%c0_128, %c0_129] {strides = array<i32: 2, 1>} : memref<256x128xf32, #tpu.memory_space<vmem>>, vector<32x128xf32>
    %c1_130 = arith.constant 1 : index
    %c0_131 = arith.constant 0 : index
    %133 = tpu.strided_load %arg20[%c1_130, %c0_131] {strides = array<i32: 2, 1>} : memref<256x128xf32, #tpu.memory_space<vmem>>, vector<32x128xf32>
    %134 = arith.maximumf %132, %133 : vector<32x128xf32>
    %cst_132 = arith.constant 0.000000e+00 : f32
    %135 = vector.broadcast %cst_132 : f32 to vector<32x128xf32>
    %136 = arith.maximumf %134, %135 : vector<32x128xf32>
    %c0_133 = arith.constant 0 : index
    %c0_134 = arith.constant 0 : index
    %137 = vector.load %arg21[%c0_133, %c0_134] : memref<32x128xf32, #tpu.memory_space<vmem>>, vector<32x128xf32>
    tpu.vector_store %arg21[%c0_133, %c0_134], %136 {strides = array<i32>} : memref<32x128xf32, #tpu.memory_space<vmem>>, vector<32x128xf32>,
    %c0_135 = arith.constant 0 : index
    %c0_136 = arith.constant 0 : index
    %138 = tpu.strided_load %arg21[%c0_135, %c0_136] {strides = array<i32: 4, 1>} : memref<32x128xf32, #tpu.memory_space<vmem>>, vector<8x128xf32>
    %139 = arith.truncf %138 : vector<8x128xf32> to vector<8x128xbf16>
    %c0_137 = arith.constant 0 : index
    %c0_138 = arith.constant 0 : index
    %c0_139 = arith.constant 0 : index
    %140 = vector.load %arg11[%c0_137, %c0_138, %c0_139] : memref<4x128x16xbf16, #tpu.memory_space<vmem>>, vector<1x128x16xbf16>
    %141 = vector.shape_cast %140 : vector<1x128x16xbf16> to vector<128x16xbf16>
    %cst_140 = arith.constant dense<0.000000e+00> : vector<8x16xf32>
    %142 = tpu.matmul %139, %141, %cst_140 {dimension_numbers = #tpu.dot_dimension_numbers<[1], [0], [0], [1], [0, 0, 1, 1], [], []>} : vector<8x128xbf16>, vector<128x16xbf16>, vector<8x16xf32> -> vector<8x16xf32>
    %c1_141 = arith.constant 1 : index
    %c0_142 = arith.constant 0 : index
    %143 = tpu.strided_load %arg21[%c1_141, %c0_142] {strides = array<i32: 4, 1>} : memref<32x128xf32, #tpu.memory_space<vmem>>, vector<8x128xf32>
    %144 = arith.truncf %143 : vector<8x128xf32> to vector<8x128xbf16>
    %c1_143 = arith.constant 1 : index
    %c0_144 = arith.constant 0 : index
    %c0_145 = arith.constant 0 : index
    %145 = vector.load %arg11[%c1_143, %c0_144, %c0_145] : memref<4x128x16xbf16, #tpu.memory_space<vmem>>, vector<1x128x16xbf16>
    %146 = vector.shape_cast %145 : vector<1x128x16xbf16> to vector<128x16xbf16>
    %cst_146 = arith.constant dense<0.000000e+00> : vector<8x16xf32>
    %147 = tpu.matmul %144, %146, %cst_146 {dimension_numbers = #tpu.dot_dimension_numbers<[1], [0], [0], [1], [0, 0, 1, 1], [], []>} : vector<8x128xbf16>, vector<128x16xbf16>, vector<8x16xf32> -> vector<8x16xf32>
    %148 = arith.addf %142, %147 : vector<8x16xf32>
    %c2_147 = arith.constant 2 : index
    %c0_148 = arith.constant 0 : index
    %149 = tpu.strided_load %arg21[%c2_147, %c0_148] {strides = array<i32: 4, 1>} : memref<32x128xf32, #tpu.memory_space<vmem>>, vector<8x128xf32>
    %150 = arith.truncf %149 : vector<8x128xf32> to vector<8x128xbf16>
    %c2_149 = arith.constant 2 : index
    %c0_150 = arith.constant 0 : index
    %c0_151 = arith.constant 0 : index
    %151 = vector.load %arg11[%c2_149, %c0_150, %c0_151] : memref<4x128x16xbf16, #tpu.memory_space<vmem>>, vector<1x128x16xbf16>
    %152 = vector.shape_cast %151 : vector<1x128x16xbf16> to vector<128x16xbf16>
    %cst_152 = arith.constant dense<0.000000e+00> : vector<8x16xf32>
    %153 = tpu.matmul %150, %152, %cst_152 {dimension_numbers = #tpu.dot_dimension_numbers<[1], [0], [0], [1], [0, 0, 1, 1], [], []>} : vector<8x128xbf16>, vector<128x16xbf16>, vector<8x16xf32> -> vector<8x16xf32>
    %154 = arith.addf %148, %153 : vector<8x16xf32>
    %c3 = arith.constant 3 : index
    %c0_153 = arith.constant 0 : index
    %155 = tpu.strided_load %arg21[%c3, %c0_153] {strides = array<i32: 4, 1>} : memref<32x128xf32, #tpu.memory_space<vmem>>, vector<8x128xf32>
    %156 = arith.truncf %155 : vector<8x128xf32> to vector<8x128xbf16>
    %c3_154 = arith.constant 3 : index
    %c0_155 = arith.constant 0 : index
    %c0_156 = arith.constant 0 : index
    %157 = vector.load %arg11[%c3_154, %c0_155, %c0_156] : memref<4x128x16xbf16, #tpu.memory_space<vmem>>, vector<1x128x16xbf16>
    %158 = vector.shape_cast %157 : vector<1x128x16xbf16> to vector<128x16xbf16>
    %cst_157 = arith.constant dense<0.000000e+00> : vector<8x16xf32>
    %159 = tpu.matmul %156, %158, %cst_157 {dimension_numbers = #tpu.dot_dimension_numbers<[1], [0], [0], [1], [0, 0, 1, 1], [], []>} : vector<8x128xbf16>, vector<128x16xbf16>, vector<8x16xf32> -> vector<8x16xf32>
    %160 = arith.addf %154, %159 : vector<8x16xf32>
    %c0_158 = arith.constant 0 : index
    %c0_159 = arith.constant 0 : index
    %161 = vector.load %arg12[%c0_158, %c0_159] : memref<1x16xf32, #tpu.memory_space<vmem>>, vector<1x16xf32>
    %162 = vector.broadcast %161 : vector<1x16xf32> to vector<8x16xf32>
    %163 = arith.mulf %160, %162 : vector<8x16xf32>
    %c0_160 = arith.constant 0 : index
    %c0_161 = arith.constant 0 : index
    %164 = vector.load %arg13[%c0_160, %c0_161] : memref<1x16xf32, #tpu.memory_space<vmem>>, vector<1x16xf32>
    %165 = vector.broadcast %164 : vector<1x16xf32> to vector<8x16xf32>
    %166 = arith.addf %163, %165 : vector<8x16xf32>
    %cst_162 = arith.constant 0.000000e+00 : f32
    %167 = vector.broadcast %cst_162 : f32 to vector<8x16xf32>
    %168 = arith.maximumf %166, %167 : vector<8x16xf32>
    %169 = arith.truncf %168 : vector<8x16xf32> to vector<8x16xbf16>
    %c0_163 = arith.constant 0 : index
    %c0_164 = arith.constant 0 : index
    %170 = vector.load %arg14[%c0_163, %c0_164] : memref<16x10xbf16, #tpu.memory_space<vmem>>, vector<16x10xbf16>
    %cst_165 = arith.constant dense<0.000000e+00> : vector<8x10xf32>
    %171 = tpu.matmul %169, %170, %cst_165 {dimension_numbers = #tpu.dot_dimension_numbers<[1], [0], [0], [1], [0, 0, 1, 1], [], []>} : vector<8x16xbf16>, vector<16x10xbf16>, vector<8x10xf32> -> vector<8x10xf32>
    %c0_166 = arith.constant 0 : index
    %c0_167 = arith.constant 0 : index
    %172 = vector.load %arg15[%c0_166, %c0_167] : memref<1x10xf32, #tpu.memory_space<vmem>>, vector<1x10xf32>
    %173 = vector.broadcast %172 : vector<1x10xf32> to vector<8x10xf32>
    %174 = arith.addf %171, %173 : vector<8x10xf32>
    %c0_168 = arith.constant 0 : index
    %c0_169 = arith.constant 0 : index
    %175 = vector.load %arg16[%c0_168, %c0_169] : memref<8x10xf32, #tpu.memory_space<vmem>>, vector<8x10xf32>
    tpu.vector_store %arg16[%c0_168, %c0_169], %174 {strides = array<i32>} : memref<8x10xf32, #tpu.memory_space<vmem>>, vector<8x10xf32>,
    return
  }
  func.func @transform_0(%arg0: i32) -> (i32, i32, i32) {
    %c0_i32 = arith.constant 0 : i32
    %c0_i32_0 = arith.constant 0 : i32
    %c0_i32_1 = arith.constant 0 : i32
    return %arg0, %c0_i32, %c0_i32_0 : i32, i32, i32
  }
  func.func @transform_1(%arg0: i32) -> (i32, i32, i32) {
    %c0_i32 = arith.constant 0 : i32
    %c0_i32_0 = arith.constant 0 : i32
    %c0_i32_1 = arith.constant 0 : i32
    %c0_i32_2 = arith.constant 0 : i32
    return %c0_i32, %c0_i32_0, %c0_i32_1 : i32, i32, i32
  }
  func.func @transform_2(%arg0: i32) -> (i32, i32) {
    %c0_i32 = arith.constant 0 : i32
    %c0_i32_0 = arith.constant 0 : i32
    %c0_i32_1 = arith.constant 0 : i32
    return %c0_i32, %c0_i32_0 : i32, i32
  }
  func.func @transform_3(%arg0: i32) -> (i32, i32) {
    %c0_i32 = arith.constant 0 : i32
    %c0_i32_0 = arith.constant 0 : i32
    %c0_i32_1 = arith.constant 0 : i32
    return %c0_i32, %c0_i32_0 : i32, i32
  }
  func.func @transform_4(%arg0: i32) -> (i32, i32, i32) {
    %c0_i32 = arith.constant 0 : i32
    %c0_i32_0 = arith.constant 0 : i32
    %c0_i32_1 = arith.constant 0 : i32
    %c0_i32_2 = arith.constant 0 : i32
    return %c0_i32, %c0_i32_0, %c0_i32_1 : i32, i32, i32
  }
  func.func @transform_5(%arg0: i32) -> (i32, i32) {
    %c0_i32 = arith.constant 0 : i32
    %c0_i32_0 = arith.constant 0 : i32
    %c0_i32_1 = arith.constant 0 : i32
    return %c0_i32, %c0_i32_0 : i32, i32
  }
  func.func @transform_6(%arg0: i32) -> (i32, i32) {
    %c0_i32 = arith.constant 0 : i32
    %c0_i32_0 = arith.constant 0 : i32
    %c0_i32_1 = arith.constant 0 : i32
    return %c0_i32, %c0_i32_0 : i32, i32
  }
  func.func @transform_7(%arg0: i32) -> (i32, i32, i32) {
    %c0_i32 = arith.constant 0 : i32
    %c0_i32_0 = arith.constant 0 : i32
    %c0_i32_1 = arith.constant 0 : i32
    %c0_i32_2 = arith.constant 0 : i32
    return %c0_i32, %c0_i32_0, %c0_i32_1 : i32, i32, i32
  }
  func.func @transform_8(%arg0: i32) -> (i32, i32) {
    %c0_i32 = arith.constant 0 : i32
    %c0_i32_0 = arith.constant 0 : i32
    %c0_i32_1 = arith.constant 0 : i32
    return %c0_i32, %c0_i32_0 : i32, i32
  }
  func.func @transform_9(%arg0: i32) -> (i32, i32) {
    %c0_i32 = arith.constant 0 : i32
    %c0_i32_0 = arith.constant 0 : i32
    %c0_i32_1 = arith.constant 0 : i32
    return %c0_i32, %c0_i32_0 : i32, i32
  }
  func.func @transform_10(%arg0: i32) -> (i32, i32, i32) {
    %c0_i32 = arith.constant 0 : i32
    %c0_i32_0 = arith.constant 0 : i32
    %c0_i32_1 = arith.constant 0 : i32
    %c0_i32_2 = arith.constant 0 : i32
    return %c0_i32, %c0_i32_0, %c0_i32_1 : i32, i32, i32
  }
  func.func @transform_11(%arg0: i32) -> (i32, i32) {
    %c0_i32 = arith.constant 0 : i32
    %c0_i32_0 = arith.constant 0 : i32
    %c0_i32_1 = arith.constant 0 : i32
    return %c0_i32, %c0_i32_0 : i32, i32
  }
  func.func @transform_12(%arg0: i32) -> (i32, i32) {
    %c0_i32 = arith.constant 0 : i32
    %c0_i32_0 = arith.constant 0 : i32
    %c0_i32_1 = arith.constant 0 : i32
    return %c0_i32, %c0_i32_0 : i32, i32
  }
  func.func @transform_13(%arg0: i32) -> (i32, i32) {
    %c0_i32 = arith.constant 0 : i32
    %c0_i32_0 = arith.constant 0 : i32
    %c0_i32_1 = arith.constant 0 : i32
    return %c0_i32, %c0_i32_0 : i32, i32
  }
  func.func @transform_14(%arg0: i32) -> (i32, i32) {
    %c0_i32 = arith.constant 0 : i32
    %c0_i32_0 = arith.constant 0 : i32
    %c0_i32_1 = arith.constant 0 : i32
    return %c0_i32, %c0_i32_0 : i32, i32
  }
  func.func @transform_15(%arg0: i32) -> (i32, i32) {
    %c0_i32 = arith.constant 0 : i32
    %c0_i32_0 = arith.constant 0 : i32
    return %arg0, %c0_i32 : i32, i32
  }
}

</mosaic_0001>

<bundles_post_ra>
// kernel: tile.33
= control target key start
LH: loop header
LB: loop body
LE: loop exit
PB: predicated region body
PF: predicated region fallthrough
CT: control target
= control target key end

     0   :  { %s40_s0 = inlined_call_operand.vmem [shape: f32[4], index: 0, kind: input, shape index: {}]   ;;  %s41_s1 = inlined_call_operand.vmem [shape: f32[32,4], index: 1, kind: output, shape index: {}]  }
   0x1   :  { %v4_v0 = vld [vmem:[%s40_s0] ss:$0 sm:$0xff] }
   0x2   :  { %5 = vst [vmem:[%s41_s1] sm:$0xff] %v4_v0 }
   0x3   :  { %12 = vst [vmem:[%s41_s1 + $0x8] sm:$0xff] %v4_v0 }
   0x4   :  { %13 = vst [vmem:[%s41_s1 + $0x10] sm:$0xff] %v4_v0 }
   0x5   :  { %14 = vst [vmem:[%s41_s1 + $0x18] sm:$0xff] %v4_v0 }

// kernel: tile.34
= control target key start
LH: loop header
LB: loop body
LE: loop exit
PB: predicated region body
PF: predicated region fallthrough
CT: control target
= control target key end

     0   :  { %s259_s10 = smov 124   ;;  %s260_s11 = smov 116   ;;  %vm3_vm0 = vcmask 31744   ;;  %vm9_vm1 = vcmask 1048544   ;;  %vm15_vm2 = vcmask 1015744   ;;  %vm21_vm3 = vcmask 982944   ;;  %s399_s0 = inlined_call_operand.vmem [shape: f32[32,4], index: 0, kind: input, shape index: {}]   ;;  %s400_s1 = inlined_call_operand.vmem [shape: f32[1,128], index: 1, kind: output, shape index: {}]  }
   0x1   :  { %v197_v0 = vld [vmem:[%s399_s0 + $0x1f] sm:$0x1]   ;;  %v199_v1 = vld [vmem:[%s399_s0 + $0x1d] sm:$0x1]   ;;  %v201_v2 = vld [vmem:[%s399_s0 + $0x1b] sm:$0x1]  }
   0x2   :  { %7 = vrot.lane.b32.xlu0 %v197_v0, %s259_s10  ;;  %19 = vrot.lane.b32.xlu1 %v199_v1, %s260_s11  ;;  %s261_s14 = smov 108   ;;  %v198_v3 = vld [vmem:[%s399_s0 + $0x1e] sm:$0x1]   ;;  %v200_v4 = vld [vmem:[%s399_s0 + $0x1c] sm:$0x1]   ;;  %s262_s19 = smov 120  }
   0x3   :  { %31 = vrot.lane.b32.xlu2 %v201_v2, %s261_s14  ;;  %s263_s20 = smov 112   ;;  %v202_v5 = vld [vmem:[%s399_s0 + $0x1a] sm:$0x1]   ;;  %s264_s23 = smov 104   ;;  %v203_v6 = vld [vmem:[%s399_s0 + $0x19] sm:$0x1]  }
   0x4   :  { %v204_v7 = vld [vmem:[%s399_s0 + $0x18] sm:$0x1]   ;;  %s265_s28 = smov 100   ;;  %s266_s29 = smov 96   ;;  %v205_v8 = vld [vmem:[%s399_s0 + $0x17] sm:$0x1]  }
   0x5   :  { %s267_s3 = smov 92   ;;  %v206_v9 = vld [vmem:[%s399_s0 + $0x16] sm:$0x1]   ;;  %v207_v10 = vld [vmem:[%s399_s0 + $0x15] sm:$0x1]   ;;  %s268_s8 = smov 88  }
   0x6   :  { %s269_s9 = smov 84   ;;  %v208_v11 = vld [vmem:[%s399_s0 + $0x14] sm:$0x1]   ;;  %s270_s12 = smov 80   ;;  %v209_v12 = vld [vmem:[%s399_s0 + $0x13] sm:$0x1]  }
   0x7   :  { %v210_v13 = vld [vmem:[%s399_s0 + $0x12] sm:$0x1]   ;;  %s271_s17 = smov 76   ;;  %s272_s18 = smov 72   ;;  %v211_v14 = vld [vmem:[%s399_s0 + $0x11] sm:$0x1]  }
   0x8   :  { %s273_s21 = smov 68   ;;  %v212_v15 = vld [vmem:[%s399_s0 + $0x10] sm:$0x1]   ;;  %v213_v16 = vld [vmem:[%s399_s0 + $0xf] sm:$0x1]   ;;  %s274_s26 = smov 64  }
   0x9   :  { %s275_s27 = smov 60   ;;  %v214_v17 = vld [vmem:[%s399_s0 + $0xe] sm:$0x1]   ;;  %s276_s30 = smov 56   ;;  %v215_v18 = vld [vmem:[%s399_s0 + $0xd] sm:$0x1]  }
   0xa   :  { %13 = vrot.lane.b32.xlu0 %v198_v3, %s262_s19  ;;  %25 = vrot.lane.b32.xlu1 %v200_v4, %s263_s20  ;;  %v216_v19 = vld [vmem:[%s399_s0 + $0xc] sm:$0x1]   ;;  %s277_s6 = smov 52   ;;  %s278_s7 = smov 48   ;;  %v217_v20 = vld [vmem:[%s399_s0 + $0xb] sm:$0x1]  }
   0xb   :  { %37 = vrot.lane.b32.xlu2 %v202_v5, %s264_s23  ;;  %s279_s10 = smov 44   ;;  %v218_v21 = vld [vmem:[%s399_s0 + $0xa] sm:$0x1]   ;;  %v219_v22 = vld [vmem:[%s399_s0 + $0x9] sm:$0x1]   ;;  %s280_s15 = smov 40  }
   0xc   :  { %s281_s16 = smov 36   ;;  %v220_v23 = vld [vmem:[%s399_s0 + $0x8] sm:$0x1]   ;;  %s282_s19 = smov 32   ;;  %v221_v24 = vld [vmem:[%s399_s0 + $0x7] sm:$0x1]  }
   0xd   :  { %v222_v25 = vld [vmem:[%s399_s0 + $0x6] sm:$0x1]   ;;  %s283_s24 = smov 28   ;;  %s284_s25 = smov 24   ;;  %v223_v26 = vld [vmem:[%s399_s0 + $0x5] sm:$0x1]  }
   0xe   :  { %v224_v27 = vld [vmem:[%s399_s0 + $0x4] sm:$0x1]   ;;  %v225_v28 = vld [vmem:[%s399_s0 + $0x3] sm:$0x1]   ;;  %s286_s4 = smov 16   ;;  %s287_s5 = smov 12  }
   0xf   :  { %v226_v29 = vld [vmem:[%s399_s0 + $0x2] sm:$0x1]   ;;  %v227_v30 = vld [vmem:[%s399_s0 + $0x1] sm:$0x1]   ;;  %s289_s11 = smov 4   ;;  %vm27_vm4 = vcmask 950144  }
  0x10   :  { %v2_v31 = vld [vmem:[%s399_s0] sm:$0x1]   ;;  %vm33_vm5 = vcmask 917344   ;;  %vm39_vm6 = vcmask 884544   ;;  %vm45_vm7 = vcmask 851744   ;;  %vm51_vm8 = vcmask 818944  }
  0x11   :  { %4 = vst.msk [vmem:[#allocation0] sm:$0x1] %vm3_vm0, %v2_v31   ;;  %vm57_vm9 = vcmask 786144   ;;  %vm63_vm10 = vcmask 753344   ;;  %vm69_vm11 = vcmask 720544   ;;  %vm75_vm12 = vcmask 687744  }
  0x12   :  { %43 = vrot.lane.b32.xlu0 %v203_v6, %s265_s28  ;;  %49 = vrot.lane.b32.xlu1 %v204_v7, %s266_s29  ;;  %s285_s28 = smov 20   ;;  %vm81_vm13 = vcmask 654944   ;;  %vm87_vm14 = vcmask 622144   ;;  %vm93_vm15 = vcmask 589344   ;;  %vm99_vm0 = vcmask 556544  }
  0x13   :  { %55 = vrot.lane.b32.xlu2 %v205_v8, %s267_s3 }
  0x1a   :  { %61 = vrot.lane.b32.xlu0 %v206_v9, %s268_s8  ;;  %67 = vrot.lane.b32.xlu1 %v207_v10, %s269_s9  ;;  %s288_s8 = smov 8  }
  0x1b   :  { %73 = vrot.lane.b32.xlu2 %v208_v11, %s270_s12 }
  0x22   :  { %79 = vrot.lane.b32.xlu0 %v209_v12, %s271_s17  ;;  %85 = vrot.lane.b32.xlu1 %v210_v13, %s272_s18 }
  0x23   :  { %91 = vrot.lane.b32.xlu2 %v211_v14, %s273_s21 }
  0x2a   :  { %97 = vrot.lane.b32.xlu0 %v212_v15, %s274_s26  ;;  %103 = vrot.lane.b32.xlu1 %v213_v16, %s275_s27 }
  0x2b   :  { %109 = vrot.lane.b32.xlu2 %v214_v17, %s276_s30 }
  0x32   :  { %115 = vrot.lane.b32.xlu0 %v215_v18, %s277_s6  ;;  %121 = vrot.lane.b32.xlu1 %v216_v19, %s278_s7 }
  0x33   :  { %127 = vrot.lane.b32.xlu2 %v217_v20, %s279_s10 }
  0x3a   :  { %133 = vrot.lane.b32.xlu0 %v218_v21, %s280_s15  ;;  %139 = vrot.lane.b32.xlu1 %v219_v22, %s281_s16 }
  0x3b   :  { %145 = vrot.lane.b32.xlu2 %v220_v23, %s282_s19 }
  0x42   :  { %151 = vrot.lane.b32.xlu0 %v221_v24, %s283_s24  ;;  %157 = vrot.lane.b32.xlu1 %v222_v25, %s284_s25 }
  0x43   :  { %163 = vrot.lane.b32.xlu2 %v223_v26, %s285_s28 }
  0x4a   :  { %169 = vrot.lane.b32.xlu0 %v224_v27, %s286_s4  ;;  %175 = vrot.lane.b32.xlu1 %v225_v28, %s287_s5 }
  0x4b   :  { %181 = vrot.lane.b32.xlu2 %v226_v29, %s288_s8 }
  0x52   :  { %187 = vrot.lane.b32.xlu0 %v227_v30, %s289_s11 }
  0x5d   :  { %v32_v32 = vpop.permute.xlu2 %31  }
  0x65   :  { %v38_v33 = vpop.permute.xlu2 %37  }
  0x6d   :  { %v56_v34 = vpop.permute.xlu2 %55  }
  0x74   :  { %v8_v35 = vpop.permute.xlu0 %7   ;;  %v20_v36 = vpop.permute.xlu1 %19  }
  0x75   :  { %10 = vst.msk [vmem:[#allocation0] sm:$0x1] %vm9_vm1, %v8_v35   ;;  %v74_v37 = vpop.permute.xlu2 %73   ;;  %vm105_vm1 = vcmask 523744  }
  0x7c   :  { %v14_v38 = vpop.permute.xlu0 %13   ;;  %v26_v39 = vpop.permute.xlu1 %25  }
  0x7d   :  { %16 = vst.msk [vmem:[#allocation0] sm:$0x1] %vm15_vm2, %v14_v38   ;;  %v92_v40 = vpop.permute.xlu2 %91   ;;  %vm111_vm2 = vcmask 490944  }
  0x7e   :  { %22 = vst.msk [vmem:[#allocation0] sm:$0x1] %vm21_vm3, %v20_v36   ;;  %vm117_vm3 = vcmask 458144  }
  0x7f   :  { %28 = vst.msk [vmem:[#allocation0] sm:$0x1] %vm27_vm4, %v26_v39   ;;  %vm123_vm4 = vcmask 425344  }
  0x80   :  { %34 = vst.msk [vmem:[#allocation0] sm:$0x1] %vm33_vm5, %v32_v32   ;;  %vm129_vm5 = vcmask 392544  }
  0x81   :  { %40 = vst.msk [vmem:[#allocation0] sm:$0x1] %vm39_vm6, %v38_v33   ;;  %vm135_vm6 = vcmask 359744  }
  0x84   :  { %v44_v41 = vpop.permute.xlu0 %43   ;;  %v50_v42 = vpop.permute.xlu1 %49  }
  0x85   :  { %46 = vst.msk [vmem:[#allocation0] sm:$0x1] %vm45_vm7, %v44_v41   ;;  %v110_v43 = vpop.permute.xlu2 %109   ;;  %vm141_vm7 = vcmask 326944  }
  0x86   :  { %52 = vst.msk [vmem:[#allocation0] sm:$0x1] %vm51_vm8, %v50_v42   ;;  %vm147_vm8 = vcmask 294144  }
  0x87   :  { %58 = vst.msk [vmem:[#allocation0] sm:$0x1] %vm57_vm9, %v56_v34   ;;  %vm153_vm9 = vcmask 261344  }
  0x8c   :  { %v62_v44 = vpop.permute.xlu0 %61   ;;  %v68_v45 = vpop.permute.xlu1 %67  }
  0x8d   :  { %64 = vst.msk [vmem:[#allocation0] sm:$0x1] %vm63_vm10, %v62_v44   ;;  %v128_v46 = vpop.permute.xlu2 %127   ;;  %vm159_vm10 = vcmask 228544  }
  0x8e   :  { %70 = vst.msk [vmem:[#allocation0] sm:$0x1] %vm69_vm11, %v68_v45   ;;  %vm165_vm11 = vcmask 195744  }
  0x8f   :  { %76 = vst.msk [vmem:[#allocation0] sm:$0x1] %vm75_vm12, %v74_v37   ;;  %vm171_vm12 = vcmask 162944  }
  0x94   :  { %v80_v47 = vpop.permute.xlu0 %79   ;;  %v86_v48 = vpop.permute.xlu1 %85  }
  0x95   :  { %82 = vst.msk [vmem:[#allocation0] sm:$0x1] %vm81_vm13, %v80_v47   ;;  %v146_v49 = vpop.permute.xlu2 %145   ;;  %vm177_vm13 = vcmask 130144  }
  0x96   :  { %88 = vst.msk [vmem:[#allocation0] sm:$0x1] %vm87_vm14, %v86_v48   ;;  %vm183_vm14 = vcmask 97344  }
  0x97   :  { %94 = vst.msk [vmem:[#allocation0] sm:$0x1] %vm93_vm15, %v92_v40   ;;  %vm189_vm15 = vcmask 64544  }
  0x9c   :  { %v98_v50 = vpop.permute.xlu0 %97   ;;  %v104_v51 = vpop.permute.xlu1 %103  }
  0x9d   :  { %100 = vst.msk [vmem:[#allocation0] sm:$0x1] %vm99_vm0, %v98_v50   ;;  %v164_v52 = vpop.permute.xlu2 %163  }
  0x9e   :  { %106 = vst.msk [vmem:[#allocation0] sm:$0x1] %vm105_vm1, %v104_v51  }
  0x9f   :  { %112 = vst.msk [vmem:[#allocation0] sm:$0x1] %vm111_vm2, %v110_v43  }
  0xa4   :  { %v116_v53 = vpop.permute.xlu0 %115   ;;  %v122_v54 = vpop.permute.xlu1 %121  }
  0xa5   :  { %118 = vst.msk [vmem:[#allocation0] sm:$0x1] %vm117_vm3, %v116_v53   ;;  %v182_v55 = vpop.permute.xlu2 %181  }
  0xa6   :  { %124 = vst.msk [vmem:[#allocation0] sm:$0x1] %vm123_vm4, %v122_v54  }
  0xa7   :  { %130 = vst.msk [vmem:[#allocation0] sm:$0x1] %vm129_vm5, %v128_v46  }
  0xac   :  { %v134_v56 = vpop.permute.xlu0 %133   ;;  %v140_v57 = vpop.permute.xlu1 %139  }
  0xad   :  { %136 = vst.msk [vmem:[#allocation0] sm:$0x1] %vm135_vm6, %v134_v56  }
  0xae   :  { %142 = vst.msk [vmem:[#allocation0] sm:$0x1] %vm141_vm7, %v140_v57  }
  0xaf   :  { %148 = vst.msk [vmem:[#allocation0] sm:$0x1] %vm147_vm8, %v146_v49  }
  0xb4   :  { %v152_v58 = vpop.permute.xlu0 %151   ;;  %v158_v59 = vpop.permute.xlu1 %157  }
  0xb5   :  { %154 = vst.msk [vmem:[#allocation0] sm:$0x1] %vm153_vm9, %v152_v58  }
  0xb6   :  { %160 = vst.msk [vmem:[#allocation0] sm:$0x1] %vm159_vm10, %v158_v59  }
  0xb7   :  { %166 = vst.msk [vmem:[#allocation0] sm:$0x1] %vm165_vm11, %v164_v52  }
  0xbc   :  { %v170_v60 = vpop.permute.xlu0 %169   ;;  %v176_v61 = vpop.permute.xlu1 %175  }
  0xbd   :  { %172 = vst.msk [vmem:[#allocation0] sm:$0x1] %vm171_vm12, %v170_v60  }
  0xbe   :  { %178 = vst.msk [vmem:[#allocation0] sm:$0x1] %vm177_vm13, %v176_v61  }
  0xbf   :  { %184 = vst.msk [vmem:[#allocation0] sm:$0x1] %vm183_vm14, %v182_v55  }
  0xc4   :  { %v188_v62 = vpop.permute.xlu0 %187  }
  0xc5   :  { %190 = vst.msk [vmem:[#allocation0] sm:$0x1] %vm189_vm15, %v188_v62  }
  0xcc   :  { %v193_v63 = vld [vmem:[#allocation0] sm:$0x1] }
  0xcd   :  { %196 = vst [vmem:[%s400_s1] sm:$0x1] %v193_v63 }

// kernel: tile.43
= control target key start
LH: loop header
LB: loop body
LE: loop exit
PB: predicated region body
PF: predicated region fallthrough
CT: control target
= control target key end

     0   :  { %s28_s0 = inlined_call_operand.vmem [shape: f32[8], index: 0, kind: input, shape index: {}]   ;;  %s29_s1 = inlined_call_operand.vmem [shape: f32[16,8], index: 1, kind: output, shape index: {}]  }
   0x1   :  { %v4_v0 = vld [vmem:[%s28_s0] ss:$0 sm:$0xff] }
   0x2   :  { %5 = vst [vmem:[%s29_s1] sm:$0xff] %v4_v0 }
   0x3   :  { %8 = vst [vmem:[%s29_s1 + $0x8] sm:$0xff] %v4_v0 }

// kernel: tile.44
= control target key start
LH: loop header
LB: loop body
LE: loop exit
PB: predicated region body
PF: predicated region fallthrough
CT: control target
= control target key end

     0   :  { %s131_s10 = smov 120   ;;  %s132_s11 = smov 104   ;;  %vm3_vm0 = vcmask 64512   ;;  %vm9_vm1 = vcmask 1048512   ;;  %vm15_vm2 = vcmask 982912   ;;  %vm21_vm3 = vcmask 917312   ;;  %s207_s0 = inlined_call_operand.vmem [shape: f32[16,8], index: 0, kind: input, shape index: {}]   ;;  %s208_s1 = inlined_call_operand.vmem [shape: f32[1,128], index: 1, kind: output, shape index: {}]  }
   0x1   :  { %v101_v0 = vld [vmem:[%s207_s0 + $0xf] sm:$0x1]   ;;  %v103_v1 = vld [vmem:[%s207_s0 + $0xd] sm:$0x1]   ;;  %v105_v2 = vld [vmem:[%s207_s0 + $0xb] sm:$0x1]  }
   0x2   :  { %7 = vrot.lane.b32.xlu0 %v101_v0, %s131_s10  ;;  %19 = vrot.lane.b32.xlu1 %v103_v1, %s132_s11  ;;  %s133_s14 = smov 88   ;;  %v102_v3 = vld [vmem:[%s207_s0 + $0xe] sm:$0x1]   ;;  %v104_v4 = vld [vmem:[%s207_s0 + $0xc] sm:$0x1]   ;;  %s134_s19 = smov 112  }
   0x3   :  { %31 = vrot.lane.b32.xlu2 %v105_v2, %s133_s14  ;;  %s135_s20 = smov 96   ;;  %v106_v5 = vld [vmem:[%s207_s0 + $0xa] sm:$0x1]   ;;  %s136_s23 = smov 80   ;;  %v107_v6 = vld [vmem:[%s207_s0 + $0x9] sm:$0x1]  }
   0x4   :  { %v108_v7 = vld [vmem:[%s207_s0 + $0x8] sm:$0x1]   ;;  %s137_s28 = smov 72   ;;  %s138_s29 = smov 64   ;;  %v109_v8 = vld [vmem:[%s207_s0 + $0x7] sm:$0x1]  }
   0x5   :  { %s139_s3 = smov 56   ;;  %v110_v9 = vld [vmem:[%s207_s0 + $0x6] sm:$0x1]   ;;  %v111_v10 = vld [vmem:[%s207_s0 + $0x5] sm:$0x1]   ;;  %s140_s8 = smov 48  }
   0x6   :  { %s141_s9 = smov 40   ;;  %v112_v11 = vld [vmem:[%s207_s0 + $0x4] sm:$0x1]   ;;  %s142_s12 = smov 32   ;;  %v113_v12 = vld [vmem:[%s207_s0 + $0x3] sm:$0x1]  }
   0x7   :  { %v114_v13 = vld [vmem:[%s207_s0 + $0x2] sm:$0x1]   ;;  %s143_s17 = smov 24   ;;  %s144_s18 = smov 16   ;;  %v115_v14 = vld [vmem:[%s207_s0 + $0x1] sm:$0x1]  }
   0x8   :  { %s145_s21 = smov 8   ;;  %v2_v15 = vld [vmem:[%s207_s0] sm:$0x1]   ;;  %vm27_vm4 = vcmask 851712   ;;  %vm33_vm5 = vcmask 786112   ;;  %vm39_vm6 = vcmask 720512  }
   0x9   :  { %4 = vst.msk [vmem:[#allocation0] sm:$0x1] %vm3_vm0, %v2_v15   ;;  %vm45_vm7 = vcmask 654912   ;;  %vm51_vm8 = vcmask 589312   ;;  %vm57_vm9 = vcmask 523712   ;;  %vm63_vm10 = vcmask 458112  }
   0xa   :  { %13 = vrot.lane.b32.xlu0 %v102_v3, %s134_s19  ;;  %25 = vrot.lane.b32.xlu1 %v104_v4, %s135_s20  ;;  %vm69_vm11 = vcmask 392512   ;;  %vm75_vm12 = vcmask 326912   ;;  %vm81_vm13 = vcmask 261312   ;;  %vm87_vm14 = vcmask 195712  }
   0xb   :  { %37 = vrot.lane.b32.xlu2 %v106_v5, %s136_s23  ;;  %vm93_vm15 = vcmask 130112  }
  0x12   :  { %43 = vrot.lane.b32.xlu0 %v107_v6, %s137_s28  ;;  %49 = vrot.lane.b32.xlu1 %v108_v7, %s138_s29 }
  0x13   :  { %55 = vrot.lane.b32.xlu2 %v109_v8, %s139_s3 }
  0x1a   :  { %61 = vrot.lane.b32.xlu0 %v110_v9, %s140_s8  ;;  %67 = vrot.lane.b32.xlu1 %v111_v10, %s141_s9 }
  0x1b   :  { %73 = vrot.lane.b32.xlu2 %v112_v11, %s142_s12 }
  0x22   :  { %79 = vrot.lane.b32.xlu0 %v113_v12, %s143_s17  ;;  %85 = vrot.lane.b32.xlu1 %v114_v13, %s144_s18 }
  0x23   :  { %91 = vrot.lane.b32.xlu2 %v115_v14, %s145_s21 }
  0x5d   :  { %v32_v16 = vpop.permute.xlu2 %31  }
  0x65   :  { %v38_v17 = vpop.permute.xlu2 %37  }
  0x6d   :  { %v56_v18 = vpop.permute.xlu2 %55  }
  0x74   :  { %v8_v19 = vpop.permute.xlu0 %7   ;;  %v20_v20 = vpop.permute.xlu1 %19  }
  0x75   :  { %10 = vst.msk [vmem:[#allocation0] sm:$0x1] %vm9_vm1, %v8_v19   ;;  %v74_v21 = vpop.permute.xlu2 %73  }
  0x7c   :  { %v14_v22 = vpop.permute.xlu0 %13   ;;  %v26_v23 = vpop.permute.xlu1 %25  }
  0x7d   :  { %16 = vst.msk [vmem:[#allocation0] sm:$0x1] %vm15_vm2, %v14_v22   ;;  %v92_v24 = vpop.permute.xlu2 %91  }
  0x7e   :  { %22 = vst.msk [vmem:[#allocation0] sm:$0x1] %vm21_vm3, %v20_v20  }
  0x7f   :  { %28 = vst.msk [vmem:[#allocation0] sm:$0x1] %vm27_vm4, %v26_v23  }
  0x80   :  { %34 = vst.msk [vmem:[#allocation0] sm:$0x1] %vm33_vm5, %v32_v16  }
  0x81   :  { %40 = vst.msk [vmem:[#allocation0] sm:$0x1] %vm39_vm6, %v38_v17  }
  0x84   :  { %v44_v25 = vpop.permute.xlu0 %43   ;;  %v50_v26 = vpop.permute.xlu1 %49  }
  0x85   :  { %46 = vst.msk [vmem:[#allocation0] sm:$0x1] %vm45_vm7, %v44_v25  }
  0x86   :  { %52 = vst.msk [vmem:[#allocation0] sm:$0x1] %vm51_vm8, %v50_v26  }
  0x87   :  { %58 = vst.msk [vmem:[#allocation0] sm:$0x1] %vm57_vm9, %v56_v18  }
  0x8c   :  { %v62_v27 = vpop.permute.xlu0 %61   ;;  %v68_v28 = vpop.permute.xlu1 %67  }
  0x8d   :  { %64 = vst.msk [vmem:[#allocation0] sm:$0x1] %vm63_vm10, %v62_v27  }
  0x8e   :  { %70 = vst.msk [vmem:[#allocation0] sm:$0x1] %vm69_vm11, %v68_v28  }
  0x8f   :  { %76 = vst.msk [vmem:[#allocation0] sm:$0x1] %vm75_vm12, %v74_v21  }
  0x94   :  { %v80_v29 = vpop.permute.xlu0 %79   ;;  %v86_v30 = vpop.permute.xlu1 %85  }
  0x95   :  { %82 = vst.msk [vmem:[#allocation0] sm:$0x1] %vm81_vm13, %v80_v29  }
  0x96   :  { %88 = vst.msk [vmem:[#allocation0] sm:$0x1] %vm87_vm14, %v86_v30  }
  0x97   :  { %94 = vst.msk [vmem:[#allocation0] sm:$0x1] %vm93_vm15, %v92_v24  }
  0x9e   :  { %v97_v31 = vld [vmem:[#allocation0] sm:$0x1] }
  0x9f   :  { %100 = vst [vmem:[%s208_s1] sm:$0x1] %v97_v31 }

// kernel: tile.53
= control target key start
LH: loop header
LB: loop body
LE: loop exit
PB: predicated region body
PF: predicated region fallthrough
CT: control target
= control target key end

     0   :  { %s22_s0 = inlined_call_operand.vmem [shape: f32[16], index: 0, kind: input, shape index: {}]   ;;  %s23_s1 = inlined_call_operand.vmem [shape: f32[8,16], index: 1, kind: output, shape index: {}]  }
   0x1   :  { %v4_v0 = vld [vmem:[%s22_s0] ss:$0 sm:$0xff] }
   0x2   :  { %5 = vst [vmem:[%s23_s1] sm:$0xff] %v4_v0 }

// kernel: tile.54
= control target key start
LH: loop header
LB: loop body
LE: loop exit
PB: predicated region body
PF: predicated region fallthrough
CT: control target
= control target key end

     0   :  { %s67_s10 = smov 112   ;;  %s68_s11 = smov 80   ;;  %vm3_vm0 = vcmask 130048   ;;  %vm9_vm1 = vcmask 1048448   ;;  %vm15_vm2 = vcmask 917248   ;;  %vm21_vm3 = vcmask 786048   ;;  %s111_s0 = inlined_call_operand.vmem [shape: f32[8,16], index: 0, kind: input, shape index: {}]   ;;  %s112_s1 = inlined_call_operand.vmem [shape: f32[1,128], index: 1, kind: output, shape index: {}]  }
   0x1   :  { %v53_v0 = vld [vmem:[%s111_s0 + $0x7] sm:$0x1]   ;;  %v55_v1 = vld [vmem:[%s111_s0 + $0x5] sm:$0x1]   ;;  %v57_v2 = vld [vmem:[%s111_s0 + $0x3] sm:$0x1]  }
   0x2   :  { %7 = vrot.lane.b32.xlu0 %v53_v0, %s67_s10  ;;  %19 = vrot.lane.b32.xlu1 %v55_v1, %s68_s11  ;;  %s69_s14 = smov 48   ;;  %v54_v3 = vld [vmem:[%s111_s0 + $0x6] sm:$0x1]   ;;  %v56_v4 = vld [vmem:[%s111_s0 + $0x4] sm:$0x1]   ;;  %s70_s21 = smov 96  }
   0x3   :  { %31 = vrot.lane.b32.xlu2 %v57_v2, %s69_s14  ;;  %v58_v5 = vld [vmem:[%s111_s0 + $0x2] sm:$0x1]   ;;  %s71_s22 = smov 64   ;;  %s72_s23 = smov 32   ;;  %v59_v6 = vld [vmem:[%s111_s0 + $0x1] sm:$0x1]  }
   0x4   :  { %s73_s26 = smov 16   ;;  %v2_v7 = vld [vmem:[%s111_s0] sm:$0x1]   ;;  %vm27_vm4 = vcmask 654848   ;;  %vm33_vm5 = vcmask 523648   ;;  %vm39_vm6 = vcmask 392448  }
   0x5   :  { %4 = vst.msk [vmem:[#allocation0] sm:$0x1] %vm3_vm0, %v2_v7   ;;  %vm45_vm7 = vcmask 261248  }
   0xa   :  { %13 = vrot.lane.b32.xlu0 %v54_v3, %s70_s21  ;;  %25 = vrot.lane.b32.xlu1 %v56_v4, %s71_s22 }
   0xb   :  { %37 = vrot.lane.b32.xlu2 %v58_v5, %s72_s23 }
  0x12   :  { %43 = vrot.lane.b32.xlu0 %v59_v6, %s73_s26 }
  0x5d   :  { %v32_v8 = vpop.permute.xlu2 %31  }
  0x65   :  { %v38_v9 = vpop.permute.xlu2 %37  }
  0x74   :  { %v8_v10 = vpop.permute.xlu0 %7   ;;  %v20_v11 = vpop.permute.xlu1 %19  }
  0x75   :  { %10 = vst.msk [vmem:[#allocation0] sm:$0x1] %vm9_vm1, %v8_v10  }
  0x7c   :  { %v14_v12 = vpop.permute.xlu0 %13   ;;  %v26_v13 = vpop.permute.xlu1 %25  }
  0x7d   :  { %16 = vst.msk [vmem:[#allocation0] sm:$0x1] %vm15_vm2, %v14_v12  }
  0x7e   :  { %22 = vst.msk [vmem:[#allocation0] sm:$0x1] %vm21_vm3, %v20_v11  }
  0x7f   :  { %28 = vst.msk [vmem:[#allocation0] sm:$0x1] %vm27_vm4, %v26_v13  }
  0x80   :  { %34 = vst.msk [vmem:[#allocation0] sm:$0x1] %vm33_vm5, %v32_v8  }
  0x81   :  { %40 = vst.msk [vmem:[#allocation0] sm:$0x1] %vm39_vm6, %v38_v9  }
  0x84   :  { %v44_v14 = vpop.permute.xlu0 %43  }
  0x85   :  { %46 = vst.msk [vmem:[#allocation0] sm:$0x1] %vm45_vm7, %v44_v14  }
  0x8c   :  { %v49_v15 = vld [vmem:[#allocation0] sm:$0x1] }
  0x8d   :  { %52 = vst [vmem:[%s112_s1] sm:$0x1] %v49_v15 }

// kernel: net_forward.1
= control target key start
LH: loop header
LB: loop body
LE: loop exit
PB: predicated region body
PF: predicated region fallthrough
CT: control target
= control target key end

     0   :  { %s7085_s0 = inlined_call_operand.vmem [shape: f32[16,32,96], index: 0, kind: input, shape index: {}]   ;;  %s7086_s1 = inlined_call_operand.vmem [shape: bf16[3,96,256], index: 1, kind: input, shape index: {}]   ;;  %s7087_s2 = inlined_call_operand.vmem [shape: f32[1,128], index: 2, kind: input, shape index: {}]   ;;  %s7088_s3 = inlined_call_operand.vmem [shape: f32[1,128], index: 3, kind: input, shape index: {}]   ;;  %s7089_s4 = inlined_call_operand.vmem [shape: bf16[3,128,256], index: 4, kind: input, shape index: {}]   ;;  %s7090_s5 = inlined_call_operand.vmem [shape: f32[1,128], index: 5, kind: input, shape index: {}]   ;;  %s7091_s6 = inlined_call_operand.vmem [shape: f32[1,128], index: 6, kind: input, shape index: {}]   ;;  %s7092_s7 = inlined_call_operand.vmem [shape: bf16[3,128,256], index: 7, kind: input, shape index: {}]   ;;  %s7093_s8 = inlined_call_operand.vmem [shape: f32[1,128], index: 8, kind: input, shape index: {}]   ;;  %s7094_s9 = inlined_call_operand.vmem [shape: f32[1,128], index: 9, kind: input, shape index: {}]   ;;  %s7095_s10 = inlined_call_operand.vmem [shape: bf16[4,128,16], index: 10, kind: input, shape index: {}]   ;;  %s7096_s11 = inlined_call_operand.vmem [shape: f32[1,16], index: 11, kind: input, shape index: {}]   ;;  %s7097_s12 = inlined_call_operand.vmem [shape: f32[1,16], index: 12, kind: input, shape index: {}]   ;;  %s7098_s13 = inlined_call_operand.vmem [shape: bf16[16,10], index: 13, kind: input, shape index: {}]   ;;  %s7099_s14 = inlined_call_operand.vmem [shape: f32[1,10], index: 14, kind: input, shape index: {}]   ;;  %s7100_s15 = inlined_call_operand.hbm [shape: f32[16,10], index: 15, kind: output, shape index: {}]  }
   0x1   :  { %7106 = sst [smem:[#allocation31_spill]] %s7085_s0 }
   0x2   :  { %7107 = sst [smem:[#allocation32_spill]] %s7086_s1 }
   0x3   :  { %7108 = sst [smem:[#allocation33_spill]] %s7087_s2 }
   0x4   :  { %20 = vsyncpa [#allocation8], 0 }
   0x5   :  { %22 = vsyncpa [#allocation8 + $0x1], 0  ;;  %s5168_s18 = smov 0   ;;  %s5170_s19 = smov 0  }
   0x6   :  { %s5172_s20 = smov 0   ;;  %s5174_s21 = smov 0  }
   0x7 LB: > { %7109 = sst [smem:[#allocation10_spill]] %s5081_s20  ;;  %s7101_s22 = sadd.s32 4294967295, %s5085_s21   ;;  %s5085_s21 = sphi %s5174_s21, %s7154_s21   ;;  %s5081_s20 = sphi %s5172_s20, %s7156_s20   ;;  %s5077_s19 = sphi %s5170_s19, %s7158_s19   ;;  %s5073_s18 = sphi %s5168_s18, %s7157_s18  }
   0x8   : > { %s3901_s23 = sadd.s32 4294967294, %s5085_s21   ;;  %s5191_s24 = sadd.s32 1, %s5085_s21  }
   0x9   : > { %7110 = sst [smem:[#allocation11_spill]] %s5191_s24  ;;  %s355_s25 = sadd.s32 1, %s5081_s20 }
   0xa   : > { %s352_s26 = ssub.s32 %s5085_s21, %s5191_s24  ;;  %p365_p0 = scmp.ne.s32.totalorder %s5081_s20, %s5077_s19 }
   0xb   : > { %p353_p1 = scmp.eq.s32.totalorder %s352_s26, 0  ;;  %p366_p2 = scmp.eq.s32.totalorder %s7101_s22, 1 }
   0xc   : > { %p371_p3 = scmp.ne.s32.totalorder %s5077_s19, %s5073_s18  ;;  %p372_p4 = scmp.eq.s32.totalorder %s3901_s23, 1 }
   0xd   : > { %s5203_s27 = scalar_select %p353_p1, %s5081_s20, %s355_s25  }
   0xe   : > { %p5205_p5 = por %p366_p2, %p365_p0  ;;  %p5209_p6 = por %p372_p4, %p371_p3 }
   0xf   : > { %7111 = sst [smem:[#allocation12_spill]] %s5203_s27  ;;  %p3904_p7 = scmp.ge.s32.totalorder %s5085_s21, 1 }
  0x10   : > { %s7113_s29 = scalar_select %p5209_p6, 1, 0 }
  0x11   : > { %p442_p8 = scmp.lt.s32.totalorder %s5085_s21, 3 }
  0x12   : > { %7114 = sst [smem:[#allocation13_spill]] %s7113_s29 }
  0x13   : > { %p443_p9 = pnand %p3904_p7, %p442_p8 }
  0x15   : > { %446 = sbr.rel (%p443_p9) target bundleno = 1574 (0x626), region = 80 }
  0x1a   : > { %s7115_s1 = sld [smem:[#allocation32_spill]]  ;;  %s7116_s24 = sadd.s32 4294967295, %s5085_s21   ;;  %vm499_vm0 = vcmask 778240   ;;  %vm548_vm1 = vcmask 785408   ;;  %vm3807_vm2 = vcmask 130048   ;;  %vm3824_vm3 = vcmask 80896  }
  0x1b   : > { %s5361_s29 = sshll.u32 %s7116_s24, 3  ;;  %s7117_s0 = sld [smem:[#allocation31_spill]] }
  0x1c   : > { %p492_p10 = scmp.lt.s32.totalorder %s5361_s29, 15  ;;  %s7135_s2 = sld [smem:[#allocation33_spill]] }
  0x1e   : > { %s493_s26 = scalar_select %p492_p10, %s5361_s29, 15 }
  0x20   : > { %v3963_v0 = vld [vmem:[%s7115_s1 + $0xb0] sm:$0xf]  ;;  %v4830_v1 = vld [vmem:[%s7115_s1 + $0xb4] sm:$0xf0]  ;;  %v4829_v2 = vld [vmem:[%s7115_s1 + $0xb4] sm:$0xf] }
  0x21   : > { %v3964_v3 = vor.u32 %v4830_v1, %v3963_v0  ;;  %v3965_v4 = vld [vmem:[%s7115_s1 + $0xb8] sm:$0xf0]  ;;  %v4043_v5 = vld [vmem:[%s7115_s1 + $0x50] sm:$0xf]  ;;  %v4818_v6 = vld [vmem:[%s7115_s1 + $0x54] sm:$0xf0] }
  0x22   : > { %v3968_v7 = vor.u32 %v4829_v2, %v3965_v4  ;;  %v4044_v8 = vor.u32 %v4818_v6, %v4043_v5  ;;  %v4817_v9 = vld [vmem:[%s7115_s1 + $0x54] sm:$0xf]  ;;  %v4045_v10 = vld [vmem:[%s7115_s1 + $0x58] sm:$0xf0]  ;;  %v3955_v11 = vld [vmem:[%s7115_s1 + $0xa0] sm:$0xf] }
  0x23   : > { %812 = vmatpush.bf16.msra.mxu0 %v3964_v3  ;;  %v4048_v12 = vor.u32 %v4817_v9, %v4045_v10  ;;  %v4828_v13 = vld [vmem:[%s7115_s1 + $0xa4] sm:$0xf0]  ;;  %v4827_v14 = vld [vmem:[%s7115_s1 + $0xa4] sm:$0xf]  ;;  %v3957_v15 = vld [vmem:[%s7115_s1 + $0xa8] sm:$0xf0] }
  0x24   : > { %901 = vmatpush.bf16.msra.mxu1 %v3968_v7  ;;  %1098 = vmatpush.bf16.msra.mxu2 %v4044_v8  ;;  %v3956_v16 = vor.u32 %v4828_v13, %v3955_v11  ;;  %v3960_v17 = vor.u32 %v4827_v14, %v3957_v15  ;;  %v4035_v18 = vld [vmem:[%s7115_s1 + $0x40] sm:$0xf]  ;;  %v4816_v19 = vld [vmem:[%s7115_s1 + $0x44] sm:$0xf0]  ;;  %v4815_v20 = vld [vmem:[%s7115_s1 + $0x44] sm:$0xf] }
  0x25   : > { %1187 = vmatpush.bf16.msra.mxu3 %v4048_v12  ;;  %v4036_v21 = vor.u32 %v4816_v19, %v4035_v18  ;;  %v4037_v22 = vld [vmem:[%s7115_s1 + $0x48] sm:$0xf0]  ;;  %v3947_v23 = vld [vmem:[%s7115_s1 + $0x90] sm:$0xf]  ;;  %v4826_v24 = vld [vmem:[%s7115_s1 + $0x94] sm:$0xf0] }
  0x26   : > { %v4040_v25 = vor.u32 %v4815_v20, %v4037_v22  ;;  %v4825_v26 = vld [vmem:[%s7115_s1 + $0x94] sm:$0xf]  ;;  %v3949_v27 = vld [vmem:[%s7115_s1 + $0x98] sm:$0xf0]  ;;  %v4027_v28 = vld [vmem:[%s7115_s1 + $0x30] sm:$0xf]  ;;  %v3948_v29 = vor.u32 %v4826_v24, %v3947_v23 }
  0x27   : > { %813 = vmatpush.bf16.msra.mxu0 %v3956_v16  ;;  %v4814_v30 = vld [vmem:[%s7115_s1 + $0x34] sm:$0xf0]  ;;  %v4813_v31 = vld [vmem:[%s7115_s1 + $0x34] sm:$0xf]  ;;  %v4029_v32 = vld [vmem:[%s7115_s1 + $0x38] sm:$0xf0]  ;;  %v3952_v33 = vor.u32 %v4825_v26, %v3949_v27 }
  0x28   : > { %902 = vmatpush.bf16.msra.mxu1 %v3960_v17  ;;  %1099 = vmatpush.bf16.msra.mxu2 %v4036_v21  ;;  %v4028_v34 = vor.u32 %v4814_v30, %v4027_v28  ;;  %v3939_v35 = vld [vmem:[%s7115_s1 + $0x80] sm:$0xf]  ;;  %v4824_v36 = vld [vmem:[%s7115_s1 + $0x84] sm:$0xf0]  ;;  %v4823_v37 = vld [vmem:[%s7115_s1 + $0x84] sm:$0xf]  ;;  %v4032_v38 = vor.u32 %v4813_v31, %v4029_v32 }
  0x29   : > { %1188 = vmatpush.bf16.msra.mxu3 %v4040_v25  ;;  %v3941_v39 = vld [vmem:[%s7115_s1 + $0x88] sm:$0xf0]  ;;  %v4019_v40 = vld [vmem:[%s7115_s1 + $0x20] sm:$0xf]  ;;  %v4812_v41 = vld [vmem:[%s7115_s1 + $0x24] sm:$0xf0]  ;;  %v3940_v44 = vor.u32 %v4824_v36, %v3939_v35 }
  0x2a   : > { %v4811_v42 = vld [vmem:[%s7115_s1 + $0x24] sm:$0xf]  ;;  %v4021_v43 = vld [vmem:[%s7115_s1 + $0x28] sm:$0xf0]  ;;  %v3931_v45 = vld [vmem:[%s7115_s1 + $0x70] sm:$0xf]  ;;  %v3944_v46 = vor.u32 %v4823_v37, %v3941_v39  ;;  %v4020_v47 = vor.u32 %v4812_v41, %v4019_v40 }
  0x2b   : > { %814 = vmatpush.bf16.msra.mxu0 %v3948_v29  ;;  %v4822_v48 = vld [vmem:[%s7115_s1 + $0x74] sm:$0xf0]  ;;  %v4821_v49 = vld [vmem:[%s7115_s1 + $0x74] sm:$0xf]  ;;  %v3933_v50 = vld [vmem:[%s7115_s1 + $0x78] sm:$0xf0]  ;;  %v4024_v51 = vor.u32 %v4811_v42, %v4021_v43 }
  0x2c   : > { %903 = vmatpush.bf16.msra.mxu1 %v3952_v33  ;;  %1100 = vmatpush.bf16.msra.mxu2 %v4028_v34  ;;  %v4011_v52 = vld [vmem:[%s7115_s1 + $0x10] sm:$0xf]  ;;  %v4810_v53 = vld [vmem:[%s7115_s1 + $0x14] sm:$0xf0]  ;;  %v4809_v54 = vld [vmem:[%s7115_s1 + $0x14] sm:$0xf]  ;;  %v3932_v58 = vor.u32 %v4822_v48, %v3931_v45  ;;  %v3936_v63 = vor.u32 %v4821_v49, %v3933_v50 }
  0x2d   : > { %1189 = vmatpush.bf16.msra.mxu3 %v4032_v38  ;;  %v4013_v55 = vld [vmem:[%s7115_s1 + $0x18] sm:$0xf0]  ;;  %v3923_v56 = vld [vmem:[%s7115_s1 + $0x60] sm:$0xf]  ;;  %v4820_v57 = vld [vmem:[%s7115_s1 + $0x64] sm:$0xf0]  ;;  %v4012_v0 = vor.u32 %v4810_v53, %v4011_v52 }
  0x2e   : > { %v4819_v59 = vld [vmem:[%s7115_s1 + $0x64] sm:$0xf]  ;;  %v3925_v60 = vld [vmem:[%s7115_s1 + $0x68] sm:$0xf0]  ;;  %v4003_v61 = vld [vmem:[%s7115_s1] sm:$0xf]  ;;  %v4016_v3 = vor.u32 %v4809_v54, %v4013_v55  ;;  %v3924_v5 = vor.u32 %v4820_v57, %v3923_v56 }
  0x2f   : > { %815 = vmatpush.bf16.msra.mxu0 %v3940_v44  ;;  %v4808_v62 = vld [vmem:[%s7115_s1 + $0x4] sm:$0xf0]  ;;  %v4807_v1 = vld [vmem:[%s7115_s1 + $0x4] sm:$0xf]  ;;  %v4005_v2 = vld [vmem:[%s7115_s1 + $0x8] sm:$0xf0]  ;;  %v3928_v6 = vor.u32 %v4819_v59, %v3925_v60 }
  0x30   : > { %904 = vmatpush.bf16.msra.mxu1 %v3944_v46  ;;  %1101 = vmatpush.bf16.msra.mxu2 %v4020_v47  ;;  %v5087_v4 = vmov 0.0   ;;  %v4004_v7 = vor.u32 %v4808_v62, %v4003_v61  ;;  %v4008_v8 = vor.u32 %v4807_v1, %v4005_v2  ;;  %s4806_s30 = sshll.u32 %s493_s26, 5  ;;  %v4135_v17 = vld [vmem:[%s7115_s1 + $0x110] sm:$0xf]  ;;  %v4842_v18 = vld [vmem:[%s7115_s1 + $0x114] sm:$0xf0] }
  0x31   : > { %1190 = vmatpush.bf16.msra.mxu3 %v4024_v51  ;;  %500 = vst.msk [vmem:[#allocation2] sm:$0x1] %vm499_vm0, %v5087_v4  ;;  %s5376_s23 = scalar_lea.vmem %s7117_s0, %s4806_s30  ;;  %v4136_v19 = vor.u32 %v4842_v18, %v4135_v17  ;;  %v4841_v20 = vld [vmem:[%s7115_s1 + $0x114] sm:$0xf]  ;;  %v4137_v21 = vld [vmem:[%s7115_s1 + $0x118] sm:$0xf0]  ;;  %s3837_s30 = scalar_lea.hbm %s7100_s15, %s5361_s29 }
  0x32   : > { %501 = vst.msk [vmem:[#allocation2 + $0x28] sm:$0x1] %vm499_vm0, %v5087_v4  ;;  %v516_v9 = vld [vmem:[%s5376_s23] sm:$0xff]  ;;  %v517_v10 = vld [vmem:[%s5376_s23 + $0x8] sm:$0xff]  ;;  %v4140_v22 = vor.u32 %v4841_v20, %v4137_v21  ;;  %v518_v23 = vld [vmem:[%s5376_s23 + $0x10] sm:$0xff]  ;;  %s3841_s27 = sshll.u32 %s3837_s30, 4  ;;  %s3842_s27 = int_to_ptr.hbm [resolvable:$true] %s3841_s27 }
  0x33   : > { %816 = vmatpush.bf16.msra.mxu0 %v3932_v58  ;;  %502 = vst.msk [vmem:[#allocation2 + $0x50] sm:$0x1] %vm499_vm0, %v5087_v4  ;;  %v4127_v24 = vld [vmem:[%s7115_s1 + $0x100] sm:$0xf]  ;;  %v4840_v25 = vld [vmem:[%s7115_s1 + $0x104] sm:$0xf0] }
  0x34   : > { %905 = vmatpush.bf16.msra.mxu1 %v3936_v63  ;;  %1102 = vmatpush.bf16.msra.mxu2 %v4012_v0  ;;  %503 = vst.msk [vmem:[#allocation2 + $0x78] sm:$0x1] %vm499_vm0, %v5087_v4  ;;  %v4128_v26 = vor.u32 %v4840_v25, %v4127_v24  ;;  %v4839_v27 = vld [vmem:[%s7115_s1 + $0x104] sm:$0xf]  ;;  %v4129_v28 = vld [vmem:[%s7115_s1 + $0x108] sm:$0xf0] }
  0x35   : > { %1191 = vmatpush.bf16.msra.mxu3 %v4016_v3  ;;  %504 = vst.msk [vmem:[#allocation2 + $0xa0] sm:$0x1] %vm499_vm0, %v5087_v4  ;;  %v519_v29 = vld [vmem:[%s5376_s23 + $0x18] sm:$0xff]  ;;  %v4132_v30 = vor.u32 %v4839_v27, %v4129_v28  ;;  %v520_v31 = vld [vmem:[%s5376_s23 + $0x20] sm:$0xff]  ;;  %v521_v32 = vld [vmem:[%s5376_s23 + $0x28] sm:$0xff] }
  0x36   : > { %505 = vst.msk [vmem:[#allocation2 + $0xc8] sm:$0x1] %vm499_vm0, %v5087_v4  ;;  %v522_v33 = vld [vmem:[%s5376_s23 + $0x30] sm:$0xff]  ;;  %v523_v34 = vld [vmem:[%s5376_s23 + $0x38] sm:$0xff]  ;;  %v524_v41 = vld [vmem:[%s5376_s23 + $0x40] sm:$0xff] }
  0x37   : > { %817 = vmatpush.bf16.msra.mxu0 %v3924_v5  ;;  %549 = vst.msk [vmem:[#allocation2 + $0x1] sm:$0xff] %vm548_vm1, %v516_v9  ;;  %v525_v42 = vld [vmem:[%s5376_s23 + $0x48] sm:$0xff]  ;;  %v526_v49 = vld [vmem:[%s5376_s23 + $0x50] sm:$0xff]  ;;  %v527_v50 = vld [vmem:[%s5376_s23 + $0x58] sm:$0xff] }
  0x38   : > { %906 = vmatpush.bf16.msra.mxu1 %v3928_v6  ;;  %1103 = vmatpush.bf16.msra.mxu2 %v4004_v7  ;;  %550 = vst.msk [vmem:[#allocation2 + $0x9] sm:$0xff] %vm548_vm1, %v517_v10  ;;  %v4119_v57 = vld [vmem:[%s7115_s1 + $0xf0] sm:$0xf]  ;;  %v4838_v58 = vld [vmem:[%s7115_s1 + $0xf4] sm:$0xf0]  ;;  %v528_v62 = vld [vmem:[%s5376_s23 + $0x60] sm:$0xff] }
  0x39   : > { %1192 = vmatpush.bf16.msra.mxu3 %v4008_v8  ;;  %506 = vst.msk [vmem:[#allocation2 + $0xf0] sm:$0x1] %vm499_vm0, %v5087_v4  ;;  %v4837_v59 = vld [vmem:[%s7115_s1 + $0xf4] sm:$0xf]  ;;  %v4120_v60 = vor.u32 %v4838_v58, %v4119_v57  ;;  %v4121_v61 = vld [vmem:[%s7115_s1 + $0xf8] sm:$0xf0] }
  0x3a   : > { %507 = vst.msk [vmem:[#allocation2 + $0x118] sm:$0x1] %vm499_vm0, %v5087_v4  ;;  %v529_v63 = vld [vmem:[%s5376_s23 + $0x68] sm:$0xff]  ;;  %v4124_v0 = vor.u32 %v4837_v59, %v4121_v61  ;;  %v530_v7 = vld [vmem:[%s5376_s23 + $0x70] sm:$0xff]  ;;  %v531_v8 = vld [vmem:[%s5376_s23 + $0x78] sm:$0xff] }
  0x3b   : > { %508 = vst.msk [vmem:[#allocation2 + $0x21] sm:$0x1] %vm499_vm0, %v5087_v4  ;;  %1445 = vmatpush.bf16.msrb.mxu0 %v4136_v19  ;;  %v4836_v24 = vld [vmem:[%s7115_s1 + $0xe4] sm:$0xf0]  ;;  %v4835_v25 = vld [vmem:[%s7115_s1 + $0xe4] sm:$0xf] }
  0x3c   : > { %509 = vst.msk [vmem:[#allocation2 + $0x49] sm:$0x1] %vm499_vm0, %v5087_v4  ;;  %1534 = vmatpush.bf16.msrb.mxu1 %v4140_v22  ;;  %v4113_v27 = vld [vmem:[%s7115_s1 + $0xe8] sm:$0xf0] }
  0x3d   : > { %510 = vst.msk [vmem:[#allocation2 + $0x71] sm:$0x1] %vm499_vm0, %v5087_v4  ;;  %v4116_v28 = vor.u32 %v4835_v25, %v4113_v27 }
  0x3e   : > { %v641_v11 = vld [vmem:[#allocation2 + $0x1] sm:$0xff]  ;;  %511 = vst.msk [vmem:[#allocation2 + $0x99] sm:$0x1] %vm499_vm0, %v5087_v4 }
  0x3f   : > { %v581_v12 = vld [vmem:[#allocation2] sm:$0xff]  ;;  %v642_v13 = vld [vmem:[#allocation2 + $0x9] sm:$0xff]  ;;  %512 = vst.msk [vmem:[#allocation2 + $0xc1] sm:$0x1] %vm499_vm0, %v5087_v4  ;;  %1446 = vmatpush.bf16.msrb.mxu0 %v4128_v26 }
  0x40   : > { %v582_v14 = vld [vmem:[#allocation2 + $0x8] sm:$0xff]  ;;  %v673_v15 = vpack.c.bf16 %v642_v13, %v641_v11  ;;  %513 = vst.msk [vmem:[#allocation2 + $0xe9] sm:$0x1] %vm499_vm0, %v5087_v4  ;;  %1535 = vmatpush.bf16.msrb.mxu1 %v4132_v30  ;;  %v535_v30 = vld [vmem:[%s5376_s23 + $0x98] sm:$0xff] }
  0x41   : > { %v613_v16 = vpack.c.bf16 %v582_v14, %v581_v12  ;;  %514 = vst.msk [vmem:[#allocation2 + $0x111] sm:$0x1] %vm499_vm0, %v5087_v4 }
  0x42   : > { %3969 = vmatmul.msk.bf16.vlgmr.msra.gmra.mxu0 %vm548_vm1, %v673_v15  ;;  %3985 = vmatmul.msk.bf16.vlgmr.msra.gmra.mxu1 %vm548_vm1, %v673_v15  ;;  %515 = vst.msk [vmem:[#allocation2 + $0x139] sm:$0x1] %vm499_vm0, %v5087_v4  ;;  %v532_v15 = vld [vmem:[%s5376_s23 + $0x80] sm:$0xff] }
  0x43   : > { %4049 = vmatmul.msk.bf16.vlgmr.msra.gmra.mxu2 %vm548_vm1, %v613_v16  ;;  %1980 = vst [vmem:[#allocation3] sm:$0x1] %v5087_v4  ;;  %4065 = vmatmul.msk.bf16.vlgmr.msra.gmra.mxu3 %vm548_vm1, %v613_v16  ;;  %v533_v16 = vld [vmem:[%s5376_s23 + $0x88] sm:$0xff] }
  0x44   : > { %1981 = vst [vmem:[#allocation3 + $0x18] sm:$0x1] %v5087_v4  ;;  %1447 = vmatpush.bf16.msrb.mxu0 %v4120_v60  ;;  %1536 = vmatpush.bf16.msrb.mxu1 %v4124_v0 }
  0x45   : > { %1982 = vst [vmem:[#allocation3 + $0x30] sm:$0x1] %v5087_v4 }
  0x46   : > { %1983 = vst [vmem:[#allocation3 + $0x48] sm:$0x1] %v5087_v4 }
  0x47   : > { %1984 = vst [vmem:[#allocation3 + $0x60] sm:$0x1] %v5087_v4 }
  0x48   : > { %1985 = vst [vmem:[#allocation3 + $0x78] sm:$0x1] %v5087_v4  ;;  %1537 = vmatpush.bf16.msrb.mxu1 %v4116_v28 }
  0x49   : > { %1986 = vst [vmem:[#allocation3 + $0x90] sm:$0x1] %v5087_v4 }
  0x4a   : > { %1987 = vst [vmem:[#allocation3 + $0xa8] sm:$0x1] %v5087_v4 }
  0x4b   : > { %1988 = vst [vmem:[#allocation3 + $0x11] sm:$0x1] %v5087_v4 }
  0x4c   : > { %1989 = vst [vmem:[#allocation3 + $0x29] sm:$0x1] %v5087_v4 }
  0x4d   : > { %1990 = vst [vmem:[#allocation3 + $0x41] sm:$0x1] %v5087_v4 }
  0x4e   : > { %1991 = vst [vmem:[#allocation3 + $0x59] sm:$0x1] %v5087_v4 }
  0x4f   : > { %1992 = vst [vmem:[#allocation3 + $0x71] sm:$0x1] %v5087_v4 }
  0x50   : > { %1993 = vst [vmem:[#allocation3 + $0x89] sm:$0x1] %v5087_v4 }
  0x51   : > { %1994 = vst [vmem:[#allocation3 + $0xa1] sm:$0x1] %v5087_v4 }
  0x52   : > { %1995 = vst [vmem:[#allocation3 + $0xb9] sm:$0x1] %v5087_v4 }
  0x53   : > { %2843 = vst [vmem:[#allocation4] sm:$0x1] %v5087_v4 }
  0x54   : > { %2844 = vst [vmem:[#allocation4 + $0x10] sm:$0x1] %v5087_v4 }
  0x55   : > { %2845 = vst [vmem:[#allocation4 + $0x20] sm:$0x1] %v5087_v4 }
  0x56   : > { %2846 = vst [vmem:[#allocation4 + $0x30] sm:$0x1] %v5087_v4 }
  0x57   : > { %2847 = vst [vmem:[#allocation4 + $0x40] sm:$0x1] %v5087_v4 }
  0x58   : > { %2848 = vst [vmem:[#allocation4 + $0x50] sm:$0x1] %v5087_v4 }
  0x59   : > { %2849 = vst [vmem:[#allocation4 + $0x60] sm:$0x1] %v5087_v4 }
  0x5a   : > { %2850 = vst [vmem:[#allocation4 + $0x70] sm:$0x1] %v5087_v4 }
  0x5b   : > { %2851 = vst [vmem:[#allocation4 + $0x9] sm:$0x1] %v5087_v4 }
  0x5c   : > { %2852 = vst [vmem:[#allocation4 + $0x19] sm:$0x1] %v5087_v4 }
  0x5d   : > { %2853 = vst [vmem:[#allocation4 + $0x29] sm:$0x1] %v5087_v4 }
  0x5e   : > { %2854 = vst [vmem:[#allocation4 + $0x39] sm:$0x1] %v5087_v4 }
  0x5f   : > { %2855 = vst [vmem:[#allocation4 + $0x49] sm:$0x1] %v5087_v4 }
  0x60   : > { %2856 = vst [vmem:[#allocation4 + $0x59] sm:$0x1] %v5087_v4 }
  0x61   : > { %2857 = vst [vmem:[#allocation4 + $0x69] sm:$0x1] %v5087_v4 }
  0x62   : > { %2858 = vst [vmem:[#allocation4 + $0x79] sm:$0x1] %v5087_v4 }
  0x63   : > { %551 = vst.msk [vmem:[#allocation2 + $0x11] sm:$0xff] %vm548_vm1, %v518_v23  ;;  %v4111_v23 = vld [vmem:[%s7115_s1 + $0xe0] sm:$0xf] }
  0x64   : > { %552 = vst.msk [vmem:[#allocation2 + $0x19] sm:$0xff] %vm548_vm1, %v519_v29  ;;  %v4112_v26 = vor.u32 %v4836_v24, %v4111_v23  ;;  %v534_v29 = vld [vmem:[%s5376_s23 + $0x90] sm:$0xff] }
  0x65   : > { %553 = vst.msk [vmem:[#allocation2 + $0x29] sm:$0xff] %vm548_vm1, %v520_v31 }
  0x66   : > { %554 = vst.msk [vmem:[#allocation2 + $0x31] sm:$0xff] %vm548_vm1, %v521_v32  ;;  %1448 = vmatpush.bf16.msrb.mxu0 %v4112_v26 }
  0x67   : > { %555 = vst.msk [vmem:[#allocation2 + $0x39] sm:$0xff] %vm548_vm1, %v522_v33 }
  0x68   : > { %556 = vst.msk [vmem:[#allocation2 + $0x41] sm:$0xff] %vm548_vm1, %v523_v34 }
  0x69   : > { %557 = vst.msk [vmem:[#allocation2 + $0x51] sm:$0xff] %vm548_vm1, %v524_v41 }
  0x6a   : > { %v643_v35 = vld [vmem:[#allocation2 + $0x11] sm:$0xff]  ;;  %558 = vst.msk [vmem:[#allocation2 + $0x59] sm:$0xff] %vm548_vm1, %v525_v42 }
  0x6b   : > { %v583_v36 = vld [vmem:[#allocation2 + $0x10] sm:$0xff]  ;;  %v644_v37 = vld [vmem:[#allocation2 + $0x19] sm:$0xff]  ;;  %559 = vst.msk [vmem:[#allocation2 + $0x61] sm:$0xff] %vm548_vm1, %v526_v49 }
  0x6c   : > { %v584_v38 = vld [vmem:[#allocation2 + $0x18] sm:$0xff]  ;;  %v674_v39 = vpack.c.bf16 %v644_v37, %v643_v35  ;;  %v645_v43 = vld [vmem:[#allocation2 + $0x29] sm:$0xff]  ;;  %560 = vst.msk [vmem:[#allocation2 + $0x69] sm:$0xff] %vm548_vm1, %v527_v50 }
  0x6d   : > { %v614_v40 = vpack.c.bf16 %v584_v38, %v583_v36  ;;  %v646_v44 = vld [vmem:[#allocation2 + $0x31] sm:$0xff]  ;;  %v585_v45 = vld [vmem:[#allocation2 + $0x28] sm:$0xff]  ;;  %561 = vst.msk [vmem:[#allocation2 + $0x79] sm:$0xff] %vm548_vm1, %v528_v62 }
  0x6e   : > { %3970 = vmatmul.msk.bf16.gmra.mxu0 %vm548_vm1, %v674_v39  ;;  %3986 = vmatmul.msk.bf16.gmra.mxu1 %vm548_vm1, %v674_v39  ;;  %v586_v46 = vld [vmem:[#allocation2 + $0x30] sm:$0xff]  ;;  %v675_v47 = vpack.c.bf16 %v646_v44, %v645_v43  ;;  %v647_v51 = vld [vmem:[#allocation2 + $0x39] sm:$0xff]  ;;  %562 = vst.msk [vmem:[#allocation2 + $0x81] sm:$0xff] %vm548_vm1, %v529_v63  ;;  %v537_v44 = vld [vmem:[%s5376_s23 + $0xa8] sm:$0xff] }
  0x6f   : > { %4050 = vmatmul.msk.bf16.gmra.mxu2 %vm548_vm1, %v614_v40  ;;  %4066 = vmatmul.msk.bf16.gmra.mxu3 %vm548_vm1, %v614_v40  ;;  %v615_v48 = vpack.c.bf16 %v586_v46, %v585_v45  ;;  %v648_v52 = vld [vmem:[#allocation2 + $0x41] sm:$0xff]  ;;  %v587_v53 = vld [vmem:[#allocation2 + $0x38] sm:$0xff]  ;;  %563 = vst.msk [vmem:[#allocation2 + $0x89] sm:$0xff] %vm548_vm1, %v530_v7 }
  0x70   : > { %v588_v54 = vld [vmem:[#allocation2 + $0x40] sm:$0xff]  ;;  %v676_v55 = vpack.c.bf16 %v648_v52, %v647_v51  ;;  %v649_v1 = vld [vmem:[#allocation2 + $0x51] sm:$0xff]  ;;  %564 = vst.msk [vmem:[#allocation2 + $0x91] sm:$0xff] %vm548_vm1, %v531_v8 }
  0x71   : > { %v616_v56 = vpack.c.bf16 %v588_v54, %v587_v53  ;;  %v650_v2 = vld [vmem:[#allocation2 + $0x59] sm:$0xff]  ;;  %v589_v3 = vld [vmem:[#allocation2 + $0x50] sm:$0xff]  ;;  %565 = vst.msk [vmem:[#allocation2 + $0xa1] sm:$0xff] %vm548_vm1, %v532_v15 }
  0x72   : > { %v590_v4 = vld [vmem:[#allocation2 + $0x58] sm:$0xff]  ;;  %v677_v5 = vpack.c.bf16 %v650_v2, %v649_v1  ;;  %v651_v9 = vld [vmem:[#allocation2 + $0x61] sm:$0xff]  ;;  %566 = vst.msk [vmem:[#allocation2 + $0xa9] sm:$0xff] %vm548_vm1, %v533_v16  ;;  %v538_v53 = vld [vmem:[%s5376_s23 + $0xb0] sm:$0xff] }
  0x73   : > { %v617_v6 = vpack.c.bf16 %v590_v4, %v589_v3  ;;  %v652_v10 = vld [vmem:[#allocation2 + $0x69] sm:$0xff]  ;;  %v591_v11 = vld [vmem:[#allocation2 + $0x60] sm:$0xff]  ;;  %567 = vst.msk [vmem:[#allocation2 + $0xb1] sm:$0xff] %vm548_vm1, %v534_v29  ;;  %v539_v54 = vld [vmem:[%s5376_s23 + $0xb8] sm:$0xff] }
  0x74   : > { %v592_v12 = vld [vmem:[#allocation2 + $0x68] sm:$0xff]  ;;  %v678_v13 = vpack.c.bf16 %v652_v10, %v651_v9  ;;  %v653_v17 = vld [vmem:[#allocation2 + $0x79] sm:$0xff]  ;;  %568 = vst.msk [vmem:[#allocation2 + $0xb9] sm:$0xff] %vm548_vm1, %v535_v30  ;;  %v4103_v1 = vld [vmem:[%s7115_s1 + $0xd0] sm:$0xf] }
  0x75   : > { %v618_v14 = vpack.c.bf16 %v592_v12, %v591_v11  ;;  %v654_v18 = vld [vmem:[#allocation2 + $0x81] sm:$0xff]  ;;  %v593_v19 = vld [vmem:[#allocation2 + $0x78] sm:$0xff]  ;;  %570 = vst.msk [vmem:[#allocation2 + $0xd1] sm:$0xff] %vm548_vm1, %v537_v44  ;;  %v4833_v3 = vld [vmem:[%s7115_s1 + $0xd4] sm:$0xf] }
  0x76   : > { %v594_v20 = vld [vmem:[#allocation2 + $0x80] sm:$0xff]  ;;  %v679_v21 = vpack.c.bf16 %v654_v18, %v653_v17  ;;  %v655_v35 = vld [vmem:[#allocation2 + $0x89] sm:$0xff]  ;;  %571 = vst.msk [vmem:[#allocation2 + $0xd9] sm:$0xff] %vm548_vm1, %v538_v53  ;;  %v4834_v2 = vld [vmem:[%s7115_s1 + $0xd4] sm:$0xf0] }
  0x77   : > { %v619_v22 = vpack.c.bf16 %v594_v20, %v593_v19  ;;  %v656_v36 = vld [vmem:[#allocation2 + $0x91] sm:$0xff]  ;;  %v595_v39 = vld [vmem:[#allocation2 + $0x88] sm:$0xff]  ;;  %v536_v43 = vld [vmem:[%s5376_s23 + $0xa0] sm:$0xff]  ;;  %572 = vst.msk [vmem:[#allocation2 + $0xe1] sm:$0xff] %vm548_vm1, %v539_v54  ;;  %v4104_v4 = vor.u32 %v4834_v2, %v4103_v1 }
  0x78   : > { %v596_v40 = vld [vmem:[#allocation2 + $0x90] sm:$0xff]  ;;  %v680_v41 = vpack.c.bf16 %v656_v36, %v655_v35  ;;  %569 = vst.msk [vmem:[#allocation2 + $0xc9] sm:$0xff] %vm548_vm1, %v536_v43  ;;  %v657_v45 = vld [vmem:[#allocation2 + $0xa1] sm:$0xff] }
  0x79   : > { %v620_v42 = vpack.c.bf16 %v596_v40, %v595_v39  ;;  %v658_v46 = vld [vmem:[#allocation2 + $0xa9] sm:$0xff]  ;;  %1449 = vmatpush.bf16.msrb.mxu0 %v4104_v4 }
  0x7a   : > { %v681_v49 = vpack.c.bf16 %v658_v46, %v657_v45  ;;  %v599_v59 = vld [vmem:[#allocation2 + $0xb0] sm:$0xff]  ;;  %v545_v1 = vld [vmem:[%s5376_s23 + $0xe8] sm:$0xff] }
  0x7b   : > { %v600_v60 = vld [vmem:[#allocation2 + $0xb8] sm:$0xff]  ;;  %578 = vst.msk [vmem:[#allocation2 + $0x121] sm:$0xff] %vm548_vm1, %v545_v1  ;;  %v1274_v1 = vld [vmem:[#allocation2 + $0x2] sm:$0xff] }
  0x7c   : > { %v622_v0 = vpack.c.bf16 %v600_v60, %v599_v59  ;;  %v662_v16 = vld [vmem:[#allocation2 + $0xd1] sm:$0xff]  ;;  %v4095_v59 = vld [vmem:[%s7115_s1 + $0xc0] sm:$0xf]  ;;  %v4832_v60 = vld [vmem:[%s7115_s1 + $0xc4] sm:$0xf0] }
  0x7d   : > { %v663_v35 = vld [vmem:[#allocation2 + $0xd9] sm:$0xff] }
  0x7e   : > { %3971 = vmatmul.msk.bf16.gmra.mxu0 %vm548_vm1, %v675_v47  ;;  %3987 = vmatmul.msk.bf16.gmra.mxu1 %vm548_vm1, %v675_v47  ;;  %v597_v47 = vld [vmem:[#allocation2 + $0xa0] sm:$0xff]  ;;  %v603_v39 = vld [vmem:[#allocation2 + $0xd8] sm:$0xff] }
  0x7f   : > { %4051 = vmatmul.msk.bf16.gmra.mxu2 %vm548_vm1, %v615_v48  ;;  %4067 = vmatmul.msk.bf16.gmra.mxu3 %vm548_vm1, %v615_v48  ;;  %v598_v48 = vld [vmem:[#allocation2 + $0xa8] sm:$0xff]  ;;  %v602_v18 = vld [vmem:[#allocation2 + $0xd0] sm:$0xff]  ;;  %v604_v40 = vld [vmem:[#allocation2 + $0xe0] sm:$0xff] }
  0x80   : > { %v621_v50 = vpack.c.bf16 %v598_v48, %v597_v47  ;;  %v661_v15 = vld [vmem:[#allocation2 + $0xc9] sm:$0xff]  ;;  %v664_v36 = vld [vmem:[#allocation2 + $0xe1] sm:$0xff]  ;;  %v624_v48 = vpack.c.bf16 %v604_v40, %v603_v39 }
  0x81   : > { %v601_v17 = vld [vmem:[#allocation2 + $0xc8] sm:$0xff]  ;;  %v684_v43 = vpack.c.bf16 %v664_v36, %v663_v35 }
  0x82   : > { %v623_v26 = vpack.c.bf16 %v602_v18, %v601_v17  ;;  %v670_v36 = vld [vmem:[#allocation2 + $0x121] sm:$0xff] }
  0x8e   : > { %3972 = vmatmul.msk.bf16.gmra.mxu0 %vm548_vm1, %v676_v55  ;;  %3988 = vmatmul.msk.bf16.gmra.mxu1 %vm548_vm1, %v676_v55  ;;  %v659_v55 = vld [vmem:[#allocation2 + $0xb1] sm:$0xff] }
  0x8f   : > { %4052 = vmatmul.msk.bf16.gmra.mxu2 %vm548_vm1, %v616_v56  ;;  %4068 = vmatmul.msk.bf16.gmra.mxu3 %vm548_vm1, %v616_v56  ;;  %v660_v56 = vld [vmem:[#allocation2 + $0xb9] sm:$0xff] }
  0x90   : > { %v682_v61 = vpack.c.bf16 %v660_v56, %v659_v55 }
  0x9e   : > { %3973 = vmatmul.msk.bf16.gmra.mxu0 %vm548_vm1, %v677_v5  ;;  %3989 = vmatmul.msk.bf16.gmra.mxu1 %vm548_vm1, %v677_v5  ;;  %v4105_v5 = vld [vmem:[%s7115_s1 + $0xd8] sm:$0xf0] }
  0x9f   : > { %4053 = vmatmul.msk.bf16.gmra.mxu2 %vm548_vm1, %v617_v6  ;;  %4069 = vmatmul.msk.bf16.gmra.mxu3 %vm548_vm1, %v617_v6  ;;  %v4108_v6 = vor.u32 %v4833_v3, %v4105_v5 }
  0xa1   : > { %1538 = vmatpush.bf16.msrb.mxu1 %v4108_v6 }
  0xae   : > { %3974 = vmatmul.msk.bf16.gmra.mxu0 %vm548_vm1, %v678_v13  ;;  %3990 = vmatmul.msk.bf16.gmra.mxu1 %vm548_vm1, %v678_v13  ;;  %v540_v13 = vld [vmem:[%s5376_s23 + $0xc0] sm:$0xff] }
  0xaf   : > { %4054 = vmatmul.msk.bf16.gmra.mxu2 %vm548_vm1, %v618_v14  ;;  %4070 = vmatmul.msk.bf16.gmra.mxu3 %vm548_vm1, %v618_v14  ;;  %v541_v14 = vld [vmem:[%s5376_s23 + $0xc8] sm:$0xff]  ;;  %573 = vst.msk [vmem:[#allocation2 + $0xf1] sm:$0xff] %vm548_vm1, %v540_v13 }
  0xb0   : > { %574 = vst.msk [vmem:[#allocation2 + $0xf9] sm:$0xff] %vm548_vm1, %v541_v14 }
  0xb6   : > { %v665_v3 = vld [vmem:[#allocation2 + $0xf1] sm:$0xff] }
  0xb7   : > { %v666_v4 = vld [vmem:[#allocation2 + $0xf9] sm:$0xff]  ;;  %v605_v5 = vld [vmem:[#allocation2 + $0xf0] sm:$0xff] }
  0xb8   : > { %v606_v6 = vld [vmem:[#allocation2 + $0xf8] sm:$0xff] }
  0xbe   : > { %3975 = vmatmul.msk.bf16.gmra.mxu0 %vm548_vm1, %v679_v21  ;;  %3991 = vmatmul.msk.bf16.gmra.mxu1 %vm548_vm1, %v679_v21  ;;  %v683_v21 = vpack.c.bf16 %v662_v16, %v661_v15  ;;  %v625_v16 = vpack.c.bf16 %v606_v6, %v605_v5 }
  0xbf   : > { %4055 = vmatmul.msk.bf16.gmra.mxu2 %vm548_vm1, %v619_v22  ;;  %4071 = vmatmul.msk.bf16.gmra.mxu3 %vm548_vm1, %v619_v22  ;;  %v819_v31 = vpop.f32.mrf.mxu0  ;;  %v908_v32 = vpop.f32.mrf.mxu1 }
  0xc6   : > { %v1105_v33 = vpop.f32.mrf.mxu2  ;;  %v1194_v34 = vpop.f32.mrf.mxu3 }
  0xc7   : > { %v5550_v37 = vadd.f32 %v1105_v33, %v819_v31  ;;  %v5552_v38 = vadd.f32 %v1194_v34, %v908_v32  ;;  %v5566_v51 = vpop.f32.mrf.mxu0  ;;  %v5568_v52 = vpop.f32.mrf.mxu1  ;;  %v542_v33 = vld [vmem:[%s5376_s23 + $0xd0] sm:$0xff]  ;;  %v543_v34 = vld [vmem:[%s5376_s23 + $0xd8] sm:$0xff] }
  0xc8   : > { %575 = vst.msk [vmem:[#allocation2 + $0x101] sm:$0xff] %vm548_vm1, %v542_v33 }
  0xc9   : > { %576 = vst.msk [vmem:[#allocation2 + $0x109] sm:$0xff] %vm548_vm1, %v543_v34 }
  0xce   : > { %3976 = vmatmul.msk.bf16.gmra.mxu0 %vm548_vm1, %v680_v41  ;;  %3992 = vmatmul.msk.bf16.gmra.mxu1 %vm548_vm1, %v680_v41  ;;  %v5574_v57 = vpop.f32.mrf.mxu2  ;;  %v5576_v58 = vpop.f32.mrf.mxu3 }
  0xcf   : > { %4056 = vmatmul.msk.bf16.gmra.mxu2 %vm548_vm1, %v620_v42  ;;  %4072 = vmatmul.msk.bf16.gmra.mxu3 %vm548_vm1, %v620_v42 }
  0xde   : > { %3977 = vmatmul.msk.bf16.gmra.mxu0 %vm548_vm1, %v681_v49  ;;  %3993 = vmatmul.msk.bf16.gmra.mxu1 %vm548_vm1, %v681_v49 }
  0xdf   : > { %4057 = vmatmul.msk.bf16.gmra.mxu2 %vm548_vm1, %v621_v50  ;;  %4073 = vmatmul.msk.bf16.gmra.mxu3 %vm548_vm1, %v621_v50 }
  0xeb   : > { %v824_v62 = vpop.f32.mrf.mxu0  ;;  %v913_v63 = vpop.f32.mrf.mxu1 }
  0xee   : > { %3978 = vmatmul.msk.bf16.gmra.mxu0 %vm548_vm1, %v682_v61  ;;  %3994 = vmatmul.msk.bf16.gmra.mxu1 %vm548_vm1, %v682_v61  ;;  %v4831_v61 = vld [vmem:[%s7115_s1 + $0xc4] sm:$0xf] }
  0xef   : > { %4058 = vmatmul.msk.bf16.gmra.mxu2 %vm548_vm1, %v622_v0  ;;  %4074 = vmatmul.msk.bf16.gmra.mxu3 %vm548_vm1, %v622_v0  ;;  %v544_v0 = vld [vmem:[%s5376_s23 + $0xe0] sm:$0xff] }
  0xf0   : > { %577 = vst.msk [vmem:[#allocation2 + $0x119] sm:$0xff] %vm548_vm1, %v544_v0 }
  0xf2   : > { %v1110_v7 = vpop.f32.mrf.mxu2  ;;  %v1199_v8 = vpop.f32.mrf.mxu3 }
  0xf3   : > { %v5594_v9 = vadd.f32 %v1110_v7, %v824_v62  ;;  %v5596_v10 = vadd.f32 %v1199_v8, %v913_v63  ;;  %v826_v11 = vpop.f32.mrf.mxu0  ;;  %v915_v12 = vpop.f32.mrf.mxu1  ;;  %v4096_v62 = vor.u32 %v4832_v60, %v4095_v59  ;;  %v4097_v63 = vld [vmem:[%s7115_s1 + $0xc8] sm:$0xf0]  ;;  %s5037_s1 = sshra.s32 %s3842_s27, 4  ;;  %s5038_s1 = int_to_ptr.hbm [resolvable:$true] %s5037_s1 }
  0xf4   : > { %v4100_v2 = vor.u32 %v4831_v61, %v4097_v63  ;;  %p5044_p0 = scmp.lt.s32.totalorder %s5038_s1, %s7100_s15 }
  0xf5   : > { %1450 = vmatpush.bf16.msrb.mxu0 %v4096_v62 }
  0xf6   : > { %1539 = vmatpush.bf16.msrb.mxu1 %v4100_v2  ;;  %v1275_v2 = vld [vmem:[#allocation2 + $0xa] sm:$0xff] }
  0xf7   : > { %v669_v35 = vld [vmem:[#allocation2 + $0x119] sm:$0xff] }
  0xf8   : > { %v609_v39 = vld [vmem:[#allocation2 + $0x118] sm:$0xff]  ;;  %v610_v40 = vld [vmem:[#allocation2 + $0x120] sm:$0xff] }
  0xfa   : > { %v1112_v19 = vpop.f32.mrf.mxu2  ;;  %v1201_v20 = vpop.f32.mrf.mxu3 }
  0xfb   : > { %v5602_v22 = vadd.f32 %v1112_v19, %v826_v11  ;;  %v5604_v23 = vadd.f32 %v1201_v20, %v915_v12  ;;  %v829_v24 = vpop.f32.mrf.mxu0  ;;  %v918_v25 = vpop.f32.mrf.mxu1  ;;  %v685_v11 = vpack.c.bf16 %v666_v4, %v665_v3  ;;  %v546_v19 = vld [vmem:[%s5376_s23 + $0xf0] sm:$0xff]  ;;  %v547_v20 = vld [vmem:[%s5376_s23 + $0xf8] sm:$0xff]  ;;  %v1306_v3 = vpack.c.bf16 %v1275_v2, %v1274_v1  ;;  %v4241_v2 = vld [vmem:[%s7089_s4 + $0xe8] sm:$0xf0]  ;;  %s488_s23 = sand.u32 1, %s5077_s19  }
  0xfc   : > { %579 = vst.msk [vmem:[#allocation2 + $0x129] sm:$0xff] %vm548_vm1, %v546_v19  ;;  %s3905_s20 = sshll.u32 %s488_s23, 3  ;;  %s3827_s0 = scalar_lea.sflag [#allocation8], %s488_s23 }
  0xfd   : > { %580 = vst.msk [vmem:[#allocation2 + $0x131] sm:$0xff] %vm548_vm1, %v547_v20  ;;  %v4249_v20 = vld [vmem:[%s7089_s4 + $0xf8] sm:$0xf0]  ;;  %s490_s25 = scalar_lea.vmem [#allocation7], %s3905_s20  ;;  %s5043_s20 = scalar_lea.hbm %s7100_s15, 16 }
  0xfe   : > { %3979 = vmatmul.msk.bf16.gmra.mxu0 %vm548_vm1, %v683_v21  ;;  %3995 = vmatmul.msk.bf16.gmra.mxu1 %vm548_vm1, %v683_v21  ;;  %v667_v21 = vld [vmem:[#allocation2 + $0x101] sm:$0xff]  ;;  %s3839_s22 = sshll.u32 %s490_s25, 4  ;;  %s3840_s22 = int_to_ptr.vmem [resolvable:$true] %s3839_s22 }
  0xff   : > { %4059 = vmatmul.msk.bf16.gmra.mxu2 %vm548_vm1, %v623_v26  ;;  %4075 = vmatmul.msk.bf16.gmra.mxu3 %vm548_vm1, %v623_v26  ;;  %v608_v26 = vld [vmem:[#allocation2 + $0x108] sm:$0xff] }
 0x102   : > { %v1115_v27 = vpop.f32.mrf.mxu2  ;;  %v1204_v28 = vpop.f32.mrf.mxu3 }
 0x103   : > { %v5610_v29 = vadd.f32 %v1115_v27, %v829_v24  ;;  %v5612_v30 = vadd.f32 %v1204_v28, %v918_v25  ;;  %v831_v31 = vpop.f32.mrf.mxu0  ;;  %v920_v32 = vpop.f32.mrf.mxu1  ;;  %v668_v24 = vld [vmem:[#allocation2 + $0x109] sm:$0xff]  ;;  %v607_v25 = vld [vmem:[#allocation2 + $0x100] sm:$0xff] }
 0x104   : > { %v686_v27 = vpack.c.bf16 %v668_v24, %v667_v21  ;;  %v1276_v24 = vld [vmem:[#allocation2 + $0x12] sm:$0xff] }
 0x10a   : > { %v1117_v41 = vpop.f32.mrf.mxu2  ;;  %v1206_v42 = vpop.f32.mrf.mxu3 }
 0x10b   : > { %v5618_v44 = vadd.f32 %v1117_v41, %v831_v31  ;;  %v5620_v45 = vadd.f32 %v1206_v42, %v920_v32  ;;  %v834_v46 = vpop.f32.mrf.mxu0  ;;  %v923_v47 = vpop.f32.mrf.mxu1  ;;  %v626_v32 = vpack.c.bf16 %v608_v26, %v607_v25  ;;  %v687_v41 = vpack.c.bf16 %v670_v36, %v669_v35  ;;  %v1277_v25 = vld [vmem:[#allocation2 + $0x1a] sm:$0xff] }
 0x10c   : > { %v1307_v26 = vpack.c.bf16 %v1277_v25, %v1276_v24  ;;  %v1282_v25 = vld [vmem:[#allocation2 + $0x52] sm:$0xff] }
 0x10e   : > { %3980 = vmatmul.msk.bf16.gmra.mxu0 %vm548_vm1, %v684_v43  ;;  %3996 = vmatmul.msk.bf16.gmra.mxu1 %vm548_vm1, %v684_v43 }
 0x10f   : > { %4060 = vmatmul.msk.bf16.gmra.mxu2 %vm548_vm1, %v624_v48  ;;  %4076 = vmatmul.msk.bf16.gmra.mxu3 %vm548_vm1, %v624_v48 }
 0x112   : > { %v1120_v49 = vpop.f32.mrf.mxu2  ;;  %v1209_v50 = vpop.f32.mrf.mxu3 }
 0x113   : > { %v5626_v53 = vadd.f32 %v1120_v49, %v834_v46  ;;  %v5628_v54 = vadd.f32 %v1209_v50, %v923_v47  ;;  %v836_v55 = vpop.f32.mrf.mxu0  ;;  %v925_v56 = vpop.f32.mrf.mxu1  ;;  %v627_v46 = vpack.c.bf16 %v610_v40, %v609_v39  ;;  %v671_v49 = vld [vmem:[#allocation2 + $0x129] sm:$0xff]  ;;  %v672_v50 = vld [vmem:[#allocation2 + $0x131] sm:$0xff] }
 0x114   : > { %v688_v59 = vpack.c.bf16 %v672_v50, %v671_v49  ;;  %v1278_v39 = vld [vmem:[#allocation2 + $0x2a] sm:$0xff]  ;;  %v1279_v40 = vld [vmem:[#allocation2 + $0x32] sm:$0xff] }
 0x11a   : > { %v1122_v7 = vpop.f32.mrf.mxu2  ;;  %v1211_v8 = vpop.f32.mrf.mxu3 }
 0x11b   : > { %v5646_v12 = vadd.f32 %v1122_v7, %v836_v55  ;;  %v5648_v13 = vadd.f32 %v1211_v8, %v925_v56  ;;  %v5650_v14 = vpop.f32.mrf.mxu0  ;;  %v5652_v15 = vpop.f32.mrf.mxu1  ;;  %v611_v55 = vld [vmem:[#allocation2 + $0x128] sm:$0xff]  ;;  %v612_v56 = vld [vmem:[#allocation2 + $0x130] sm:$0xff] }
 0x11c   : > { %v628_v62 = vpack.c.bf16 %v612_v56, %v611_v55  ;;  %v4247_v8 = vld [vmem:[%s7089_s4 + $0xf0] sm:$0xf]  ;;  %v4239_v56 = vld [vmem:[%s7089_s4 + $0xe0] sm:$0xf] }
 0x11e   : > { %3981 = vmatmul.msk.bf16.gmra.mxu0 %vm548_vm1, %v685_v11  ;;  %3997 = vmatmul.msk.bf16.gmra.mxu1 %vm548_vm1, %v685_v11  ;;  %v4874_v11 = vld [vmem:[%s7089_s4 + $0xf4] sm:$0xf0] }
 0x11f   : > { %4061 = vmatmul.msk.bf16.gmra.mxu2 %vm548_vm1, %v625_v16  ;;  %4077 = vmatmul.msk.bf16.gmra.mxu3 %vm548_vm1, %v625_v16  ;;  %v4873_v16 = vld [vmem:[%s7089_s4 + $0xf4] sm:$0xf]  ;;  %v4248_v19 = vor.u32 %v4874_v11, %v4247_v8  ;;  %v1280_v8 = vld [vmem:[#allocation2 + $0x3a] sm:$0xff]  ;;  %v1281_v11 = vld [vmem:[#allocation2 + $0x42] sm:$0xff] }
 0x120   : > { %v4252_v21 = vor.u32 %v4873_v16, %v4249_v20  ;;  %v1309_v16 = vpack.c.bf16 %v1281_v11, %v1280_v8  ;;  %v4233_v8 = vld [vmem:[%s7089_s4 + $0xd8] sm:$0xf0] }
 0x121   : > { %2173 = vmatpush.bf16.msrb.mxu2 %v4248_v19 }
 0x122   : > { %2222 = vmatpush.bf16.msrb.mxu3 %v4252_v21 }
 0x123   : > { %v5658_v17 = vpop.f32.mrf.mxu0  ;;  %v5660_v18 = vpop.f32.mrf.mxu1 }
 0x12b   : > { %v5666_v28 = vpop.f32.mrf.mxu0  ;;  %v5668_v31 = vpop.f32.mrf.mxu1 }
 0x12e   : > { %3982 = vmatmul.msk.bf16.gmra.mxu0 %vm548_vm1, %v686_v27  ;;  %3998 = vmatmul.msk.bf16.gmra.mxu1 %vm548_vm1, %v686_v27 }
 0x12f   : > { %4062 = vmatmul.msk.bf16.gmra.mxu2 %vm548_vm1, %v626_v32  ;;  %4078 = vmatmul.msk.bf16.gmra.mxu3 %vm548_vm1, %v626_v32 }
 0x133   : > { %v5674_v33 = vpop.f32.mrf.mxu0  ;;  %v5676_v34 = vpop.f32.mrf.mxu1 }
 0x13b   : > { %v5678_v42 = vpop.f32.mrf.mxu0  ;;  %v5680_v43 = vpop.f32.mrf.mxu1 }
 0x13e   : > { %3983 = vmatmul.msk.bf16.gmra.mxu0 %vm548_vm1, %v687_v41  ;;  %3999 = vmatmul.msk.bf16.gmra.mxu1 %vm548_vm1, %v687_v41  ;;  %v1308_v41 = vpack.c.bf16 %v1279_v40, %v1278_v39 }
 0x13f   : > { %4063 = vmatmul.msk.bf16.gmra.mxu2 %vm548_vm1, %v627_v46  ;;  %4079 = vmatmul.msk.bf16.gmra.mxu3 %vm548_vm1, %v627_v46 }
 0x143   : > { %v5686_v47 = vpop.f32.mrf.mxu0  ;;  %v5688_v48 = vpop.f32.mrf.mxu1 }
 0x14b   : > { %v5690_v60 = vpop.f32.mrf.mxu0  ;;  %v5692_v61 = vpop.f32.mrf.mxu1 }
 0x14e   : > { %3984 = vmatmul.msk.bf16.gmra.mxu0 %vm548_vm1, %v688_v59  ;;  %4000 = vmatmul.msk.bf16.gmra.mxu1 %vm548_vm1, %v688_v59  ;;  %v4872_v59 = vld [vmem:[%s7089_s4 + $0xe4] sm:$0xf0] }
 0x14f   : > { %4064 = vmatmul.msk.bf16.gmra.mxu2 %vm548_vm1, %v628_v62  ;;  %4080 = vmatmul.msk.bf16.gmra.mxu3 %vm548_vm1, %v628_v62  ;;  %v4871_v62 = vld [vmem:[%s7089_s4 + $0xe4] sm:$0xf]  ;;  %v4240_v1 = vor.u32 %v4872_v59, %v4239_v56 }
 0x151   : > { %2174 = vmatpush.bf16.msrb.mxu2 %v4240_v1  ;;  %v4870_v1 = vld [vmem:[%s7089_s4 + $0xd4] sm:$0xf0] }
 0x153   : > { %v5698_v63 = vpop.f32.mrf.mxu0  ;;  %v5700_v0 = vpop.f32.mrf.mxu1 }
 0x15b   : > { %v5702_v4 = vpop.f32.mrf.mxu0  ;;  %v5704_v5 = vpop.f32.mrf.mxu1 }
 0x15e   : > { %4141 = vmatmul.msk.bf16.vlgmr.msrb.gmra.mxu0 %vm548_vm1, %v1306_v3  ;;  %4157 = vmatmul.msk.bf16.vlgmr.msrb.gmra.mxu1 %vm548_vm1, %v1306_v3  ;;  %v4244_v3 = vor.u32 %v4871_v62, %v4241_v2  ;;  %v4231_v62 = vld [vmem:[%s7089_s4 + $0xd0] sm:$0xf]  ;;  %v4869_v2 = vld [vmem:[%s7089_s4 + $0xd4] sm:$0xf] }
 0x15f   : > { %v4236_v11 = vor.u32 %v4869_v2, %v4233_v8 }
 0x160   : > { %2223 = vmatpush.bf16.msrb.mxu3 %v4244_v3  ;;  %v4232_v3 = vor.u32 %v4870_v1, %v4231_v62  ;;  %v1286_v1 = vld [vmem:[#allocation2 + $0x7a] sm:$0xff] }
 0x162   : > { %2175 = vmatpush.bf16.msrb.mxu2 %v4232_v3 }
 0x163   : > { %v5708_v6 = vpop.f32.mrf.mxu0  ;;  %v5710_v7 = vpop.f32.mrf.mxu1 }
 0x164   : > { %2224 = vmatpush.bf16.msrb.mxu3 %v4236_v11 }
 0x16b   : > { %v5724_v27 = vpop.f32.mrf.mxu0  ;;  %v5726_v32 = vpop.f32.mrf.mxu1 }
 0x16e   : > { %4142 = vmatmul.msk.bf16.gmra.mxu0 %vm548_vm1, %v1307_v26  ;;  %4158 = vmatmul.msk.bf16.gmra.mxu1 %vm548_vm1, %v1307_v26  ;;  %v1283_v26 = vld [vmem:[#allocation2 + $0x5a] sm:$0xff] }
 0x16f   : > { %v1310_v39 = vpack.c.bf16 %v1283_v26, %v1282_v25  ;;  %v1285_v25 = vld [vmem:[#allocation2 + $0x6a] sm:$0xff] }
 0x173   : > { %v5730_v35 = vpop.f32.mrf.mxu0  ;;  %v5732_v36 = vpop.f32.mrf.mxu1 }
 0x17b   : > { %v5734_v46 = vpop.f32.mrf.mxu0  ;;  %v5736_v49 = vpop.f32.mrf.mxu1 }
 0x17e   : > { %4143 = vmatmul.msk.bf16.gmra.mxu0 %vm548_vm1, %v1308_v41  ;;  %4159 = vmatmul.msk.bf16.gmra.mxu1 %vm548_vm1, %v1308_v41 }
 0x183   : > { %v5740_v50 = vpop.f32.mrf.mxu0  ;;  %v5742_v55 = vpop.f32.mrf.mxu1 }
 0x18b   : > { %v5756_v19 = vpop.f32.mrf.mxu0  ;;  %v5758_v20 = vpop.f32.mrf.mxu1 }
 0x18e   : > { %4144 = vmatmul.msk.bf16.gmra.mxu0 %vm548_vm1, %v1309_v16  ;;  %4160 = vmatmul.msk.bf16.gmra.mxu1 %vm548_vm1, %v1309_v16  ;;  %v1284_v16 = vld [vmem:[#allocation2 + $0x62] sm:$0xff] }
 0x18f   : > { %v1311_v26 = vpack.c.bf16 %v1285_v25, %v1284_v16  ;;  %v4223_v25 = vld [vmem:[%s7089_s4 + $0xc0] sm:$0xf] }
 0x193   : > { %v5762_v21 = vpop.f32.mrf.mxu0  ;;  %v5764_v24 = vpop.f32.mrf.mxu1 }
 0x194   : > { %7118 = vst [vmem:[#allocation14_spill] sm:$0xff] %v5764_v24 }
 0x19b   : > { %v5766_v40 = vpop.f32.mrf.mxu0  ;;  %v5768_v41 = vpop.f32.mrf.mxu1 }
 0x19c   : > { %7119 = vst [vmem:[#allocation15_spill] sm:$0xff] %v5766_v40  ;;  %v5851_v40 = vld [vmem:[%s7088_s3] ss:$0 sm:$0xff] }
 0x19d   : > { %7120 = vst [vmem:[#allocation16_spill] sm:$0xff] %v5768_v41  ;;  %v1287_v41 = vld [vmem:[#allocation2 + $0x82] sm:$0xff] }
 0x19e   : > { %4145 = vmatmul.msk.bf16.gmra.mxu0 %vm548_vm1, %v1310_v39  ;;  %4161 = vmatmul.msk.bf16.gmra.mxu1 %vm548_vm1, %v1310_v39  ;;  %v1312_v2 = vpack.c.bf16 %v1287_v41, %v1286_v1  ;;  %v4868_v41 = vld [vmem:[%s7089_s4 + $0xc4] sm:$0xf0] }
 0x19f   : > { %v4224_v1 = vor.u32 %v4868_v41, %v4223_v25  ;;  %v1290_v41 = vld [vmem:[#allocation2 + $0xa2] sm:$0xff] }
 0x1a1   : > { %2176 = vmatpush.bf16.msrb.mxu2 %v4224_v1 }
 0x1a3   : > { %v5772_v56 = vpop.f32.mrf.mxu0  ;;  %v5774_v59 = vpop.f32.mrf.mxu1 }
 0x1a4   : > { %7121 = vst [vmem:[#allocation17_spill] sm:$0xff] %v5772_v56 }
 0x1a5   : > { %7122 = vst [vmem:[#allocation18_spill] sm:$0xff] %v5774_v59 }
 0x1ab   : > { %v5788_v39 = vpop.f32.mrf.mxu0  ;;  %v5790_v59 = vpop.f32.mrf.mxu1 }
 0x1ac   : > { %7123 = vst [vmem:[#allocation19_spill] sm:$0xff] %v5788_v39  ;;  %v1291_v39 = vld [vmem:[#allocation2 + $0xaa] sm:$0xff] }
 0x1ad   : > { %7124 = vst [vmem:[#allocation20_spill] sm:$0xff] %v5790_v59 }
 0x1ae   : > { %4146 = vmatmul.msk.bf16.gmra.mxu0 %vm548_vm1, %v1311_v26  ;;  %4162 = vmatmul.msk.bf16.gmra.mxu1 %vm548_vm1, %v1311_v26  ;;  %v4867_v26 = vld [vmem:[%s7089_s4 + $0xc4] sm:$0xf] }
 0x1b3   : > { %v5794_v56 = vpop.f32.mrf.mxu0  ;;  %v5796_v62 = vpop.f32.mrf.mxu1 }
 0x1b4   : > { %7125 = vst [vmem:[#allocation21_spill] sm:$0xff] %v5794_v56 }
 0x1b5   : > { %7126 = vst [vmem:[#allocation22_spill] sm:$0xff] %v5796_v62 }
 0x1bb   : > { %v5798_v3 = vpop.f32.mrf.mxu0  ;;  %v5800_v8 = vpop.f32.mrf.mxu1 }
 0x1bc   : > { %7127 = vst [vmem:[#allocation23_spill] sm:$0xff] %v5798_v3 }
 0x1bd   : > { %7128 = vst [vmem:[#allocation24_spill] sm:$0xff] %v5800_v8  ;;  %v1288_v8 = vld [vmem:[#allocation2 + $0x8a] sm:$0xff] }
 0x1be   : > { %4147 = vmatmul.msk.bf16.gmra.mxu0 %vm548_vm1, %v1312_v2  ;;  %4163 = vmatmul.msk.bf16.gmra.mxu1 %vm548_vm1, %v1312_v2  ;;  %v4225_v2 = vld [vmem:[%s7089_s4 + $0xc8] sm:$0xf0] }
 0x1c3   : > { %v5804_v11 = vpop.f32.mrf.mxu0  ;;  %v5806_v16 = vpop.f32.mrf.mxu1 }
 0x1c4   : > { %7129 = vst [vmem:[#allocation25_spill] sm:$0xff] %v5804_v11  ;;  %v4228_v11 = vor.u32 %v4867_v26, %v4225_v2  ;;  %v4215_v26 = vld [vmem:[%s7089_s4 + $0xb0] sm:$0xf]  ;;  %v4217_v2 = vld [vmem:[%s7089_s4 + $0xb8] sm:$0xf0] }
 0x1c5   : > { %7130 = vst [vmem:[#allocation26_spill] sm:$0xff] %v5806_v16  ;;  %v1289_v16 = vld [vmem:[#allocation2 + $0x92] sm:$0xff] }
 0x1c6   : > { %2225 = vmatpush.bf16.msrb.mxu3 %v4228_v11  ;;  %v1313_v3 = vpack.c.bf16 %v1289_v16, %v1288_v8  ;;  %v4866_v8 = vld [vmem:[%s7089_s4 + $0xb4] sm:$0xf0]  ;;  %v4865_v11 = vld [vmem:[%s7089_s4 + $0xb4] sm:$0xf]  ;;  %v1314_v16 = vpack.c.bf16 %v1291_v39, %v1290_v41  ;;  %v4207_v39 = vld [vmem:[%s7089_s4 + $0xa0] sm:$0xf] }
 0x1c7   : > { %v4216_v1 = vor.u32 %v4866_v8, %v4215_v26  ;;  %v4864_v41 = vld [vmem:[%s7089_s4 + $0xa4] sm:$0xf0] }
 0x1c9   : > { %2177 = vmatpush.bf16.msrb.mxu2 %v4216_v1  ;;  %v1108_v1 = vadd.f32 %v5574_v57, %v5566_v51  ;;  %v4191_v51 = vld [vmem:[%s7089_s4 + $0x80] sm:$0xf]  ;;  %v4859_v57 = vld [vmem:[%s7089_s4 + $0x84] sm:$0xf] }
 0x1cb   : > { %v5820_v62 = vpop.f32.mrf.mxu0  ;;  %v5822_v56 = vpop.f32.mrf.mxu1 }
 0x1cc   : > { %7131 = vst [vmem:[#allocation27_spill] sm:$0xff] %v5820_v62 }
 0x1cd   : > { %7132 = vst [vmem:[#allocation28_spill] sm:$0xff] %v5822_v56  ;;  %v4220_v56 = vor.u32 %v4865_v11, %v4217_v2  ;;  %v1197_v2 = vadd.f32 %v5576_v58, %v5568_v52  ;;  %v4860_v52 = vld [vmem:[%s7089_s4 + $0x84] sm:$0xf0] }
 0x1ce   : > { %4148 = vmatmul.msk.bf16.gmra.mxu0 %vm548_vm1, %v1313_v3  ;;  %4164 = vmatmul.msk.bf16.gmra.mxu1 %vm548_vm1, %v1313_v3  ;;  %v5842_v3 = vld [vmem:[%s7135_s2] ss:$0 sm:$0xff] }
 0x1cf   : > { %2226 = vmatpush.bf16.msrb.mxu3 %v4220_v56  ;;  %v4209_v56 = vld [vmem:[%s7089_s4 + $0xa8] sm:$0xf0] }
 0x1d3   : > { %v5826_v59 = vpop.f32.mrf.mxu0  ;;  %v5828_v25 = vpop.f32.mrf.mxu1 }
 0x1d4   : > { %7133 = vst [vmem:[#allocation29_spill] sm:$0xff] %v5826_v59 }
 0x1d5   : > { %7134 = vst [vmem:[#allocation30_spill] sm:$0xff] %v5828_v25 }
 0x1db   : > { %v1452_v25 = vpop.f32.mrf.mxu0  ;;  %v1541_v59 = vpop.f32.mrf.mxu1 }
 0x1dc   : > { %v1621_v62 = vadd.f32 %v1452_v25, %v5550_v37  ;;  %v1622_v24 = vadd.f32 %v1541_v59, %v5552_v38  ;;  %v4863_v37 = vld [vmem:[%s7089_s4 + $0xa4] sm:$0xf]  ;;  %v4208_v38 = vor.u32 %v4864_v41, %v4207_v39 }
 0x1dd   : > { %v4212_v59 = vor.u32 %v4863_v37, %v4209_v56  ;;  %v4201_v37 = vld [vmem:[%s7089_s4 + $0x98] sm:$0xf0] }
 0x1de   : > { %v1689_v25 = vmul.f32 %v5842_v3, %v1621_v62  ;;  %v1757_v26 = vmul.f32 %v5842_v3, %v1622_v24  ;;  %4149 = vmatmul.msk.bf16.gmra.mxu0 %vm548_vm1, %v1314_v16  ;;  %4165 = vmatmul.msk.bf16.gmra.mxu1 %vm548_vm1, %v1314_v16  ;;  %v4199_v24 = vld [vmem:[%s7089_s4 + $0x90] sm:$0xf]  ;;  %v4862_v62 = vld [vmem:[%s7089_s4 + $0x94] sm:$0xf0]  ;;  %v4861_v16 = vld [vmem:[%s7089_s4 + $0x94] sm:$0xf] }
 0x1df   : > { %2178 = vmatpush.bf16.msrb.mxu2 %v4208_v38  ;;  %2227 = vmatpush.bf16.msrb.mxu3 %v4212_v59  ;;  %v4200_v41 = vor.u32 %v4862_v62, %v4199_v24  ;;  %v4204_v38 = vor.u32 %v4861_v16, %v4201_v37  ;;  %v4193_v24 = vld [vmem:[%s7089_s4 + $0x88] sm:$0xf0]  ;;  %v1292_v62 = vld [vmem:[#allocation2 + $0xb2] sm:$0xff]  ;;  %v1293_v16 = vld [vmem:[#allocation2 + $0xba] sm:$0xff] }
 0x1e0   : > { %v1725_v8 = vadd.f32 %v5851_v40, %v1689_v25  ;;  %v1789_v11 = vadd.f32 %v5851_v40, %v1757_v26 }
 0x1e2   : > { %v1821_v39 = vmax.f32 %v1725_v8, %v1789_v11  ;;  %v4192_v11 = vor.u32 %v4860_v52, %v4191_v51 }
 0x1e3   : > { %v1454_v25 = vpop.f32.mrf.mxu0  ;;  %v1543_v26 = vpop.f32.mrf.mxu1  ;;  %2179 = vmatpush.bf16.msrb.mxu2 %v4200_v41  ;;  %2228 = vmatpush.bf16.msrb.mxu3 %v4204_v38 }
 0x1e4   : > { %1853 = vst [vmem:[#allocation5] sm:$0xff] %v1821_v39  ;;  %v1623_v56 = vadd.f32 %v1454_v25, %v1108_v1  ;;  %v1624_v59 = vadd.f32 %v1543_v26, %v1197_v2  ;;  %v4196_v1 = vor.u32 %v4859_v57, %v4193_v24  ;;  %v5902_v2 = vpop.f32.mrf.mxu2  ;;  %v5904_v39 = vpop.f32.mrf.mxu3  ;;  %v1315_v26 = vpack.c.bf16 %v1293_v16, %v1292_v62 }
 0x1e6   : > { %v1690_v58 = vmul.f32 %v5842_v3, %v1623_v56  ;;  %v1758_v8 = vmul.f32 %v5842_v3, %v1624_v59 }
 0x1e7   : > { %2180 = vmatpush.bf16.msrb.mxu2 %v4192_v11  ;;  %2229 = vmatpush.bf16.msrb.mxu3 %v4196_v1 }
 0x1e8   : > { %v1726_v41 = vadd.f32 %v5851_v40, %v1690_v58  ;;  %v1790_v37 = vadd.f32 %v5851_v40, %v1758_v8 }
 0x1ea   : > { %v1822_v25 = vmax.f32 %v1726_v41, %v1790_v37  ;;  %v4391_v41 = vld [vmem:[%s7089_s4 + $0x170] sm:$0xf] }
 0x1eb   : > { %v1457_v38 = vpop.f32.mrf.mxu0  ;;  %v1546_v56 = vpop.f32.mrf.mxu1 }
 0x1ec   : > { %1854 = vst [vmem:[#allocation5 + $0x8] sm:$0xff] %v1822_v25  ;;  %v1625_v59 = vadd.f32 %v1457_v38, %v5594_v9  ;;  %v1626_v51 = vadd.f32 %v1546_v56, %v5596_v10  ;;  %v5916_v11 = vpop.f32.mrf.mxu2  ;;  %v5918_v24 = vpop.f32.mrf.mxu3  ;;  %v4889_v38 = vld [vmem:[%s7089_s4 + $0x174] sm:$0xf] }
 0x1ee   : > { %v1691_v52 = vmul.f32 %v5842_v3, %v1625_v59  ;;  %v1759_v57 = vmul.f32 %v5842_v3, %v1626_v51  ;;  %4150 = vmatmul.msk.bf16.gmra.mxu0 %vm548_vm1, %v1315_v26  ;;  %4166 = vmatmul.msk.bf16.gmra.mxu1 %vm548_vm1, %v1315_v26  ;;  %v4890_v26 = vld [vmem:[%s7089_s4 + $0x174] sm:$0xf0]  ;;  %v4393_v51 = vld [vmem:[%s7089_s4 + $0x178] sm:$0xf0] }
 0x1ef   : > { %v4392_v59 = vor.u32 %v4890_v26, %v4391_v41 }
 0x1f0   : > { %v1727_v58 = vadd.f32 %v5851_v40, %v1691_v52  ;;  %v1791_v8 = vadd.f32 %v5851_v40, %v1759_v57  ;;  %v4396_v57 = vor.u32 %v4889_v38, %v4393_v51 }
 0x1f1   : > { %2570 = vmatpush.bf16.msra.mxu0 %v4392_v59 }
 0x1f2   : > { %v1823_v62 = vmax.f32 %v1727_v58, %v1791_v8  ;;  %v1294_v58 = vld [vmem:[#allocation2 + $0xca] sm:$0xff]  ;;  %v1295_v8 = vld [vmem:[#allocation2 + $0xd2] sm:$0xff]  ;;  %2619 = vmatpush.bf16.msra.mxu1 %v4396_v57 }
 0x1f3   : > { %v1885_v9 = vld [vmem:[#allocation5] ss:$2 sm:$0xff]  ;;  %v1917_v16 = vld [vmem:[#allocation5 + $0x1] ss:$2 sm:$0xff]  ;;  %v1459_v10 = vpop.f32.mrf.mxu0  ;;  %v1548_v1 = vpop.f32.mrf.mxu1 }
 0x1f4   : > { %1855 = vst [vmem:[#allocation5 + $0x10] sm:$0xff] %v1823_v62  ;;  %v1627_v37 = vadd.f32 %v1459_v10, %v5602_v22  ;;  %v1628_v25 = vadd.f32 %v1548_v1, %v5604_v23  ;;  %v1948_v56 = vmax.f32 %v1885_v9, %v1917_v16  ;;  %v1316_v16 = vpack.c.bf16 %v1295_v8, %v1294_v58  ;;  %v5938_v26 = vpop.f32.mrf.mxu2 }
 0x1f6   : > { %v1692_v52 = vmul.f32 %v5842_v3, %v1627_v37  ;;  %v1760_v22 = vmul.f32 %v5842_v3, %v1628_v25  ;;  %v1964_v23 = vmax.f32 %v1948_v56, 0.0  ;;  %v5940_v37 = vpop.f32.mrf.mxu3 }
 0x1f8   : > { %v1728_v62 = vadd.f32 %v5851_v40, %v1692_v52  ;;  %v1792_v10 = vadd.f32 %v5851_v40, %v1760_v22  ;;  %1996 = vst [vmem:[#allocation3 + $0x1] sm:$0xff] %v1964_v23 }
 0x1fa   : > { %v1824_v9 = vmax.f32 %v1728_v62, %v1792_v10 }
 0x1fb   : > { %v1462_v1 = vpop.f32.mrf.mxu0  ;;  %v1551_v41 = vpop.f32.mrf.mxu1 }
 0x1fc   : > { %1856 = vst [vmem:[#allocation5 + $0x18] sm:$0xff] %v1824_v9  ;;  %v1629_v25 = vadd.f32 %v1462_v1, %v5610_v29  ;;  %v1630_v38 = vadd.f32 %v1551_v41, %v5612_v30  ;;  %v5952_v9 = vpop.f32.mrf.mxu2 }
 0x1fe   : > { %v1693_v56 = vmul.f32 %v5842_v3, %v1629_v25  ;;  %v1761_v59 = vmul.f32 %v5842_v3, %v1630_v38  ;;  %4151 = vmatmul.msk.bf16.gmra.mxu0 %vm548_vm1, %v1316_v16  ;;  %4167 = vmatmul.msk.bf16.gmra.mxu1 %vm548_vm1, %v1316_v16  ;;  %v5954_v1 = vpop.f32.mrf.mxu3  ;;  %v1296_v38 = vld [vmem:[#allocation2 + $0xda] sm:$0xff] }
 0x200   : > { %v1729_v51 = vadd.f32 %v5851_v40, %v1693_v56  ;;  %v1793_v52 = vadd.f32 %v5851_v40, %v1761_v59  ;;  %v1297_v56 = vld [vmem:[#allocation2 + $0xe2] sm:$0xff] }
 0x202   : > { %v1825_v22 = vmax.f32 %v1729_v51, %v1793_v52 }
 0x203   : > { %v1887_v57 = vld [vmem:[#allocation5 + $0x10] ss:$2 sm:$0xff]  ;;  %v1919_v58 = vld [vmem:[#allocation5 + $0x11] ss:$2 sm:$0xff]  ;;  %v1464_v8 = vpop.f32.mrf.mxu0  ;;  %v1553_v62 = vpop.f32.mrf.mxu1 }
 0x204   : > { %1857 = vst [vmem:[#allocation5 + $0x20] sm:$0xff] %v1825_v22  ;;  %v1631_v29 = vadd.f32 %v1464_v8, %v5618_v44  ;;  %v1632_v30 = vadd.f32 %v1553_v62, %v5620_v45  ;;  %v1949_v10 = vmax.f32 %v1887_v57, %v1919_v58  ;;  %v1317_v45 = vpack.c.bf16 %v1297_v56, %v1296_v38  ;;  %v4383_v62 = vld [vmem:[%s7089_s4 + $0x160] sm:$0xf] }
 0x206   : > { %v1694_v16 = vmul.f32 %v5842_v3, %v1631_v29  ;;  %v1762_v41 = vmul.f32 %v5842_v3, %v1632_v30  ;;  %v1965_v25 = vmax.f32 %v1949_v10, 0.0  ;;  %v4888_v29 = vld [vmem:[%s7089_s4 + $0x164] sm:$0xf0]  ;;  %v4887_v30 = vld [vmem:[%s7089_s4 + $0x164] sm:$0xf] }
 0x207   : > { %v4385_v10 = vld [vmem:[%s7089_s4 + $0x168] sm:$0xf0] }
 0x208   : > { %v1730_v59 = vadd.f32 %v5851_v40, %v1694_v16  ;;  %v1794_v51 = vadd.f32 %v5851_v40, %v1762_v41  ;;  %1997 = vst [vmem:[#allocation3 + $0x9] sm:$0xff] %v1965_v25  ;;  %v2068_v44 = vpack.c.bf16 %v1965_v25, %v1964_v23  ;;  %v4384_v23 = vor.u32 %v4888_v29, %v4383_v62  ;;  %v5978_v41 = vpop.f32.mrf.mxu2  ;;  %v5980_v25 = vpop.f32.mrf.mxu3 }
 0x209   : > { %v4388_v16 = vor.u32 %v4887_v30, %v4385_v10  ;;  %v1299_v30 = vld [vmem:[#allocation2 + $0xfa] sm:$0xff] }
 0x20a   : > { %v1826_v52 = vmax.f32 %v1730_v59, %v1794_v51  ;;  %2181 = vmatmul.bf16.vlgmr.msrb.gmra.mxu2 %v2068_v44  ;;  %2230 = vmatmul.bf16.vlgmr.msrb.gmra.mxu3 %v2068_v44 }
 0x20b   : > { %v1467_v22 = vpop.f32.mrf.mxu0  ;;  %v1556_v57 = vpop.f32.mrf.mxu1  ;;  %2571 = vmatpush.bf16.msra.mxu0 %v4384_v23  ;;  %2620 = vmatpush.bf16.msra.mxu1 %v4388_v16  ;;  %v1298_v23 = vld [vmem:[#allocation2 + $0xf2] sm:$0xff] }
 0x20c   : > { %1858 = vst [vmem:[#allocation5 + $0x28] sm:$0xff] %v1826_v52  ;;  %v1633_v58 = vadd.f32 %v1467_v22, %v5626_v53  ;;  %v1634_v8 = vadd.f32 %v1556_v57, %v5628_v54 }
 0x20e   : > { %v1695_v53 = vmul.f32 %v5842_v3, %v1633_v58  ;;  %v1763_v54 = vmul.f32 %v5842_v3, %v1634_v8  ;;  %4152 = vmatmul.msk.bf16.gmra.mxu0 %vm548_vm1, %v1317_v45  ;;  %4168 = vmatmul.msk.bf16.gmra.mxu1 %vm548_vm1, %v1317_v45 }
 0x210   : > { %v1731_v38 = vadd.f32 %v5851_v40, %v1695_v53  ;;  %v1795_v56 = vadd.f32 %v5851_v40, %v1763_v54  ;;  %v1126_v54 = vadd.f32 %v5902_v2, %v5650_v14  ;;  %v5996_v16 = vpop.f32.mrf.mxu3  ;;  %v1128_v2 = vadd.f32 %v5916_v11, %v5658_v17  ;;  %v4375_v17 = vld [vmem:[%s7089_s4 + $0x150] sm:$0xf]  ;;  %v4885_v11 = vld [vmem:[%s7089_s4 + $0x154] sm:$0xf] }
 0x212   : > { %v1827_v59 = vmax.f32 %v1731_v38, %v1795_v56  ;;  %v1318_v56 = vpack.c.bf16 %v1299_v30, %v1298_v23 }
 0x213   : > { %v1889_v51 = vld [vmem:[#allocation5 + $0x20] ss:$2 sm:$0xff]  ;;  %v1921_v44 = vld [vmem:[#allocation5 + $0x21] ss:$2 sm:$0xff]  ;;  %v1469_v52 = vpop.f32.mrf.mxu0  ;;  %v1558_v22 = vpop.f32.mrf.mxu1 }
 0x214   : > { %1859 = vst [vmem:[#allocation5 + $0x30] sm:$0xff] %v1827_v59  ;;  %v1635_v57 = vadd.f32 %v1469_v52, %v5646_v12  ;;  %v1636_v45 = vadd.f32 %v1558_v22, %v5648_v13  ;;  %v1950_v58 = vmax.f32 %v1889_v51, %v1921_v44  ;;  %v1215_v12 = vadd.f32 %v5904_v39, %v5652_v15  ;;  %v5994_v13 = vpop.f32.mrf.mxu2 }
 0x215   : > { %v1217_v39 = vadd.f32 %v5918_v24, %v5660_v18  ;;  %v4886_v18 = vld [vmem:[%s7089_s4 + $0x154] sm:$0xf0] }
 0x216   : > { %v1696_v8 = vmul.f32 %v5842_v3, %v1635_v57  ;;  %v1764_v62 = vmul.f32 %v5842_v3, %v1636_v45  ;;  %v1966_v29 = vmax.f32 %v1950_v58, 0.0 }
 0x218   : > { %v1732_v10 = vadd.f32 %v5851_v40, %v1696_v8  ;;  %v1796_v53 = vadd.f32 %v5851_v40, %v1764_v62  ;;  %1998 = vst [vmem:[#allocation3 + $0x19] sm:$0xff] %v1966_v29 }
 0x21a   : > { %v1828_v38 = vmax.f32 %v1732_v10, %v1796_v53  ;;  %v6010_v10 = vpop.f32.mrf.mxu3 }
 0x21b   : > { %v1472_v59 = vpop.f32.mrf.mxu0  ;;  %v1561_v51 = vpop.f32.mrf.mxu1 }
 0x21c   : > { %1860 = vst [vmem:[#allocation5 + $0x38] sm:$0xff] %v1828_v38  ;;  %v1637_v44 = vadd.f32 %v1472_v59, %v1126_v54  ;;  %v1638_v52 = vadd.f32 %v1561_v51, %v1215_v12  ;;  %v6008_v30 = vpop.f32.mrf.mxu2  ;;  %v4376_v59 = vor.u32 %v4886_v18, %v4375_v17  ;;  %v4377_v51 = vld [vmem:[%s7089_s4 + $0x158] sm:$0xf0]  ;;  %v4882_v17 = vld [vmem:[%s7089_s4 + $0x134] sm:$0xf0] }
 0x21d   : > { %v4881_v18 = vld [vmem:[%s7089_s4 + $0x134] sm:$0xf] }
 0x21e   : > { %v1697_v22 = vmul.f32 %v5842_v3, %v1637_v44  ;;  %v1765_v57 = vmul.f32 %v5842_v3, %v1638_v52  ;;  %4153 = vmatmul.msk.bf16.gmra.mxu0 %vm548_vm1, %v1318_v56  ;;  %4169 = vmatmul.msk.bf16.gmra.mxu1 %vm548_vm1, %v1318_v56  ;;  %v1300_v44 = vld [vmem:[#allocation2 + $0x102] sm:$0xff]  ;;  %v1301_v52 = vld [vmem:[#allocation2 + $0x10a] sm:$0xff] }
 0x21f   : > { %2572 = vmatpush.bf16.msra.mxu0 %v4376_v59 }
 0x220   : > { %v1733_v14 = vadd.f32 %v5851_v40, %v1697_v22  ;;  %v1797_v15 = vadd.f32 %v5851_v40, %v1765_v57  ;;  %v4380_v22 = vor.u32 %v4885_v11, %v4377_v51  ;;  %v4361_v51 = vld [vmem:[%s7089_s4 + $0x138] sm:$0xf0] }
 0x222   : > { %v1829_v45 = vmax.f32 %v1733_v14, %v1797_v15  ;;  %2621 = vmatpush.bf16.msra.mxu1 %v4380_v22 }
 0x223   : > { %v1891_v58 = vld [vmem:[#allocation5 + $0x30] ss:$2 sm:$0xff]  ;;  %v1923_v8 = vld [vmem:[#allocation5 + $0x31] ss:$2 sm:$0xff]  ;;  %v1474_v62 = vpop.f32.mrf.mxu0  ;;  %v1563_v23 = vpop.f32.mrf.mxu1 }
 0x224   : > { %1861 = vst [vmem:[#allocation5 + $0x40] sm:$0xff] %v1829_v45  ;;  %v1639_v53 = vadd.f32 %v1474_v62, %v1128_v2  ;;  %v1640_v54 = vadd.f32 %v1563_v23, %v1217_v39  ;;  %v1951_v12 = vmax.f32 %v1891_v58, %v1923_v8  ;;  %v1131_v2 = vadd.f32 %v5938_v26, %v5666_v28  ;;  %v4367_v45 = vld [vmem:[%s7089_s4 + $0x140] sm:$0xf]  ;;  %v4884_v58 = vld [vmem:[%s7089_s4 + $0x144] sm:$0xf0]  ;;  %v6053_v11 = vpop.f32.mrf.mxu2 }
 0x225   : > { %v1220_v39 = vadd.f32 %v5940_v37, %v5668_v31  ;;  %v1319_v62 = vpack.c.bf16 %v1301_v52, %v1300_v44  ;;  %v4368_v28 = vor.u32 %v4884_v58, %v4367_v45  ;;  %v4369_v31 = vld [vmem:[%s7089_s4 + $0x148] sm:$0xf0]  ;;  %v4364_v44 = vor.u32 %v4881_v18, %v4361_v51  ;;  %v4345_v18 = vld [vmem:[%s7089_s4 + $0x118] sm:$0xf0] }
 0x226   : > { %v1698_v24 = vmul.f32 %v5842_v3, %v1639_v53  ;;  %v1766_v38 = vmul.f32 %v5842_v3, %v1640_v54  ;;  %v1967_v56 = vmax.f32 %v1951_v12, 0.0  ;;  %v4359_v12 = vld [vmem:[%s7089_s4 + $0x130] sm:$0xf] }
 0x227   : > { %2573 = vmatpush.bf16.msra.mxu0 %v4368_v28  ;;  %v4360_v59 = vor.u32 %v4882_v17, %v4359_v12 }
 0x228   : > { %v1734_v57 = vadd.f32 %v5851_v40, %v1698_v24  ;;  %v1798_v14 = vadd.f32 %v5851_v40, %v1766_v38  ;;  %1999 = vst [vmem:[#allocation3 + $0x21] sm:$0xff] %v1967_v56  ;;  %v2069_v15 = vpack.c.bf16 %v1967_v56, %v1966_v29  ;;  %v4883_v29 = vld [vmem:[%s7089_s4 + $0x144] sm:$0xf]  ;;  %v6055_v24 = vpop.f32.mrf.mxu3 }
 0x229   : > { %v4372_v23 = vor.u32 %v4883_v29, %v4369_v31  ;;  %v4353_v29 = vld [vmem:[%s7089_s4 + $0x128] sm:$0xf0] }
 0x22a   : > { %v1830_v8 = vmax.f32 %v1734_v57, %v1798_v14  ;;  %2186 = vmatmul.bf16.gmra.mxu2 %v2069_v15  ;;  %2235 = vmatmul.bf16.gmra.mxu3 %v2069_v15  ;;  %v4351_v57 = vld [vmem:[%s7089_s4 + $0x120] sm:$0xf]  ;;  %v4880_v14 = vld [vmem:[%s7089_s4 + $0x124] sm:$0xf0]  ;;  %v4879_v15 = vld [vmem:[%s7089_s4 + $0x124] sm:$0xf] }
 0x22b   : > { %v1477_v26 = vpop.f32.mrf.mxu0  ;;  %v1566_v37 = vpop.f32.mrf.mxu1  ;;  %2622 = vmatpush.bf16.msra.mxu1 %v4372_v23  ;;  %2574 = vmatpush.bf16.msra.mxu0 %v4360_v59  ;;  %v4352_v58 = vor.u32 %v4880_v14, %v4351_v57  ;;  %v1136_v57 = vadd.f32 %v5978_v41, %v5678_v42  ;;  %v4335_v14 = vld [vmem:[%s7089_s4 + $0x100] sm:$0xf]  ;;  %v4337_v42 = vld [vmem:[%s7089_s4 + $0x108] sm:$0xf0] }
 0x22c   : > { %1862 = vst [vmem:[#allocation5 + $0x48] sm:$0xff] %v1830_v8  ;;  %v1641_v53 = vadd.f32 %v1477_v26, %v1131_v2  ;;  %v1642_v54 = vadd.f32 %v1566_v37, %v1220_v39  ;;  %v1133_v2 = vadd.f32 %v5952_v9, %v5674_v33  ;;  %v1222_v39 = vadd.f32 %v5954_v1, %v5676_v34  ;;  %v4343_v33 = vld [vmem:[%s7089_s4 + $0x110] sm:$0xf]  ;;  %v4878_v34 = vld [vmem:[%s7089_s4 + $0x114] sm:$0xf0]  ;;  %v6096_v51 = vpop.f32.mrf.mxu2 }
 0x22d   : > { %v4356_v26 = vor.u32 %v4879_v15, %v4353_v29  ;;  %v4877_v9 = vld [vmem:[%s7089_s4 + $0x114] sm:$0xf]  ;;  %v4344_v17 = vor.u32 %v4878_v34, %v4343_v33  ;;  %v4876_v15 = vld [vmem:[%s7089_s4 + $0x104] sm:$0xf0] }
 0x22e   : > { %v1699_v38 = vmul.f32 %v5842_v3, %v1641_v53  ;;  %v1767_v56 = vmul.f32 %v5842_v3, %v1642_v54  ;;  %4154 = vmatmul.msk.bf16.gmra.mxu0 %vm548_vm1, %v1319_v62  ;;  %4170 = vmatmul.msk.bf16.gmra.mxu1 %vm548_vm1, %v1319_v62  ;;  %v4348_v59 = vor.u32 %v4877_v9, %v4345_v18 }
 0x22f   : > { %2623 = vmatpush.bf16.msra.mxu1 %v4364_v44  ;;  %2575 = vmatpush.bf16.msra.mxu0 %v4352_v58  ;;  %v4336_v29 = vor.u32 %v4876_v15, %v4335_v14  ;;  %v1141_v15 = vadd.f32 %v6008_v30, %v5690_v60 }
 0x230   : > { %v1735_v52 = vadd.f32 %v5851_v40, %v1699_v38  ;;  %v1799_v22 = vadd.f32 %v5851_v40, %v1767_v56  ;;  %v1302_v38 = vld [vmem:[#allocation2 + $0x11a] sm:$0xff]  ;;  %v1303_v56 = vld [vmem:[#allocation2 + $0x122] sm:$0xff]  ;;  %v6098_v44 = vpop.f32.mrf.mxu3 }
 0x231   : > { %v1320_v58 = vpack.c.bf16 %v1303_v56, %v1302_v38 }
 0x232   : > { %v1831_v45 = vmax.f32 %v1735_v52, %v1799_v22 }
 0x233   : > { %v1479_v8 = vpop.f32.mrf.mxu0  ;;  %v1568_v62 = vpop.f32.mrf.mxu1  ;;  %v1893_v28 = vld [vmem:[#allocation5 + $0x40] ss:$2 sm:$0xff]  ;;  %v1925_v31 = vld [vmem:[#allocation5 + $0x41] ss:$2 sm:$0xff]  ;;  %2624 = vmatpush.bf16.msra.mxu1 %v4356_v26  ;;  %2576 = vmatpush.bf16.msra.mxu0 %v4344_v17 }
 0x234   : > { %1863 = vst [vmem:[#allocation5 + $0x50] sm:$0xff] %v1831_v45  ;;  %v1643_v37 = vadd.f32 %v1479_v8, %v1133_v2  ;;  %v1644_v23 = vadd.f32 %v1568_v62, %v1222_v39  ;;  %v1952_v53 = vmax.f32 %v1893_v28, %v1925_v31  ;;  %v4875_v2 = vld [vmem:[%s7089_s4 + $0x104] sm:$0xf]  ;;  %v1225_v39 = vadd.f32 %v5980_v25, %v5680_v43  ;;  %v6128_v33 = vpop.f32.mrf.mxu2 }
 0x235   : > { %v4340_v62 = vor.u32 %v4875_v2, %v4337_v42  ;;  %v1230_v2 = vadd.f32 %v6010_v10, %v5692_v61  ;;  %v1143_v10 = vadd.f32 %v6053_v11, %v5698_v63 }
 0x236   : > { %v1700_v1 = vmul.f32 %v5842_v3, %v1643_v37  ;;  %v1768_v54 = vmul.f32 %v5842_v3, %v1644_v23  ;;  %v1968_v12 = vmax.f32 %v1952_v53, 0.0  ;;  %v1138_v23 = vadd.f32 %v5994_v13, %v5686_v47 }
 0x237   : > { %2625 = vmatpush.bf16.msra.mxu1 %v4348_v59  ;;  %2577 = vmatpush.bf16.msra.mxu0 %v4336_v29  ;;  %v1227_v53 = vadd.f32 %v5996_v16, %v5688_v48  ;;  %v1305_v48 = vld [vmem:[#allocation2 + $0x132] sm:$0xff] }
 0x238   : > { %v1736_v52 = vadd.f32 %v5851_v40, %v1700_v1  ;;  %v1800_v22 = vadd.f32 %v5851_v40, %v1768_v54  ;;  %2000 = vst [vmem:[#allocation3 + $0x31] sm:$0xff] %v1968_v12  ;;  %v6130_v34 = vpop.f32.mrf.mxu3 }
 0x23a   : > { %v1832_v45 = vmax.f32 %v1736_v52, %v1800_v22  ;;  %v1304_v22 = vld [vmem:[#allocation2 + $0x12a] sm:$0xff] }
 0x23b   : > { %v1482_v41 = vpop.f32.mrf.mxu0  ;;  %v1571_v8 = vpop.f32.mrf.mxu1  ;;  %2626 = vmatpush.bf16.msra.mxu1 %v4340_v62 }
 0x23c   : > { %1864 = vst [vmem:[#allocation5 + $0x58] sm:$0xff] %v1832_v45  ;;  %v1645_v28 = vadd.f32 %v1482_v41, %v1136_v57  ;;  %v1646_v31 = vadd.f32 %v1571_v8, %v1225_v39  ;;  %v1321_v45 = vpack.c.bf16 %v1305_v48, %v1304_v22  ;;  %v6140_v42 = vpop.f32.mrf.mxu2 }
 0x23e   : > { %v1701_v26 = vmul.f32 %v5842_v3, %v1645_v28  ;;  %v1769_v37 = vmul.f32 %v5842_v3, %v1646_v31  ;;  %4155 = vmatmul.msk.bf16.gmra.mxu0 %vm548_vm1, %v1320_v58  ;;  %4171 = vmatmul.msk.bf16.gmra.mxu1 %vm548_vm1, %v1320_v58  ;;  %v1232_v28 = vadd.f32 %v6055_v24, %v5700_v0 }
 0x240   : > { %v1737_v43 = vadd.f32 %v5851_v40, %v1701_v26  ;;  %v1801_v25 = vadd.f32 %v5851_v40, %v1769_v37  ;;  %v6142_v41 = vpop.f32.mrf.mxu3 }
 0x242   : > { %v1833_v9 = vmax.f32 %v1737_v43, %v1801_v25 }
 0x243   : > { %v1484_v1 = vpop.f32.mrf.mxu0  ;;  %v1573_v54 = vpop.f32.mrf.mxu1  ;;  %v1895_v17 = vld [vmem:[#allocation5 + $0x50] ss:$2 sm:$0xff]  ;;  %v1927_v18 = vld [vmem:[#allocation5 + $0x51] ss:$2 sm:$0xff] }
 0x244   : > { %1865 = vst [vmem:[#allocation5 + $0x60] sm:$0xff] %v1833_v9  ;;  %v1647_v38 = vadd.f32 %v1484_v1, %v1138_v23  ;;  %v1648_v56 = vadd.f32 %v1573_v54, %v1227_v53  ;;  %v1953_v59 = vmax.f32 %v1895_v17, %v1927_v18  ;;  %v6154_v1 = vpop.f32.mrf.mxu2  ;;  %v2449_v18 = vld [vmem:[#allocation3 + $0x2] sm:$0xff] }
 0x246   : > { %v1702_v52 = vmul.f32 %v5842_v3, %v1647_v38  ;;  %v1770_v47 = vmul.f32 %v5842_v3, %v1648_v56  ;;  %v1969_v13 = vmax.f32 %v1953_v59, 0.0  ;;  %v2450_v38 = vld [vmem:[#allocation3 + $0xa] sm:$0xff]  ;;  %v1146_v56 = vadd.f32 %v6096_v51, %v5702_v4 }
 0x247   : > { %v1235_v59 = vadd.f32 %v6098_v44, %v5704_v5  ;;  %v1148_v51 = vadd.f32 %v6128_v33, %v5708_v6  ;;  %v1237_v44 = vadd.f32 %v6130_v34, %v5710_v7  ;;  %v4858_v6 = vld [vmem:[%s7089_s4 + $0x74] sm:$0xf0]  ;;  %v4857_v7 = vld [vmem:[%s7089_s4 + $0x74] sm:$0xf]  ;;  %v4313_v34 = vld [vmem:[%s7089_s4 + $0x78] sm:$0xf0] }
 0x248   : > { %v1738_v16 = vadd.f32 %v5851_v40, %v1702_v52  ;;  %v1802_v57 = vadd.f32 %v5851_v40, %v1770_v47  ;;  %2001 = vst [vmem:[#allocation3 + $0x39] sm:$0xff] %v1969_v13  ;;  %v2070_v14 = vpack.c.bf16 %v1969_v13, %v1968_v12  ;;  %v6156_v54 = vpop.f32.mrf.mxu3 }
 0x24a   : > { %v1834_v39 = vmax.f32 %v1738_v16, %v1802_v57  ;;  %2191 = vmatmul.bf16.gmra.mxu2 %v2070_v14  ;;  %2240 = vmatmul.bf16.gmra.mxu3 %v2070_v14  ;;  %v2465_v16 = vpack.c.bf16 %v2450_v38, %v2449_v18 }
 0x24b   : > { %v1487_v58 = vpop.f32.mrf.mxu0  ;;  %v1576_v29 = vpop.f32.mrf.mxu1 }
 0x24c   : > { %1866 = vst [vmem:[#allocation5 + $0x68] sm:$0xff] %v1834_v39  ;;  %v1649_v8 = vadd.f32 %v1487_v58, %v1141_v15  ;;  %v1650_v62 = vadd.f32 %v1576_v29, %v1230_v2  ;;  %v6168_v15 = vpop.f32.mrf.mxu2 }
 0x24e   : > { %v1703_v12 = vmul.f32 %v5842_v3, %v1649_v8  ;;  %v1771_v60 = vmul.f32 %v5842_v3, %v1650_v62  ;;  %4156 = vmatmul.msk.bf16.gmra.mxu0 %vm548_vm1, %v1321_v45  ;;  %4172 = vmatmul.msk.bf16.gmra.mxu1 %vm548_vm1, %v1321_v45 }
 0x250   : > { %v1739_v61 = vadd.f32 %v5851_v40, %v1703_v12  ;;  %v1803_v30 = vadd.f32 %v5851_v40, %v1771_v60  ;;  %v6170_v2 = vpop.f32.mrf.mxu3 }
 0x252   : > { %v1835_v31 = vmax.f32 %v1739_v61, %v1803_v30  ;;  %v4311_v61 = vld [vmem:[%s7089_s4 + $0x70] sm:$0xf] }
 0x253   : > { %v1489_v26 = vpop.f32.mrf.mxu0  ;;  %v1578_v37 = vpop.f32.mrf.mxu1  ;;  %v1897_v43 = vld [vmem:[#allocation5 + $0x60] ss:$2 sm:$0xff]  ;;  %v1929_v25 = vld [vmem:[#allocation5 + $0x61] ss:$2 sm:$0xff]  ;;  %v4312_v33 = vor.u32 %v4858_v6, %v4311_v61  ;;  %v1156_v61 = vadd.f32 %v6168_v15, %v5734_v46  ;;  %v1245_v6 = vadd.f32 %v6170_v2, %v5736_v49 }
 0x254   : > { %1867 = vst [vmem:[#allocation5 + $0x70] sm:$0xff] %v1835_v31  ;;  %v1651_v23 = vadd.f32 %v1489_v26, %v1143_v10  ;;  %v1652_v53 = vadd.f32 %v1578_v37, %v1232_v28  ;;  %v1954_v9 = vmax.f32 %v1897_v43, %v1929_v25  ;;  %v4316_v31 = vor.u32 %v4857_v7, %v4313_v34  ;;  %v2451_v25 = vld [vmem:[#allocation3 + $0x1a] sm:$0xff] }
 0x255   : > { %2351 = vmatpush.bf16.msra.mxu2 %v4312_v33 }
 0x256   : > { %v1704_v17 = vmul.f32 %v5842_v3, %v1651_v23  ;;  %v1772_v63 = vmul.f32 %v5842_v3, %v1652_v53  ;;  %v1970_v11 = vmax.f32 %v1954_v9, 0.0  ;;  %2400 = vmatpush.bf16.msra.mxu3 %v4316_v31  ;;  %v2452_v23 = vld [vmem:[#allocation3 + $0x22] sm:$0xff]  ;;  %v1151_v53 = vadd.f32 %v6140_v42, %v5724_v27 }
 0x257   : > { %v1240_v9 = vadd.f32 %v6142_v41, %v5726_v32  ;;  %v1153_v41 = vadd.f32 %v6154_v1, %v5730_v35  ;;  %v4303_v35 = vld [vmem:[%s7089_s4 + $0x60] sm:$0xf] }
 0x258   : > { %v1740_v0 = vadd.f32 %v5851_v40, %v1704_v17  ;;  %v1804_v24 = vadd.f32 %v5851_v40, %v1772_v63  ;;  %2002 = vst [vmem:[#allocation3 + $0x49] sm:$0xff] %v1970_v11  ;;  %v6198_v17 = vpop.f32.mrf.mxu2  ;;  %v6200_v63 = vpop.f32.mrf.mxu3 }
 0x259   : > { %v1158_v49 = vadd.f32 %v6198_v17, %v5740_v50  ;;  %v1247_v2 = vadd.f32 %v6200_v63, %v5742_v55  ;;  %v4854_v50 = vld [vmem:[%s7089_s4 + $0x54] sm:$0xf0]  ;;  %v4853_v55 = vld [vmem:[%s7089_s4 + $0x54] sm:$0xf]  ;;  %v4297_v63 = vld [vmem:[%s7089_s4 + $0x58] sm:$0xf0] }
 0x25a   : > { %v1836_v52 = vmax.f32 %v1740_v0, %v1804_v24 }
 0x25b   : > { %v1492_v47 = vpop.f32.mrf.mxu0  ;;  %v1581_v13 = vpop.f32.mrf.mxu1 }
 0x25c   : > { %1868 = vst [vmem:[#allocation5 + $0x78] sm:$0xff] %v1836_v52  ;;  %v1653_v22 = vadd.f32 %v1492_v47, %v1146_v56  ;;  %v1654_v48 = vadd.f32 %v1581_v13, %v1235_v59  ;;  %v2466_v56 = vpack.c.bf16 %v2452_v23, %v2451_v25  ;;  %v1242_v52 = vadd.f32 %v6156_v54, %v5732_v36  ;;  %v4856_v36 = vld [vmem:[%s7089_s4 + $0x64] sm:$0xf0]  ;;  %v4855_v54 = vld [vmem:[%s7089_s4 + $0x64] sm:$0xf] }
 0x25d   : > { %v4304_v1 = vor.u32 %v4856_v36, %v4303_v35 }
 0x25e   : > { %v1705_v57 = vmul.f32 %v5842_v3, %v1653_v22  ;;  %v1773_v14 = vmul.f32 %v5842_v3, %v1654_v48  ;;  %2578 = vmatmul.bf16.vlgmr.msra.gmra.mxu0 %v2465_v16  ;;  %2627 = vmatmul.bf16.vlgmr.msra.gmra.mxu1 %v2465_v16 }
 0x25f   : > { %2352 = vmatpush.bf16.msra.mxu2 %v4304_v1  ;;  %v6265_v1 = vld [vmem:[%s7135_s2] ss:$0 sm:$0xff]  ;;  %s5039_s2 = scalar_lea.hbm %s5038_s1, 8 }
 0x260   : > { %v1741_v4 = vadd.f32 %v5851_v40, %v1705_v57  ;;  %v1805_v5 = vadd.f32 %v5851_v40, %v1773_v14  ;;  %v6210_v57 = vpop.f32.mrf.mxu2  ;;  %v6212_v14 = vpop.f32.mrf.mxu3  ;;  %p5040_p11 = scmp.ne.s32.totalorder %s5038_s1, %s5039_s2  ;;  %p5045_p1 = scmp.lt.s32.totalorder %s5043_s20, %s5039_s2 }
 0x262   : > { %v1837_v39 = vmax.f32 %v1741_v4, %v1805_v5  ;;  %p5041_p12 = pnand %p5040_p11, %p5205_p5  ;;  %p5046_p2 = por %p5045_p1, %p5044_p0 }
 0x263   : > { %v1494_v45 = vpop.f32.mrf.mxu0  ;;  %v1583_v58 = vpop.f32.mrf.mxu1  ;;  %v1899_v29 = vld [vmem:[#allocation5 + $0x70] ss:$2 sm:$0xff]  ;;  %v1931_v8 = vld [vmem:[#allocation5 + $0x71] ss:$2 sm:$0xff] }
 0x264   : > { %1869 = vst [vmem:[#allocation5 + $0x80] sm:$0xff] %v1837_v39  ;;  %v1655_v62 = vadd.f32 %v1494_v45, %v1148_v51  ;;  %v1656_v12 = vadd.f32 %v1583_v58, %v1237_v44  ;;  %v1955_v60 = vmax.f32 %v1899_v29, %v1931_v8  ;;  %v4305_v44 = vld [vmem:[%s7089_s4 + $0x68] sm:$0xf0]  ;;  %p5042_p13 = pneg %p5041_p12 }
 0x265   : > { %v4308_v29 = vor.u32 %v4855_v54, %v4305_v44 }
 0x266   : > { %v1706_v30 = vmul.f32 %v5842_v3, %v1655_v62  ;;  %v1774_v10 = vmul.f32 %v5842_v3, %v1656_v12  ;;  %v1971_v28 = vmax.f32 %v1955_v60, 0.0  ;;  %v2453_v12 = vld [vmem:[#allocation3 + $0x32] sm:$0xff]  ;;  %v2454_v60 = vld [vmem:[#allocation3 + $0x3a] sm:$0xff]  ;;  %p5047_p3 = pnand %p5046_p2, %p5042_p13 }
 0x267   : > { %2401 = vmatpush.bf16.msra.mxu3 %v4308_v29 }
 0x268   : > { %v1742_v26 = vadd.f32 %v5851_v40, %v1706_v30  ;;  %v1806_v37 = vadd.f32 %v5851_v40, %v1774_v10  ;;  %2003 = vst [vmem:[#allocation3 + $0x51] sm:$0xff] %v1971_v28  ;;  %v2071_v43 = vpack.c.bf16 %v1971_v28, %v1970_v11  ;;  %v2467_v28 = vpack.c.bf16 %v2454_v60, %v2453_v12  ;;  %v1162_v31 = vpop.f32.mrf.mxu2 }
 0x269   : > { %v1163_v44 = vadd.f32 %v1162_v31, %v5762_v21  ;;  %v4852_v21 = vld [vmem:[%s7089_s4 + $0x44] sm:$0xf0] }
 0x26a   : > { %v1838_v0 = vmax.f32 %v1742_v26, %v1806_v37  ;;  %2196 = vmatmul.bf16.gmra.mxu2 %v2071_v43  ;;  %2245 = vmatmul.bf16.gmra.mxu3 %v2071_v43  ;;  %v1251_v26 = vpop.f32.mrf.mxu3 }
 0x26b   : > { %v1497_v24 = vpop.f32.mrf.mxu0  ;;  %v1586_v18 = vpop.f32.mrf.mxu1 }
 0x26c   : > { %1870 = vst [vmem:[#allocation5 + $0x88] sm:$0xff] %v1838_v0  ;;  %v1657_v11 = vadd.f32 %v1497_v24, %v1151_v53  ;;  %v1658_v38 = vadd.f32 %v1586_v18, %v1240_v9 }
 0x26e   : > { %v1707_v59 = vmul.f32 %v5842_v3, %v1657_v11  ;;  %v1775_v27 = vmul.f32 %v5842_v3, %v1658_v38  ;;  %2583 = vmatmul.bf16.gmra.mxu0 %v2466_v56  ;;  %2632 = vmatmul.bf16.gmra.mxu1 %v2466_v56  ;;  %v4295_v38 = vld [vmem:[%s7089_s4 + $0x50] sm:$0xf] }
 0x26f   : > { %v4296_v17 = vor.u32 %v4854_v50, %v4295_v38 }
 0x270   : > { %v1743_v32 = vadd.f32 %v5851_v40, %v1707_v59  ;;  %v1807_v42 = vadd.f32 %v5851_v40, %v1775_v27 }
 0x271   : > { %2353 = vmatpush.bf16.msra.mxu2 %v4296_v17 }
 0x272   : > { %v1839_v47 = vmax.f32 %v1743_v32, %v1807_v42  ;;  %v4300_v32 = vor.u32 %v4853_v55, %v4297_v63  ;;  %v1165_v42 = vpop.f32.mrf.mxu2 }
 0x273   : > { %v1499_v13 = vpop.f32.mrf.mxu0  ;;  %v1588_v22 = vpop.f32.mrf.mxu1  ;;  %v1901_v48 = vld [vmem:[#allocation5 + $0x80] ss:$2 sm:$0xff]  ;;  %v1933_v16 = vld [vmem:[#allocation5 + $0x81] ss:$2 sm:$0xff] }
 0x274   : > { %1871 = vst [vmem:[#allocation5 + $0x90] sm:$0xff] %v1839_v47  ;;  %v1659_v4 = vadd.f32 %v1499_v13, %v1153_v41  ;;  %v1660_v5 = vadd.f32 %v1588_v22, %v1242_v52  ;;  %v1956_v51 = vmax.f32 %v1901_v48, %v1933_v16  ;;  %v1254_v41 = vpop.f32.mrf.mxu3  ;;  %2402 = vmatpush.bf16.msra.mxu3 %v4300_v32  ;;  %v2455_v22 = vld [vmem:[#allocation3 + $0x4a] sm:$0xff]  ;;  %v2456_v48 = vld [vmem:[#allocation3 + $0x52] sm:$0xff] }
 0x275   : > { %v1161_v16 = vadd.f32 %v6210_v57, %v5756_v19  ;;  %v7139_v32 = vld [vmem:[#allocation17_spill] sm:$0xff] }
 0x276   : > { %v1708_v39 = vmul.f32 %v5842_v3, %v1659_v4  ;;  %v1776_v45 = vmul.f32 %v5842_v3, %v1660_v5  ;;  %v1972_v58 = vmax.f32 %v1956_v51, 0.0 }
 0x278   : > { %v1744_v8 = vadd.f32 %v5851_v40, %v1708_v39  ;;  %v1808_v62 = vadd.f32 %v5851_v40, %v1776_v45  ;;  %2004 = vst [vmem:[#allocation3 + $0x61] sm:$0xff] %v1972_v58  ;;  %v7136_v39 = vld [vmem:[#allocation14_spill] sm:$0xff] }
 0x279   : > { %v1252_v45 = vadd.f32 %v1251_v26, %v7136_v39 }
 0x27a   : > { %v1840_v33 = vmax.f32 %v1744_v8, %v1808_v62 }
 0x27b   : > { %v1502_v7 = vpop.f32.mrf.mxu0  ;;  %v1591_v34 = vpop.f32.mrf.mxu1 }
 0x27c   : > { %1872 = vst [vmem:[#allocation5 + $0x98] sm:$0xff] %v1840_v33  ;;  %v1661_v30 = vadd.f32 %v1502_v7, %v1156_v61  ;;  %v1662_v10 = vadd.f32 %v1591_v34, %v1245_v6  ;;  %v1256_v29 = vpop.f32.mrf.mxu3  ;;  %v4287_v34 = vld [vmem:[%s7089_s4 + $0x40] sm:$0xf] }
 0x27e   : > { %v1709_v37 = vmul.f32 %v5842_v3, %v1661_v30  ;;  %v1777_v43 = vmul.f32 %v5842_v3, %v1662_v10  ;;  %2588 = vmatmul.bf16.gmra.mxu0 %v2467_v28  ;;  %2637 = vmatmul.bf16.gmra.mxu1 %v2467_v28  ;;  %v4288_v30 = vor.u32 %v4852_v21, %v4287_v34  ;;  %v4851_v10 = vld [vmem:[%s7089_s4 + $0x44] sm:$0xf]  ;;  %v4289_v28 = vld [vmem:[%s7089_s4 + $0x48] sm:$0xf0] }
 0x280   : > { %v1745_v46 = vadd.f32 %v5851_v40, %v1709_v37  ;;  %v1809_v15 = vadd.f32 %v5851_v40, %v1777_v43  ;;  %v4292_v43 = vor.u32 %v4851_v10, %v4289_v28  ;;  %2354 = vmatpush.bf16.msra.mxu2 %v4288_v30 }
 0x282   : > { %v1841_v25 = vmax.f32 %v1745_v46, %v1809_v15  ;;  %2403 = vmatpush.bf16.msra.mxu3 %v4292_v43 }
 0x283   : > { %v1504_v23 = vpop.f32.mrf.mxu0  ;;  %v1593_v53 = vpop.f32.mrf.mxu1  ;;  %v1903_v9 = vld [vmem:[#allocation5 + $0x90] ss:$2 sm:$0xff]  ;;  %v1935_v0 = vld [vmem:[#allocation5 + $0x91] ss:$2 sm:$0xff] }
 0x284   : > { %1873 = vst [vmem:[#allocation5 + $0xa0] sm:$0xff] %v1841_v25  ;;  %v1663_v24 = vadd.f32 %v1504_v23, %v1158_v49  ;;  %v1664_v18 = vadd.f32 %v1593_v53, %v1247_v2  ;;  %v1957_v11 = vmax.f32 %v1903_v9, %v1935_v0  ;;  %v7137_v25 = vld [vmem:[#allocation15_spill] sm:$0xff]  ;;  %v7138_v53 = vld [vmem:[#allocation16_spill] sm:$0xff]  ;;  %v1259_v38 = vpop.f32.mrf.mxu3 }
 0x285   : > { %v1166_v23 = vadd.f32 %v1165_v42, %v7137_v25  ;;  %v1255_v9 = vadd.f32 %v1254_v41, %v7138_v53  ;;  %v7140_v41 = vld [vmem:[#allocation18_spill] sm:$0xff] }
 0x286   : > { %v1710_v56 = vmul.f32 %v5842_v3, %v1663_v24  ;;  %v1778_v59 = vmul.f32 %v5842_v3, %v1664_v18  ;;  %v1973_v27 = vmax.f32 %v1957_v11, 0.0  ;;  %v1250_v3 = vadd.f32 %v6212_v14, %v5758_v20  ;;  %v6272_v20 = vld [vmem:[%s7088_s3] ss:$0 sm:$0xff]  ;;  %v7144_v25 = vld [vmem:[#allocation22_spill] sm:$0xff] }
 0x288   : > { %v1746_v52 = vadd.f32 %v5851_v40, %v1710_v56  ;;  %v1810_v47 = vadd.f32 %v5851_v40, %v1778_v59  ;;  %2005 = vst [vmem:[#allocation3 + $0x69] sm:$0xff] %v1973_v27  ;;  %v2072_v13 = vpack.c.bf16 %v1973_v27, %v1972_v58  ;;  %v2468_v40 = vpack.c.bf16 %v2456_v48, %v2455_v22  ;;  %v1167_v58 = vpop.f32.mrf.mxu2 }
 0x289   : > { %v1168_v42 = vadd.f32 %v1167_v58, %v7139_v32 }
 0x28a   : > { %v1842_v4 = vmax.f32 %v1746_v52, %v1810_v47  ;;  %2201 = vmatmul.bf16.gmra.mxu2 %v2072_v13  ;;  %2250 = vmatmul.bf16.gmra.mxu3 %v2072_v13  ;;  %v1257_v52 = vadd.f32 %v1256_v29, %v7140_v41 }
 0x28b   : > { %v1507_v5 = vpop.f32.mrf.mxu0  ;;  %v1596_v51 = vpop.f32.mrf.mxu1 }
 0x28c   : > { %1874 = vst [vmem:[#allocation5 + $0xa8] sm:$0xff] %v1842_v4  ;;  %v1665_v35 = vadd.f32 %v1507_v5, %v1161_v16  ;;  %v1666_v36 = vadd.f32 %v1596_v51, %v1250_v3  ;;  %v4279_v51 = vld [vmem:[%s7089_s4 + $0x30] sm:$0xf] }
 0x28e   : > { %v1711_v54 = vmul.f32 %v6265_v1, %v1665_v35  ;;  %v1779_v19 = vmul.f32 %v6265_v1, %v1666_v36  ;;  %2593 = vmatmul.bf16.gmra.mxu0 %v2468_v40  ;;  %2642 = vmatmul.bf16.gmra.mxu1 %v2468_v40  ;;  %v4850_v35 = vld [vmem:[%s7089_s4 + $0x34] sm:$0xf0]  ;;  %v4849_v40 = vld [vmem:[%s7089_s4 + $0x34] sm:$0xf] }
 0x28f   : > { %v2457_v49 = vld [vmem:[#allocation3 + $0x62] sm:$0xff]  ;;  %v2458_v2 = vld [vmem:[#allocation3 + $0x6a] sm:$0xff]  ;;  %v4280_v36 = vor.u32 %v4850_v35, %v4279_v51 }
 0x290   : > { %v1747_v57 = vadd.f32 %v6272_v20, %v1711_v54  ;;  %v1811_v14 = vadd.f32 %v6272_v20, %v1779_v19  ;;  %v1170_v11 = vpop.f32.mrf.mxu2  ;;  %v2469_v55 = vpack.c.bf16 %v2458_v2, %v2457_v49  ;;  %v4281_v54 = vld [vmem:[%s7089_s4 + $0x38] sm:$0xf0]  ;;  %v7143_v49 = vld [vmem:[#allocation21_spill] sm:$0xff] }
 0x291   : > { %2355 = vmatpush.bf16.msra.mxu2 %v4280_v36 }
 0x292   : > { %v1843_v8 = vmax.f32 %v1747_v57, %v1811_v14  ;;  %v1261_v57 = vpop.f32.mrf.mxu3 }
 0x293   : > { %v1509_v62 = vpop.f32.mrf.mxu0  ;;  %v1598_v12 = vpop.f32.mrf.mxu1  ;;  %v1905_v60 = vld [vmem:[#allocation5 + $0xa0] ss:$2 sm:$0xff]  ;;  %v1937_v61 = vld [vmem:[#allocation5 + $0xa1] ss:$2 sm:$0xff] }
 0x294   : > { %1875 = vst [vmem:[#allocation5 + $0xb0] sm:$0xff] %v1843_v8  ;;  %v1667_v6 = vadd.f32 %v1509_v62, %v1163_v44  ;;  %v1668_v33 = vadd.f32 %v1598_v12, %v1252_v45  ;;  %v1958_v7 = vmax.f32 %v1905_v60, %v1937_v61  ;;  %v4284_v45 = vor.u32 %v4849_v40, %v4281_v54  ;;  %v7141_v62 = vld [vmem:[#allocation19_spill] sm:$0xff]  ;;  %v7142_v60 = vld [vmem:[#allocation20_spill] sm:$0xff]  ;;  %v4263_v54 = vld [vmem:[%s7089_s4 + $0x10] sm:$0xf] }
 0x295   : > { %v1171_v12 = vadd.f32 %v1170_v11, %v7141_v62  ;;  %v1260_v61 = vadd.f32 %v1259_v38, %v7142_v60  ;;  %v7147_v62 = vld [vmem:[#allocation25_spill] sm:$0xff]  ;;  %v7148_v60 = vld [vmem:[#allocation26_spill] sm:$0xff] }
 0x296   : > { %v1712_v31 = vmul.f32 %v6265_v1, %v1667_v6  ;;  %v1780_v26 = vmul.f32 %v6265_v1, %v1668_v33  ;;  %v1974_v37 = vmax.f32 %v1958_v7, 0.0  ;;  %2404 = vmatpush.bf16.msra.mxu3 %v4284_v45 }
 0x298   : > { %v1748_v46 = vadd.f32 %v6272_v20, %v1712_v31  ;;  %v1812_v15 = vadd.f32 %v6272_v20, %v1780_v26  ;;  %2006 = vst [vmem:[#allocation3 + $0x79] sm:$0xff] %v1974_v37  ;;  %v1172_v19 = vpop.f32.mrf.mxu2 }
 0x299   : > { %v1173_v2 = vadd.f32 %v1172_v19, %v7143_v49  ;;  %v4846_v19 = vld [vmem:[%s7089_s4 + $0x14] sm:$0xf0] }
 0x29a   : > { %v1844_v0 = vmax.f32 %v1748_v46, %v1812_v15 }
 0x29b   : > { %v1512_v24 = vpop.f32.mrf.mxu0  ;;  %v1601_v18 = vpop.f32.mrf.mxu1 }
 0x29c   : > { %1876 = vst [vmem:[#allocation5 + $0xb8] sm:$0xff] %v1844_v0  ;;  %v1669_v50 = vadd.f32 %v1512_v24, %v1166_v23  ;;  %v1670_v17 = vadd.f32 %v1601_v18, %v1255_v9  ;;  %v1262_v23 = vadd.f32 %v1261_v57, %v7144_v25  ;;  %v4264_v57 = vor.u32 %v4846_v19, %v4263_v54  ;;  %v7149_v25 = vld [vmem:[#allocation27_spill] sm:$0xff] }
 0x29e   : > { %v1713_v63 = vmul.f32 %v6265_v1, %v1669_v50  ;;  %v1781_v56 = vmul.f32 %v6265_v1, %v1670_v17  ;;  %2598 = vmatmul.bf16.gmra.mxu0 %v2469_v55  ;;  %2647 = vmatmul.bf16.gmra.mxu1 %v2469_v55  ;;  %v4271_v17 = vld [vmem:[%s7089_s4 + $0x20] sm:$0xf]  ;;  %v4848_v55 = vld [vmem:[%s7089_s4 + $0x24] sm:$0xf0] }
 0x2a0   : > { %v1749_v59 = vadd.f32 %v6272_v20, %v1713_v63  ;;  %v1813_v27 = vadd.f32 %v6272_v20, %v1781_v56  ;;  %v1175_v26 = vpop.f32.mrf.mxu2  ;;  %v4272_v63 = vor.u32 %v4848_v55, %v4271_v17  ;;  %v4847_v56 = vld [vmem:[%s7089_s4 + $0x24] sm:$0xf] }
 0x2a2   : > { %v1845_v47 = vmax.f32 %v1749_v59, %v1813_v27  ;;  %v4273_v59 = vld [vmem:[%s7089_s4 + $0x28] sm:$0xf0]  ;;  %2356 = vmatpush.bf16.msra.mxu2 %v4272_v63 }
 0x2a3   : > { %v1514_v13 = vpop.f32.mrf.mxu0  ;;  %v1603_v22 = vpop.f32.mrf.mxu1  ;;  %v1907_v48 = vld [vmem:[#allocation5 + $0xb0] ss:$2 sm:$0xff]  ;;  %v1939_v16 = vld [vmem:[#allocation5 + $0xb1] ss:$2 sm:$0xff]  ;;  %v4276_v41 = vor.u32 %v4847_v56, %v4273_v59  ;;  %v4257_v56 = vld [vmem:[%s7089_s4 + $0x8] sm:$0xf0] }
 0x2a4   : > { %1877 = vst [vmem:[#allocation5 + $0xc0] sm:$0xff] %v1845_v47  ;;  %v1671_v3 = vadd.f32 %v1514_v13, %v1168_v42  ;;  %v1672_v4 = vadd.f32 %v1603_v22, %v1257_v52  ;;  %v1959_v5 = vmax.f32 %v1907_v48, %v1939_v16  ;;  %v7145_v13 = vld [vmem:[#allocation23_spill] sm:$0xff]  ;;  %v7146_v48 = vld [vmem:[#allocation24_spill] sm:$0xff] }
 0x2a5   : > { %2405 = vmatpush.bf16.msra.mxu3 %v4276_v41  ;;  %v1176_v22 = vadd.f32 %v1175_v26, %v7145_v13 }
 0x2a6   : > { %v1714_v14 = vmul.f32 %v6265_v1, %v1671_v3  ;;  %v1782_v44 = vmul.f32 %v6265_v1, %v1672_v4  ;;  %v1975_v39 = vmax.f32 %v1959_v5, 0.0  ;;  %2357 = vmatpush.bf16.msra.mxu2 %v4264_v57 }
 0x2a8   : > { %v1750_v58 = vadd.f32 %v6272_v20, %v1714_v14  ;;  %v1814_v29 = vadd.f32 %v6272_v20, %v1782_v44  ;;  %2007 = vst [vmem:[#allocation3 + $0x81] sm:$0xff] %v1975_v39  ;;  %v2073_v8 = vpack.c.bf16 %v1975_v39, %v1974_v37  ;;  %v1264_v37 = vpop.f32.mrf.mxu3  ;;  %v1177_v3 = vpop.f32.mrf.mxu2  ;;  %v4845_v14 = vld [vmem:[%s7089_s4 + $0x14] sm:$0xf]  ;;  %v4265_v44 = vld [vmem:[%s7089_s4 + $0x18] sm:$0xf0] }
 0x2a9   : > { %v1265_v16 = vadd.f32 %v1264_v37, %v7146_v48 }
 0x2aa   : > { %v1846_v6 = vmax.f32 %v1750_v58, %v1814_v29  ;;  %2206 = vmatmul.bf16.gmra.mxu2 %v2073_v8  ;;  %2255 = vmatmul.bf16.gmra.mxu3 %v2073_v8  ;;  %v4268_v58 = vor.u32 %v4845_v14, %v4265_v44 }
 0x2ab   : > { %v1517_v33 = vpop.f32.mrf.mxu0  ;;  %v1606_v7 = vpop.f32.mrf.mxu1 }
 0x2ac   : > { %1878 = vst [vmem:[#allocation5 + $0xc8] sm:$0xff] %v1846_v6  ;;  %v1673_v34 = vadd.f32 %v1517_v33, %v1171_v12  ;;  %v1674_v21 = vadd.f32 %v1606_v7, %v1260_v61  ;;  %2406 = vmatpush.bf16.msra.mxu3 %v4268_v58  ;;  %v1178_v12 = vadd.f32 %v1177_v3, %v7147_v62 }
 0x2ae   : > { %v1715_v30 = vmul.f32 %v6265_v1, %v1673_v34  ;;  %v1783_v10 = vmul.f32 %v6265_v1, %v1674_v21 }
 0x2af   : > { %v2459_v28 = vld [vmem:[#allocation3 + $0x7a] sm:$0xff]  ;;  %v2460_v31 = vld [vmem:[#allocation3 + $0x82] sm:$0xff] }
 0x2b0   : > { %v1751_v43 = vadd.f32 %v6272_v20, %v1715_v30  ;;  %v1815_v46 = vadd.f32 %v6272_v20, %v1783_v10  ;;  %v2470_v15 = vpack.c.bf16 %v2460_v31, %v2459_v28  ;;  %v1266_v4 = vpop.f32.mrf.mxu3  ;;  %v1180_v31 = vpop.f32.mrf.mxu2 }
 0x2b1   : > { %v1267_v61 = vadd.f32 %v1266_v4, %v7148_v60  ;;  %v7152_v4 = vld [vmem:[#allocation30_spill] sm:$0xff] }
 0x2b2   : > { %v1847_v53 = vmax.f32 %v1751_v43, %v1815_v46  ;;  %2603 = vmatmul.bf16.gmra.mxu0 %v2470_v15  ;;  %2652 = vmatmul.bf16.gmra.mxu1 %v2470_v15 }
 0x2b3   : > { %v1519_v9 = vpop.f32.mrf.mxu0  ;;  %v1608_v0 = vpop.f32.mrf.mxu1  ;;  %v1909_v24 = vld [vmem:[#allocation5 + $0xc0] ss:$2 sm:$0xff]  ;;  %v1941_v18 = vld [vmem:[#allocation5 + $0xc1] ss:$2 sm:$0xff] }
 0x2b4   : > { %1879 = vst [vmem:[#allocation5 + $0xd0] sm:$0xff] %v1847_v53  ;;  %v1675_v11 = vadd.f32 %v1519_v9, %v1173_v2  ;;  %v1676_v38 = vadd.f32 %v1608_v0, %v1262_v23  ;;  %v1960_v50 = vmax.f32 %v1909_v24, %v1941_v18  ;;  %v1181_v23 = vadd.f32 %v1180_v31, %v7149_v25  ;;  %v7150_v53 = vld [vmem:[#allocation28_spill] sm:$0xff] }
 0x2b6   : > { %v1716_v27 = vmul.f32 %v6265_v1, %v1675_v11  ;;  %v1784_v32 = vmul.f32 %v6265_v1, %v1676_v38  ;;  %v1976_v42 = vmax.f32 %v1960_v50, 0.0  ;;  %v4255_v11 = vld [vmem:[%s7089_s4] sm:$0xf]  ;;  %v4844_v38 = vld [vmem:[%s7089_s4 + $0x4] sm:$0xf0] }
 0x2b7   : > { %v4843_v50 = vld [vmem:[%s7089_s4 + $0x4] sm:$0xf]  ;;  %v4256_v63 = vor.u32 %v4844_v38, %v4255_v11 }
 0x2b8   : > { %v1752_v52 = vadd.f32 %v6272_v20, %v1716_v27  ;;  %v1816_v47 = vadd.f32 %v6272_v20, %v1784_v32  ;;  %2008 = vst [vmem:[#allocation3 + $0x91] sm:$0xff] %v1976_v42  ;;  %v1269_v26 = vpop.f32.mrf.mxu3  ;;  %v4260_v59 = vor.u32 %v4843_v50, %v4257_v56  ;;  %v2019_v50 = vld [vmem:[#allocation3 + $0x50] sm:$0xff] }
 0x2b9   : > { %v1270_v9 = vadd.f32 %v1269_v26, %v7150_v53  ;;  %2358 = vmatpush.bf16.msra.mxu2 %v4256_v63  ;;  %v2017_v53 = vld [vmem:[#allocation3 + $0x38] sm:$0xff] }
 0x2ba   : > { %v1848_v5 = vmax.f32 %v1752_v52, %v1816_v47  ;;  %2407 = vmatpush.bf16.msra.mxu3 %v4260_v59  ;;  %v2021_v59 = vld [vmem:[#allocation3 + $0x68] sm:$0xff] }
 0x2bb   : > { %v1522_v51 = vpop.f32.mrf.mxu0  ;;  %v1611_v35 = vpop.f32.mrf.mxu1 }
 0x2bc   : > { %1880 = vst [vmem:[#allocation5 + $0xd8] sm:$0xff] %v1848_v5  ;;  %v1677_v36 = vadd.f32 %v1522_v51, %v1176_v22  ;;  %v1678_v40 = vadd.f32 %v1611_v35, %v1265_v16  ;;  %v7151_v16 = vld [vmem:[#allocation29_spill] sm:$0xff] }
 0x2be   : > { %v1717_v39 = vmul.f32 %v6265_v1, %v1677_v36  ;;  %v1785_v45 = vmul.f32 %v6265_v1, %v1678_v40 }
 0x2c0   : > { %v1753_v29 = vadd.f32 %v6272_v20, %v1717_v39  ;;  %v1817_v8 = vadd.f32 %v6272_v20, %v1785_v45  ;;  %v1271_v41 = vpop.f32.mrf.mxu3 }
 0x2c1   : > { %v1272_v5 = vadd.f32 %v1271_v41, %v7152_v4 }
 0x2c2   : > { %v1849_v6 = vmax.f32 %v1753_v29, %v1817_v8 }
 0x2c3   : > { %v1524_v33 = vpop.f32.mrf.mxu0  ;;  %v1613_v7 = vpop.f32.mrf.mxu1  ;;  %v1911_v34 = vld [vmem:[#allocation5 + $0xd0] ss:$2 sm:$0xff]  ;;  %v1943_v21 = vld [vmem:[#allocation5 + $0xd1] ss:$2 sm:$0xff] }
 0x2c4   : > { %1881 = vst [vmem:[#allocation5 + $0xe0] sm:$0xff] %v1849_v6  ;;  %v1679_v30 = vadd.f32 %v1524_v33, %v1178_v12  ;;  %v1680_v10 = vadd.f32 %v1613_v7, %v1267_v61  ;;  %v1961_v28 = vmax.f32 %v1911_v34, %v1943_v21 }
 0x2c6   : > { %v1718_v37 = vmul.f32 %v6265_v1, %v1679_v30  ;;  %v1786_v43 = vmul.f32 %v6265_v1, %v1680_v10  ;;  %v1977_v46 = vmax.f32 %v1961_v28, 0.0  ;;  %v2012_v30 = vld [vmem:[#allocation3] sm:$0xff] }
 0x2c8   : > { %v1754_v15 = vadd.f32 %v6272_v20, %v1718_v37  ;;  %v1818_v49 = vadd.f32 %v6272_v20, %v1786_v43  ;;  %2009 = vst [vmem:[#allocation3 + $0x99] sm:$0xff] %v1977_v46  ;;  %v2074_v2 = vpack.c.bf16 %v1977_v46, %v1976_v42  ;;  %v1182_v42 = vpop.f32.mrf.mxu2  ;;  %v6392_v7 = vpop.f32.mrf.mxu3  ;;  %v2015_v43 = vld [vmem:[#allocation3 + $0x20] sm:$0xff]  ;;  %v2014_v46 = vld [vmem:[#allocation3 + $0x18] sm:$0xff] }
 0x2c9   : > { %v1183_v3 = vadd.f32 %v1182_v42, %v7151_v16  ;;  %v2020_v42 = vld [vmem:[#allocation3 + $0x60] sm:$0xff] }
 0x2ca   : > { %v1850_v0 = vmax.f32 %v1754_v15, %v1818_v49  ;;  %2211 = vmatmul.bf16.gmra.mxu2 %v2074_v2  ;;  %2260 = vmatmul.bf16.gmra.mxu3 %v2074_v2  ;;  %v2029_v15 = vpack.c.bf16 %v2015_v43, %v2014_v46  ;;  %v2032_v41 = vpack.c.bf16 %v2021_v59, %v2020_v42 }
 0x2cb   : > { %v1527_v24 = vpop.f32.mrf.mxu0  ;;  %v1616_v18 = vpop.f32.mrf.mxu1 }
 0x2cc   : > { %1882 = vst [vmem:[#allocation5 + $0xe8] sm:$0xff] %v1850_v0  ;;  %v1681_v17 = vadd.f32 %v1527_v24, %v1181_v23  ;;  %v1682_v55 = vadd.f32 %v1616_v18, %v1270_v9  ;;  %v2016_v9 = vld [vmem:[#allocation3 + $0x30] sm:$0xff] }
 0x2cd   : > { %v2030_v0 = vpack.c.bf16 %v2017_v53, %v2016_v9  ;;  %v4455_v53 = vld [vmem:[%s7092_s7 + $0xd0] sm:$0xf]  ;;  %v4918_v9 = vld [vmem:[%s7092_s7 + $0xd4] sm:$0xf0] }
 0x2ce   : > { %v1719_v27 = vmul.f32 %v6265_v1, %v1681_v17  ;;  %v1787_v32 = vmul.f32 %v6265_v1, %v1682_v55  ;;  %v2018_v17 = vld [vmem:[#allocation3 + $0x48] sm:$0xff] }
 0x2cf   : > { %v2461_v52 = vld [vmem:[#allocation3 + $0x92] sm:$0xff]  ;;  %v2462_v47 = vld [vmem:[#allocation3 + $0x9a] sm:$0xff]  ;;  %v2031_v55 = vpack.c.bf16 %v2019_v50, %v2018_v17  ;;  %v4456_v50 = vor.u32 %v4918_v9, %v4455_v53 }
 0x2d0   : > { %v1755_v13 = vadd.f32 %v6272_v20, %v1719_v27  ;;  %v1819_v22 = vadd.f32 %v6272_v20, %v1787_v32  ;;  %v2471_v48 = vpack.c.bf16 %v2462_v47, %v2461_v52  ;;  %v6390_v33 = vpop.f32.mrf.mxu2  ;;  %v6396_v31 = vpop.f32.mrf.mxu3  ;;  %v4471_v52 = vld [vmem:[%s7092_s7 + $0xf0] sm:$0xf]  ;;  %v4922_v47 = vld [vmem:[%s7092_s7 + $0xf4] sm:$0xf0]  ;;  %v4457_v17 = vld [vmem:[%s7092_s7 + $0xd8] sm:$0xf0] }
 0x2d1   : > { %v4599_v9 = vld [vmem:[%s7092_s7 + $0x150] sm:$0xf] }
 0x2d2   : > { %v1851_v51 = vmax.f32 %v1755_v13, %v1819_v22  ;;  %2608 = vmatmul.bf16.gmra.mxu0 %v2471_v48  ;;  %2657 = vmatmul.bf16.gmra.mxu1 %v2471_v48  ;;  %v4921_v13 = vld [vmem:[%s7092_s7 + $0xf4] sm:$0xf]  ;;  %v4472_v22 = vor.u32 %v4922_v47, %v4471_v52  ;;  %v4473_v48 = vld [vmem:[%s7092_s7 + $0xf8] sm:$0xf0]  ;;  %v4938_v52 = vld [vmem:[%s7092_s7 + $0x174] sm:$0xf0] }
 0x2d3   : > { %v1529_v35 = vpop.f32.mrf.mxu0  ;;  %v1618_v36 = vpop.f32.mrf.mxu1  ;;  %v1913_v40 = vld [vmem:[#allocation5 + $0xe0] ss:$2 sm:$0xff]  ;;  %v1945_v54 = vld [vmem:[#allocation5 + $0xe1] ss:$2 sm:$0xff]  ;;  %v4476_v16 = vor.u32 %v4921_v13, %v4473_v48  ;;  %v4937_v47 = vld [vmem:[%s7092_s7 + $0x174] sm:$0xf] }
 0x2d4   : > { %1883 = vst [vmem:[#allocation5 + $0xf0] sm:$0xff] %v1851_v51  ;;  %v1683_v19 = vadd.f32 %v1529_v35, %v1183_v3  ;;  %v1684_v57 = vadd.f32 %v1618_v36, %v1272_v5  ;;  %v1962_v14 = vmax.f32 %v1913_v40, %v1945_v54  ;;  %3004 = vmatpush.bf16.msrb.mxu2 %v4472_v22  ;;  %v2023_v5 = vld [vmem:[#allocation3 + $0x80] sm:$0xff]  ;;  %v2022_v51 = vld [vmem:[#allocation3 + $0x78] sm:$0xff] }
 0x2d5   : > { %3033 = vmatpush.bf16.msrb.mxu3 %v4476_v16  ;;  %v2033_v35 = vpack.c.bf16 %v2023_v5, %v2022_v51  ;;  %v4617_v22 = vld [vmem:[%s7092_s7 + $0x178] sm:$0xf0]  ;;  %v4447_v16 = vld [vmem:[%s7092_s7 + $0xc0] sm:$0xf]  ;;  %v4916_v5 = vld [vmem:[%s7092_s7 + $0xc4] sm:$0xf0] }
 0x2d6   : > { %v1720_v44 = vmul.f32 %v6265_v1, %v1683_v19  ;;  %v1788_v39 = vmul.f32 %v6265_v1, %v1684_v57  ;;  %v1978_v45 = vmax.f32 %v1962_v14, 0.0  ;;  %v2025_v57 = vld [vmem:[#allocation3 + $0x98] sm:$0xff]  ;;  %v2024_v14 = vld [vmem:[#allocation3 + $0x90] sm:$0xff]  ;;  %v4620_v48 = vor.u32 %v4937_v47, %v4617_v22  ;;  %v4915_v51 = vld [vmem:[%s7092_s7 + $0xc4] sm:$0xf] }
 0x2d7   : > { %v4439_v47 = vld [vmem:[%s7092_s7 + $0xb0] sm:$0xf] }
 0x2d8   : > { %v1756_v58 = vadd.f32 %v6272_v20, %v1720_v44  ;;  %v1820_v29 = vadd.f32 %v6272_v20, %v1788_v39  ;;  %2010 = vst [vmem:[#allocation3 + $0xa9] sm:$0xff] %v1978_v45  ;;  %v2013_v20 = vld [vmem:[#allocation3 + $0x8] sm:$0xff]  ;;  %v6394_v28 = vpop.f32.mrf.mxu2  ;;  %v6400_v37 = vpop.f32.mrf.mxu3  ;;  %v4463_v44 = vld [vmem:[%s7092_s7 + $0xe0] sm:$0xf]  ;;  %3338 = vmatpush.bf16.msrb.mxu1 %v4620_v48 }
 0x2d9   : > { %v2028_v10 = vpack.c.bf16 %v2013_v20, %v2012_v30  ;;  %v4920_v39 = vld [vmem:[%s7092_s7 + $0xe4] sm:$0xf0] }
 0x2da   : > { %v1852_v8 = vmax.f32 %v1756_v58, %v1820_v29  ;;  %v2034_v58 = vpack.c.bf16 %v2025_v57, %v2024_v14  ;;  %v4464_v29 = vor.u32 %v4920_v39, %v4463_v44  ;;  %v4448_v14 = vor.u32 %v4916_v5, %v4447_v16  ;;  %v4449_v44 = vld [vmem:[%s7092_s7 + $0xc8] sm:$0xf0]  ;;  %v4607_v39 = vld [vmem:[%s7092_s7 + $0x160] sm:$0xf] }
 0x2db   : > { %v6570_v5 = vld [vmem:[%s7091_s6] ss:$0 sm:$0xff] }
 0x2dc   : > { %1884 = vst [vmem:[#allocation5 + $0xf8] sm:$0xff] %v1852_v8  ;;  %v4465_v8 = vld [vmem:[%s7092_s7 + $0xe8] sm:$0xf0]  ;;  %3005 = vmatpush.bf16.msrb.mxu2 %v4464_v29 }
 0x2df   : > { %v2026_v20 = vld [vmem:[#allocation3 + $0xa8] sm:$0xff] }
 0x2e0   : > { %v6398_v26 = vpop.f32.mrf.mxu2  ;;  %v6404_v2 = vpop.f32.mrf.mxu3  ;;  %3006 = vmatpush.bf16.msrb.mxu2 %v4456_v50  ;;  %v4933_v50 = vld [vmem:[%s7092_s7 + $0x154] sm:$0xf] }
 0x2e3   : > { %v1915_v62 = vld [vmem:[#allocation5 + $0xf0] ss:$2 sm:$0xff]  ;;  %v1947_v12 = vld [vmem:[#allocation5 + $0xf1] ss:$2 sm:$0xff] }
 0x2e4   : > { %v1963_v60 = vmax.f32 %v1915_v62, %v1947_v12  ;;  %3007 = vmatpush.bf16.msrb.mxu2 %v4448_v14 }
 0x2e6   : > { %v1979_v61 = vmax.f32 %v1963_v60, 0.0 }
 0x2e8   : > { %2011 = vst [vmem:[#allocation3 + $0xb1] sm:$0xff] %v1979_v61  ;;  %v2075_v6 = vpack.c.bf16 %v1979_v61, %v1978_v45  ;;  %v6402_v49 = vpop.f32.mrf.mxu2  ;;  %v6408_v23 = vpop.f32.mrf.mxu3  ;;  %v4919_v45 = vld [vmem:[%s7092_s7 + $0xe4] sm:$0xf] }
 0x2e9   : > { %v4468_v62 = vor.u32 %v4919_v45, %v4465_v8  ;;  %v4936_v45 = vld [vmem:[%s7092_s7 + $0x164] sm:$0xf0]  ;;  %v4935_v8 = vld [vmem:[%s7092_s7 + $0x164] sm:$0xf] }
 0x2ea   : > { %2216 = vmatmul.bf16.gmra.mxu2 %v2075_v6  ;;  %2265 = vmatmul.bf16.gmra.mxu3 %v2075_v6  ;;  %v4608_v29 = vor.u32 %v4936_v45, %v4607_v39  ;;  %v4932_v39 = vld [vmem:[%s7092_s7 + $0x144] sm:$0xf0] }
 0x2eb   : > { %3034 = vmatpush.bf16.msrb.mxu3 %v4468_v62  ;;  %v4609_v62 = vld [vmem:[%s7092_s7 + $0x168] sm:$0xf0] }
 0x2ef   : > { %v2463_v1 = vld [vmem:[#allocation3 + $0xaa] sm:$0xff]  ;;  %v2464_v34 = vld [vmem:[#allocation3 + $0xb2] sm:$0xff] }
 0x2f0   : > { %v2472_v21 = vpack.c.bf16 %v2464_v34, %v2463_v1  ;;  %v6406_v25 = vpop.f32.mrf.mxu2  ;;  %v6412_v18 = vpop.f32.mrf.mxu3  ;;  %v2027_v1 = vld [vmem:[#allocation3 + $0xb0] sm:$0xff] }
 0x2f1   : > { %v2579_v34 = vpop.f32.mrf.mxu0  ;;  %v2035_v30 = vpack.c.bf16 %v2027_v1, %v2026_v20  ;;  %v6539_v1 = vld [vmem:[%s7090_s5] ss:$0 sm:$0xff]  ;;  %v4612_v20 = vor.u32 %v4935_v8, %v4609_v62  ;;  %v4912_v62 = vld [vmem:[%s7092_s7 + $0xa4] sm:$0xf0] }
 0x2f2   : > { %2613 = vmatmul.bf16.gmra.mxu0 %v2472_v21  ;;  %2662 = vmatmul.bf16.gmra.mxu1 %v2472_v21  ;;  %v6470_v21 = vpop.f32.mrf.mxu1  ;;  %v4431_v8 = vld [vmem:[%s7092_s7 + $0xa0] sm:$0xf] }
 0x2f3   : > { %3339 = vmatpush.bf16.msrb.mxu1 %v4612_v20 }
 0x2f8   : > { %v6410_v24 = vpop.f32.mrf.mxu2  ;;  %v6416_v38 = vpop.f32.mrf.mxu3 }
 0x2f9   : > { %v6476_v46 = vpop.f32.mrf.mxu0 }
 0x2fa   : > { %2359 = vmatmul.bf16.vlgmr.msra.gmra.mxu2 %v2028_v10  ;;  %2408 = vmatmul.bf16.vlgmr.msra.gmra.mxu3 %v2028_v10 }
 0x300   : > { %v6414_v11 = vpop.f32.mrf.mxu2  ;;  %v6420_v56 = vpop.f32.mrf.mxu3 }
 0x308   : > { %v6418_v63 = vpop.f32.mrf.mxu2 }
 0x30a   : > { %2364 = vmatmul.bf16.gmra.mxu2 %v2029_v15  ;;  %2413 = vmatmul.bf16.gmra.mxu3 %v2029_v15  ;;  %v6478_v15 = vpop.f32.mrf.mxu1 }
 0x30d   : > { %v6424_v32 = vpop.f32.mrf.mxu3 }
 0x310   : > { %v6422_v27 = vpop.f32.mrf.mxu2 }
 0x312   : > { %v6519_v57 = vpop.f32.mrf.mxu1 }
 0x315   : > { %v6440_v4 = vpop.f32.mrf.mxu3 }
 0x318   : > { %v6438_v3 = vpop.f32.mrf.mxu2 }
 0x31a   : > { %2369 = vmatmul.bf16.gmra.mxu2 %v2030_v0  ;;  %2418 = vmatmul.bf16.gmra.mxu3 %v2030_v0  ;;  %v4917_v0 = vld [vmem:[%s7092_s7 + $0xd4] sm:$0xf] }
 0x32a   : > { %2374 = vmatmul.bf16.gmra.mxu2 %v2031_v55  ;;  %2423 = vmatmul.bf16.gmra.mxu3 %v2031_v55  ;;  %v4460_v55 = vor.u32 %v4917_v0, %v4457_v17  ;;  %v4934_v0 = vld [vmem:[%s7092_s7 + $0x154] sm:$0xf0] }
 0x32c   : > { %3035 = vmatpush.bf16.msrb.mxu3 %v4460_v55 }
 0x32d   : > { %v6442_v36 = vpop.f32.mrf.mxu2  ;;  %v6444_v40 = vpop.f32.mrf.mxu3 }
 0x335   : > { %v6446_v54 = vpop.f32.mrf.mxu2  ;;  %v6448_v19 = vpop.f32.mrf.mxu3 }
 0x33a   : > { %2379 = vmatmul.bf16.gmra.mxu2 %v2032_v41  ;;  %2428 = vmatmul.bf16.gmra.mxu3 %v2032_v41  ;;  %v4615_v41 = vld [vmem:[%s7092_s7 + $0x170] sm:$0xf] }
 0x33b   : > { %v4616_v13 = vor.u32 %v4938_v52, %v4615_v41  ;;  %v4600_v41 = vor.u32 %v4934_v0, %v4599_v9  ;;  %v4601_v52 = vld [vmem:[%s7092_s7 + $0x158] sm:$0xf0]  ;;  %v4433_v9 = vld [vmem:[%s7092_s7 + $0xa8] sm:$0xf0] }
 0x33c   : > { %v4604_v22 = vor.u32 %v4933_v50, %v4601_v52  ;;  %v6601_v50 = vpop.f32.mrf.mxu1 }
 0x33d   : > { %3309 = vmatpush.bf16.msrb.mxu0 %v4616_v13  ;;  %v4914_v13 = vld [vmem:[%s7092_s7 + $0xb4] sm:$0xf0] }
 0x33e   : > { %v4440_v48 = vor.u32 %v4914_v13, %v4439_v47  ;;  %3340 = vmatpush.bf16.msrb.mxu1 %v4604_v22  ;;  %v4583_v13 = vld [vmem:[%s7092_s7 + $0x130] sm:$0xf]  ;;  %v4930_v22 = vld [vmem:[%s7092_s7 + $0x134] sm:$0xf0] }
 0x340   : > { %3008 = vmatpush.bf16.msrb.mxu2 %v4440_v48  ;;  %v4929_v48 = vld [vmem:[%s7092_s7 + $0x134] sm:$0xf] }
 0x341   : > { %3310 = vmatpush.bf16.msrb.mxu0 %v4608_v29  ;;  %v4593_v29 = vld [vmem:[%s7092_s7 + $0x148] sm:$0xf0] }
 0x345   : > { %3311 = vmatpush.bf16.msrb.mxu0 %v4600_v41 }
 0x34a   : > { %2384 = vmatmul.bf16.gmra.mxu2 %v2033_v35  ;;  %2433 = vmatmul.bf16.gmra.mxu3 %v2033_v35  ;;  %v6517_v35 = vpop.f32.mrf.mxu0 }
 0x34d   : > { %v6462_v12 = vpop.f32.mrf.mxu2  ;;  %v6464_v60 = vpop.f32.mrf.mxu3 }
 0x352   : > { %v6599_v0 = vpop.f32.mrf.mxu0 }
 0x355   : > { %v6466_v61 = vpop.f32.mrf.mxu2  ;;  %v6468_v6 = vpop.f32.mrf.mxu3 }
 0x35a   : > { %2389 = vmatmul.bf16.gmra.mxu2 %v2034_v58  ;;  %2438 = vmatmul.bf16.gmra.mxu3 %v2034_v58  ;;  %v4452_v58 = vor.u32 %v4915_v51, %v4449_v44  ;;  %v4591_v44 = vld [vmem:[%s7092_s7 + $0x140] sm:$0xf] }
 0x35c   : > { %3036 = vmatpush.bf16.msrb.mxu3 %v4452_v58 }
 0x36a   : > { %2394 = vmatmul.bf16.gmra.mxu2 %v2035_v30  ;;  %2443 = vmatmul.bf16.gmra.mxu3 %v2035_v30 }
 0x36d   : > { %v6472_v10 = vpop.f32.mrf.mxu2  ;;  %v6474_v43 = vpop.f32.mrf.mxu3 }
 0x375   : > { %v6492_v59 = vpop.f32.mrf.mxu2  ;;  %v6494_v42 = vpop.f32.mrf.mxu3 }
 0x37d   : > { %v2360_v30 = vpop.f32.mrf.mxu2  ;;  %v2409_v53 = vpop.f32.mrf.mxu3 }
 0x37e   : > { %v2361_v17 = vadd.f32 %v2360_v30, %v6390_v33  ;;  %v2410_v55 = vadd.f32 %v2409_v53, %v6392_v7  ;;  %v4913_v33 = vld [vmem:[%s7092_s7 + $0xb4] sm:$0xf]  ;;  %v4441_v7 = vld [vmem:[%s7092_s7 + $0xb8] sm:$0xf0]  ;;  %v4432_v30 = vor.u32 %v4912_v62, %v4431_v8  ;;  %v4911_v53 = vld [vmem:[%s7092_s7 + $0xa4] sm:$0xf] }
 0x37f   : > { %v4444_v14 = vor.u32 %v4913_v33, %v4441_v7  ;;  %v4436_v41 = vor.u32 %v4911_v53, %v4433_v9  ;;  %v4575_v8 = vld [vmem:[%s7092_s7 + $0x120] sm:$0xf]  ;;  %v4928_v62 = vld [vmem:[%s7092_s7 + $0x124] sm:$0xf0]  ;;  %v4577_v53 = vld [vmem:[%s7092_s7 + $0x128] sm:$0xf0] }
 0x380   : > { %v2668_v16 = vadd.f32 %v2579_v34, %v2361_v17  ;;  %v2669_v51 = vadd.f32 %v6470_v21, %v2410_v55  ;;  %v4931_v34 = vld [vmem:[%s7092_s7 + $0x144] sm:$0xf]  ;;  %v4592_v21 = vor.u32 %v4932_v39, %v4591_v44  ;;  %3009 = vmatpush.bf16.msrb.mxu2 %v4432_v30  ;;  %v4423_v44 = vld [vmem:[%s7092_s7 + $0x90] sm:$0xf]  ;;  %v4910_v39 = vld [vmem:[%s7092_s7 + $0x94] sm:$0xf0] }
 0x381   : > { %3037 = vmatpush.bf16.msrb.mxu3 %v4444_v14  ;;  %v4596_v20 = vor.u32 %v4931_v34, %v4593_v29  ;;  %v4585_v14 = vld [vmem:[%s7092_s7 + $0x138] sm:$0xf0]  ;;  %v4415_v9 = vld [vmem:[%s7092_s7 + $0x80] sm:$0xf] }
 0x382   : > { %v2704_v45 = vmul.f32 %v6539_v1, %v2668_v16  ;;  %v2740_v58 = vmul.f32 %v6539_v1, %v2669_v51  ;;  %3312 = vmatpush.bf16.msrb.mxu0 %v4592_v21  ;;  %v4584_v51 = vor.u32 %v4930_v22, %v4583_v13  ;;  %v4588_v34 = vor.u32 %v4929_v48, %v4585_v14  ;;  %v4925_v14 = vld [vmem:[%s7092_s7 + $0x114] sm:$0xf] }
 0x383   : > { %3341 = vmatpush.bf16.msrb.mxu1 %v4596_v20  ;;  %v4927_v20 = vld [vmem:[%s7092_s7 + $0x124] sm:$0xf] }
 0x384   : > { %v2724_v17 = vadd.f32 %v6570_v5, %v2704_v45  ;;  %v2756_v55 = vadd.f32 %v6570_v5, %v2740_v58  ;;  %v4424_v45 = vor.u32 %v4910_v39, %v4423_v44  ;;  %v2589_v44 = vpop.f32.mrf.mxu0  ;;  %v2638_v39 = vpop.f32.mrf.mxu1 }
 0x385   : > { %v2362_v52 = vpop.f32.mrf.mxu2  ;;  %v2411_v47 = vpop.f32.mrf.mxu3  ;;  %3038 = vmatpush.bf16.msrb.mxu3 %v4436_v41 }
 0x386   : > { %v2772_v33 = vmax.f32 %v2724_v17, %v2756_v55  ;;  %v2363_v7 = vadd.f32 %v2362_v52, %v6394_v28  ;;  %v2412_v16 = vadd.f32 %v2411_v47, %v6396_v31  ;;  %v4909_v28 = vld [vmem:[%s7092_s7 + $0x94] sm:$0xf]  ;;  %v4425_v31 = vld [vmem:[%s7092_s7 + $0x98] sm:$0xf0]  ;;  %3313 = vmatpush.bf16.msrb.mxu0 %v4584_v51  ;;  %3010 = vmatpush.bf16.msrb.mxu2 %v4424_v45  ;;  %v4908_v17 = vld [vmem:[%s7092_s7 + $0x84] sm:$0xf0] }
 0x387   : > { %v4428_v29 = vor.u32 %v4909_v28, %v4425_v31  ;;  %3342 = vmatpush.bf16.msrb.mxu1 %v4588_v34  ;;  %v4580_v55 = vor.u32 %v4927_v20, %v4577_v53  ;;  %v4416_v41 = vor.u32 %v4908_v17, %v4415_v9  ;;  %v4907_v52 = vld [vmem:[%s7092_s7 + $0x84] sm:$0xf]  ;;  %v4417_v47 = vld [vmem:[%s7092_s7 + $0x88] sm:$0xf0]  ;;  %v4926_v51 = vld [vmem:[%s7092_s7 + $0x114] sm:$0xf0] }
 0x388   : > { %2788 = vst [vmem:[#allocation5] sm:$0xff] %v2772_v33  ;;  %v2670_v58 = vadd.f32 %v6476_v46, %v2363_v7  ;;  %v2671_v21 = vadd.f32 %v6478_v15, %v2412_v16  ;;  %v4576_v15 = vor.u32 %v4928_v62, %v4575_v8  ;;  %v4420_v48 = vor.u32 %v4907_v52, %v4417_v47  ;;  %v4567_v16 = vld [vmem:[%s7092_s7 + $0x110] sm:$0xf]  ;;  %v4923_v62 = vld [vmem:[%s7092_s7 + $0x104] sm:$0xf] }
 0x389   : > { %3039 = vmatpush.bf16.msrb.mxu3 %v4428_v29  ;;  %v4568_v31 = vor.u32 %v4926_v51, %v4567_v16 }
 0x38a   : > { %v2705_v30 = vmul.f32 %v6539_v1, %v2670_v58  ;;  %v2741_v46 = vmul.f32 %v6539_v1, %v2671_v21  ;;  %3314 = vmatpush.bf16.msrb.mxu0 %v4576_v15  ;;  %3011 = vmatpush.bf16.msrb.mxu2 %v4416_v41  ;;  %v4569_v58 = vld [vmem:[%s7092_s7 + $0x118] sm:$0xf0] }
 0x38b   : > { %3343 = vmatpush.bf16.msrb.mxu1 %v4580_v55  ;;  %v4572_v21 = vor.u32 %v4925_v14, %v4569_v58 }
 0x38c   : > { %v2725_v13 = vadd.f32 %v6570_v5, %v2705_v30  ;;  %v2757_v22 = vadd.f32 %v6570_v5, %v2741_v46 }
 0x38d   : > { %v2365_v33 = vpop.f32.mrf.mxu2  ;;  %v2414_v7 = vpop.f32.mrf.mxu3  ;;  %3040 = vmatpush.bf16.msrb.mxu3 %v4420_v48 }
 0x38e   : > { %v2773_v34 = vmax.f32 %v2725_v13, %v2757_v22  ;;  %v2366_v45 = vadd.f32 %v2365_v33, %v6398_v26  ;;  %v2415_v28 = vadd.f32 %v2414_v7, %v6400_v37  ;;  %3315 = vmatpush.bf16.msrb.mxu0 %v4568_v31  ;;  %v4559_v26 = vld [vmem:[%s7092_s7 + $0x100] sm:$0xf]  ;;  %v4924_v37 = vld [vmem:[%s7092_s7 + $0x104] sm:$0xf0]  ;;  %v2591_v22 = vpop.f32.mrf.mxu0  ;;  %v2640_v48 = vpop.f32.mrf.mxu1 }
 0x38f   : > { %3344 = vmatpush.bf16.msrb.mxu1 %v4572_v21 }
 0x390   : > { %2789 = vst [vmem:[#allocation5 + $0x8] sm:$0xff] %v2773_v34  ;;  %v2672_v29 = vadd.f32 %v6517_v35, %v2366_v45  ;;  %v2673_v8 = vadd.f32 %v6519_v57, %v2415_v28  ;;  %v4560_v35 = vor.u32 %v4924_v37, %v4559_v26  ;;  %v4561_v57 = vld [vmem:[%s7092_s7 + $0x108] sm:$0xf0] }
 0x391   : > { %v4564_v46 = vor.u32 %v4923_v62, %v4561_v57 }
 0x392   : > { %v2706_v20 = vmul.f32 %v6539_v1, %v2672_v29  ;;  %v2742_v30 = vmul.f32 %v6539_v1, %v2673_v8  ;;  %3316 = vmatpush.bf16.msrb.mxu0 %v4560_v35 }
 0x393   : > { %3345 = vmatpush.bf16.msrb.mxu1 %v4564_v46 }
 0x394   : > { %v2726_v15 = vadd.f32 %v6570_v5, %v2706_v20  ;;  %v2758_v53 = vadd.f32 %v6570_v5, %v2742_v30 }
 0x395   : > { %v2367_v9 = vpop.f32.mrf.mxu2  ;;  %v2416_v17 = vpop.f32.mrf.mxu3 }
 0x396   : > { %v2774_v55 = vmax.f32 %v2726_v15, %v2758_v53  ;;  %v2368_v41 = vadd.f32 %v2367_v9, %v6402_v49  ;;  %v2417_v52 = vadd.f32 %v2416_v17, %v6404_v2  ;;  %v2594_v29 = vpop.f32.mrf.mxu0  ;;  %v2643_v8 = vpop.f32.mrf.mxu1 }
 0x397   : > { %v2804_v47 = vld [vmem:[#allocation5] ss:$2 sm:$0xff]  ;;  %v2819_v13 = vld [vmem:[#allocation5 + $0x1] ss:$2 sm:$0xff] }
 0x398   : > { %2790 = vst [vmem:[#allocation5 + $0x10] sm:$0xff] %v2774_v55  ;;  %v2674_v33 = vadd.f32 %v6599_v0, %v2368_v41  ;;  %v2675_v7 = vadd.f32 %v6601_v50, %v2417_v52  ;;  %v2827_v16 = vmax.f32 %v2804_v47, %v2819_v13 }
 0x39a   : > { %v2707_v51 = vmul.f32 %v6539_v1, %v2674_v33  ;;  %v2743_v14 = vmul.f32 %v6539_v1, %v2675_v7  ;;  %v2835_v34 = vmax.f32 %v2827_v16, 0.0 }
 0x39c   : > { %v2727_v49 = vadd.f32 %v6570_v5, %v2707_v51  ;;  %v2759_v2 = vadd.f32 %v6570_v5, %v2743_v14  ;;  %2859 = vst [vmem:[#allocation4 + $0x1] sm:$0xff] %v2835_v34 }
 0x39d   : > { %v2370_v45 = vpop.f32.mrf.mxu2  ;;  %v2419_v28 = vpop.f32.mrf.mxu3 }
 0x39e   : > { %v2775_v31 = vmax.f32 %v2727_v49, %v2759_v2  ;;  %v2371_v58 = vadd.f32 %v2370_v45, %v6406_v25  ;;  %v2420_v0 = vadd.f32 %v2419_v28, %v6408_v23  ;;  %v2596_v41 = vpop.f32.mrf.mxu0  ;;  %v2645_v52 = vpop.f32.mrf.mxu1 }
 0x3a0   : > { %2791 = vst [vmem:[#allocation5 + $0x18] sm:$0xff] %v2775_v31  ;;  %v2676_v50 = vadd.f32 %v2589_v44, %v2371_v58  ;;  %v2677_v21 = vadd.f32 %v2638_v39, %v2420_v0 }
 0x3a2   : > { %v2708_v26 = vmul.f32 %v6539_v1, %v2676_v50  ;;  %v2744_v37 = vmul.f32 %v6539_v1, %v2677_v21 }
 0x3a3   : > { %v3200_v2 = vld [vmem:[#allocation4 + $0x2] sm:$0xff] }
 0x3a4   : > { %v2728_v62 = vadd.f32 %v6570_v5, %v2708_v26  ;;  %v2760_v20 = vadd.f32 %v6570_v5, %v2744_v37 }
 0x3a5   : > { %v2372_v30 = vpop.f32.mrf.mxu2  ;;  %v2421_v35 = vpop.f32.mrf.mxu3 }
 0x3a6   : > { %v2776_v57 = vmax.f32 %v2728_v62, %v2760_v20  ;;  %v2373_v25 = vadd.f32 %v2372_v30, %v6410_v24  ;;  %v2422_v23 = vadd.f32 %v2421_v35, %v6412_v18  ;;  %v2599_v0 = vpop.f32.mrf.mxu0 }
 0x3a7   : > { %v2806_v46 = vld [vmem:[#allocation5 + $0x10] ss:$2 sm:$0xff]  ;;  %v2820_v44 = vld [vmem:[#allocation5 + $0x11] ss:$2 sm:$0xff] }
 0x3a8   : > { %2792 = vst [vmem:[#allocation5 + $0x20] sm:$0xff] %v2776_v57  ;;  %v2678_v39 = vadd.f32 %v2591_v22, %v2373_v25  ;;  %v2679_v15 = vadd.f32 %v2640_v48, %v2422_v23  ;;  %v2828_v53 = vmax.f32 %v2806_v46, %v2820_v44 }
 0x3aa   : > { %v2709_v9 = vmul.f32 %v6539_v1, %v2678_v39  ;;  %v2745_v17 = vmul.f32 %v6539_v1, %v2679_v15  ;;  %v2836_v55 = vmax.f32 %v2828_v53, 0.0 }
 0x3ac   : > { %v2729_v47 = vadd.f32 %v6570_v5, %v2709_v9  ;;  %v2761_v13 = vadd.f32 %v6570_v5, %v2745_v17  ;;  %2860 = vst [vmem:[#allocation4 + $0x11] sm:$0xff] %v2836_v55  ;;  %v2903_v24 = vpack.c.bf16 %v2836_v55, %v2835_v34 }
 0x3ad   : > { %v2375_v18 = vpop.f32.mrf.mxu2  ;;  %v2424_v33 = vpop.f32.mrf.mxu3 }
 0x3ae   : > { %v2777_v7 = vmax.f32 %v2729_v47, %v2761_v13  ;;  %v2376_v22 = vadd.f32 %v2375_v18, %v6414_v11  ;;  %v2425_v48 = vadd.f32 %v2424_v33, %v6416_v38  ;;  %3012 = vmatmul.bf16.vlgmr.msrb.gmra.mxu2 %v2903_v24  ;;  %3041 = vmatmul.bf16.vlgmr.msrb.gmra.mxu3 %v2903_v24  ;;  %v2648_v38 = vpop.f32.mrf.mxu1  ;;  %v2601_v15 = vpop.f32.mrf.mxu0 }
 0x3b0   : > { %2793 = vst [vmem:[#allocation5 + $0x28] sm:$0xff] %v2777_v7  ;;  %v2680_v16 = vadd.f32 %v2594_v29, %v2376_v22  ;;  %v2681_v51 = vadd.f32 %v2643_v8, %v2425_v48 }
 0x3b2   : > { %v2710_v14 = vmul.f32 %v6539_v1, %v2680_v16  ;;  %v2746_v49 = vmul.f32 %v6539_v1, %v2681_v51 }
 0x3b3   : > { %v3201_v45 = vld [vmem:[#allocation4 + $0x12] sm:$0xff] }
 0x3b4   : > { %v2730_v34 = vadd.f32 %v6570_v5, %v2710_v14  ;;  %v2762_v28 = vadd.f32 %v6570_v5, %v2746_v49  ;;  %v3208_v31 = vpack.c.bf16 %v3201_v45, %v3200_v2 }
 0x3b5   : > { %v2377_v58 = vpop.f32.mrf.mxu2  ;;  %v2426_v11 = vpop.f32.mrf.mxu3 }
 0x3b6   : > { %v2778_v50 = vmax.f32 %v2730_v34, %v2762_v28  ;;  %v2378_v21 = vadd.f32 %v2377_v58, %v6418_v63  ;;  %v2427_v29 = vadd.f32 %v2426_v11, %v6420_v56  ;;  %3317 = vmatmul.bf16.vlgmr.msrb.gmra.mxu0 %v3208_v31  ;;  %3346 = vmatmul.bf16.vlgmr.msrb.gmra.mxu1 %v3208_v31  ;;  %v2650_v53 = vpop.f32.mrf.mxu1  ;;  %v2604_v22 = vpop.f32.mrf.mxu0 }
 0x3b7   : > { %v2808_v8 = vld [vmem:[#allocation5 + $0x20] ss:$2 sm:$0xff]  ;;  %v2821_v26 = vld [vmem:[#allocation5 + $0x21] ss:$2 sm:$0xff] }
 0x3b8   : > { %2794 = vst [vmem:[#allocation5 + $0x30] sm:$0xff] %v2778_v50  ;;  %v2682_v37 = vadd.f32 %v2596_v41, %v2378_v21  ;;  %v2683_v62 = vadd.f32 %v2645_v52, %v2427_v29  ;;  %v2829_v20 = vmax.f32 %v2808_v8, %v2821_v26  ;;  %v4535_v21 = vld [vmem:[%s7092_s7 + $0x70] sm:$0xf]  ;;  %v4906_v29 = vld [vmem:[%s7092_s7 + $0x74] sm:$0xf0] }
 0x3b9   : > { %v4536_v8 = vor.u32 %v4906_v29, %v4535_v21  ;;  %v4513_v21 = vld [vmem:[%s7092_s7 + $0x48] sm:$0xf0] }
 0x3ba   : > { %v2711_v30 = vmul.f32 %v6539_v1, %v2682_v37  ;;  %v2747_v35 = vmul.f32 %v6539_v1, %v2683_v62  ;;  %v2837_v57 = vmax.f32 %v2829_v20, 0.0 }
 0x3bb   : > { %3142 = vmatpush.bf16.msra.mxu2 %v4536_v8  ;;  %v4503_v8 = vld [vmem:[%s7092_s7 + $0x30] sm:$0xf] }
 0x3bc   : > { %v2731_v25 = vadd.f32 %v6570_v5, %v2711_v30  ;;  %v2763_v23 = vadd.f32 %v6570_v5, %v2747_v35  ;;  %2861 = vst [vmem:[#allocation4 + $0x21] sm:$0xff] %v2837_v57 }
 0x3bd   : > { %v2380_v63 = vpop.f32.mrf.mxu2  ;;  %v2429_v56 = vpop.f32.mrf.mxu3 }
 0x3be   : > { %v2779_v46 = vmax.f32 %v2731_v25, %v2763_v23  ;;  %v2381_v44 = vadd.f32 %v2380_v63, %v6422_v27  ;;  %v2430_v39 = vadd.f32 %v2429_v56, %v6424_v32  ;;  %v2653_v48 = vpop.f32.mrf.mxu1  ;;  %v2606_v26 = vpop.f32.mrf.mxu0 }
 0x3c0   : > { %2795 = vst [vmem:[#allocation5 + $0x38] sm:$0xff] %v2779_v46  ;;  %v2684_v9 = vadd.f32 %v2599_v0, %v2381_v44  ;;  %v2685_v17 = vadd.f32 %v2648_v38, %v2430_v39 }
 0x3c2   : > { %v2712_v55 = vmul.f32 %v6539_v1, %v2684_v9  ;;  %v2748_v41 = vmul.f32 %v6539_v1, %v2685_v17 }
 0x3c3   : > { %v3202_v35 = vld [vmem:[#allocation4 + $0x22] sm:$0xff] }
 0x3c4   : > { %v2732_v52 = vadd.f32 %v6570_v5, %v2712_v55  ;;  %v2764_v47 = vadd.f32 %v6570_v5, %v2748_v41  ;;  %v4527_v41 = vld [vmem:[%s7092_s7 + $0x60] sm:$0xf] }
 0x3c5   : > { %v2382_v13 = vpop.f32.mrf.mxu2  ;;  %v2431_v24 = vpop.f32.mrf.mxu3 }
 0x3c6   : > { %v2780_v18 = vmax.f32 %v2732_v52, %v2764_v47  ;;  %v2383_v27 = vadd.f32 %v2382_v13, %v6438_v3  ;;  %v2432_v32 = vadd.f32 %v2431_v24, %v6440_v4  ;;  %v2655_v37 = vpop.f32.mrf.mxu1  ;;  %v4904_v52 = vld [vmem:[%s7092_s7 + $0x64] sm:$0xf0]  ;;  %v2609_v24 = vpop.f32.mrf.mxu0 }
 0x3c7   : > { %v2810_v33 = vld [vmem:[#allocation5 + $0x30] ss:$2 sm:$0xff]  ;;  %v2822_v7 = vld [vmem:[#allocation5 + $0x31] ss:$2 sm:$0xff]  ;;  %v4528_v13 = vor.u32 %v4904_v52, %v4527_v41 }
 0x3c8   : > { %2796 = vst [vmem:[#allocation5 + $0x40] sm:$0xff] %v2780_v18  ;;  %v2686_v16 = vadd.f32 %v2601_v15, %v2383_v27  ;;  %v2687_v51 = vadd.f32 %v2650_v53, %v2432_v32  ;;  %v2830_v14 = vmax.f32 %v2810_v33, %v2822_v7 }
 0x3c9   : > { %3143 = vmatpush.bf16.msra.mxu2 %v4528_v13 }
 0x3ca   : > { %v2713_v49 = vmul.f32 %v6539_v1, %v2686_v16  ;;  %v2749_v2 = vmul.f32 %v6539_v1, %v2687_v51  ;;  %v2838_v45 = vmax.f32 %v2830_v14, 0.0 }
 0x3cc   : > { %v2733_v34 = vadd.f32 %v6570_v5, %v2713_v49  ;;  %v2765_v28 = vadd.f32 %v6570_v5, %v2749_v2  ;;  %2862 = vst [vmem:[#allocation4 + $0x31] sm:$0xff] %v2838_v45  ;;  %v2904_v3 = vpack.c.bf16 %v2838_v45, %v2837_v57 }
 0x3cd   : > { %v2385_v4 = vpop.f32.mrf.mxu2  ;;  %v2434_v31 = vpop.f32.mrf.mxu3 }
 0x3ce   : > { %v2781_v58 = vmax.f32 %v2733_v34, %v2765_v28  ;;  %v2386_v11 = vadd.f32 %v2385_v4, %v6442_v36  ;;  %v2435_v0 = vadd.f32 %v2434_v31, %v6444_v40  ;;  %3017 = vmatmul.bf16.gmra.mxu2 %v2904_v3  ;;  %3046 = vmatmul.bf16.gmra.mxu3 %v2904_v3  ;;  %v4905_v36 = vld [vmem:[%s7092_s7 + $0x74] sm:$0xf]  ;;  %v4537_v40 = vld [vmem:[%s7092_s7 + $0x78] sm:$0xf0]  ;;  %v2658_v18 = vpop.f32.mrf.mxu1  ;;  %v4519_v28 = vld [vmem:[%s7092_s7 + $0x50] sm:$0xf] }
 0x3cf   : > { %v4540_v30 = vor.u32 %v4905_v36, %v4537_v40  ;;  %v4902_v3 = vld [vmem:[%s7092_s7 + $0x54] sm:$0xf0]  ;;  %v4901_v31 = vld [vmem:[%s7092_s7 + $0x54] sm:$0xf]  ;;  %v2611_v36 = vpop.f32.mrf.mxu0 }
 0x3d0   : > { %2797 = vst [vmem:[#allocation5 + $0x48] sm:$0xff] %v2781_v58  ;;  %v2688_v38 = vadd.f32 %v2604_v22, %v2386_v11  ;;  %v2689_v50 = vadd.f32 %v2653_v48, %v2435_v0  ;;  %v4520_v4 = vor.u32 %v4902_v3, %v4519_v28 }
 0x3d1   : > { %3171 = vmatpush.bf16.msra.mxu3 %v4540_v30  ;;  %v4897_v30 = vld [vmem:[%s7092_s7 + $0x34] sm:$0xf] }
 0x3d2   : > { %v2714_v62 = vmul.f32 %v6539_v1, %v2688_v38  ;;  %v2750_v20 = vmul.f32 %v6539_v1, %v2689_v50  ;;  %v4900_v38 = vld [vmem:[%s7092_s7 + $0x44] sm:$0xf0]  ;;  %v4899_v50 = vld [vmem:[%s7092_s7 + $0x44] sm:$0xf]  ;;  %3144 = vmatpush.bf16.msra.mxu2 %v4520_v4 }
 0x3d3   : > { %v3203_v57 = vld [vmem:[#allocation4 + $0x32] sm:$0xff] }
 0x3d4   : > { %v2734_v25 = vadd.f32 %v6570_v5, %v2714_v62  ;;  %v2766_v23 = vadd.f32 %v6570_v5, %v2750_v20  ;;  %v3209_v63 = vpack.c.bf16 %v3203_v57, %v3202_v35  ;;  %v4516_v62 = vor.u32 %v4899_v50, %v4513_v21  ;;  %v4898_v20 = vld [vmem:[%s7092_s7 + $0x34] sm:$0xf0]  ;;  %v4505_v35 = vld [vmem:[%s7092_s7 + $0x38] sm:$0xf0] }
 0x3d5   : > { %v2387_v56 = vpop.f32.mrf.mxu2  ;;  %v2436_v46 = vpop.f32.mrf.mxu3 }
 0x3d6   : > { %v2782_v44 = vmax.f32 %v2734_v25, %v2766_v23  ;;  %v2388_v39 = vadd.f32 %v2387_v56, %v6446_v54  ;;  %v2437_v15 = vadd.f32 %v2436_v46, %v6448_v19  ;;  %3322 = vmatmul.bf16.gmra.mxu0 %v3209_v63  ;;  %3351 = vmatmul.bf16.gmra.mxu1 %v3209_v63  ;;  %v4903_v54 = vld [vmem:[%s7092_s7 + $0x64] sm:$0xf]  ;;  %v4529_v19 = vld [vmem:[%s7092_s7 + $0x68] sm:$0xf0]  ;;  %v2660_v40 = vpop.f32.mrf.mxu1  ;;  %v4495_v46 = vld [vmem:[%s7092_s7 + $0x20] sm:$0xf] }
 0x3d7   : > { %v2812_v53 = vld [vmem:[#allocation5 + $0x40] ss:$2 sm:$0xff]  ;;  %v2823_v9 = vld [vmem:[#allocation5 + $0x41] ss:$2 sm:$0xff]  ;;  %v4532_v33 = vor.u32 %v4903_v54, %v4529_v19 }
 0x3d8   : > { %2798 = vst [vmem:[#allocation5 + $0x50] sm:$0xff] %v2782_v44  ;;  %v2690_v17 = vadd.f32 %v2606_v26, %v2388_v39  ;;  %v2691_v55 = vadd.f32 %v2655_v37, %v2437_v15  ;;  %v2831_v47 = vmax.f32 %v2812_v53, %v2823_v9  ;;  %v4504_v15 = vor.u32 %v4898_v20, %v4503_v8  ;;  %v4896_v9 = vld [vmem:[%s7092_s7 + $0x24] sm:$0xf0]  ;;  %v4479_v8 = vld [vmem:[%s7092_s7] sm:$0xf] }
 0x3d9   : > { %3172 = vmatpush.bf16.msra.mxu3 %v4532_v33  ;;  %v4508_v53 = vor.u32 %v4897_v30, %v4505_v35  ;;  %v4496_v54 = vor.u32 %v4896_v9, %v4495_v46 }
 0x3da   : > { %v2715_v27 = vmul.f32 %v6539_v1, %v2690_v17  ;;  %v2751_v32 = vmul.f32 %v6539_v1, %v2691_v55  ;;  %v6771_v7 = vmax.f32 %v2831_v47, 0.0 }
 0x3dc   : > { %v2735_v22 = vadd.f32 %v6570_v5, %v2715_v27  ;;  %v2767_v48 = vadd.f32 %v6570_v5, %v2751_v32  ;;  %2863 = vst [vmem:[#allocation4 + $0x41] sm:$0xff] %v6771_v7 }
 0x3dd   : > { %v2390_v16 = vpop.f32.mrf.mxu2  ;;  %v2439_v51 = vpop.f32.mrf.mxu3 }
 0x3de   : > { %v2783_v14 = vmax.f32 %v2735_v22, %v2767_v48  ;;  %v2391_v49 = vadd.f32 %v2390_v16, %v6462_v12  ;;  %v2440_v2 = vadd.f32 %v2439_v51, %v6464_v60  ;;  %v4521_v12 = vld [vmem:[%s7092_s7 + $0x58] sm:$0xf0]  ;;  %v4511_v60 = vld [vmem:[%s7092_s7 + $0x40] sm:$0xf] }
 0x3df   : > { %v4524_v0 = vor.u32 %v4901_v31, %v4521_v12  ;;  %v4512_v29 = vor.u32 %v4900_v38, %v4511_v60 }
 0x3e0   : > { %2799 = vst [vmem:[#allocation5 + $0x58] sm:$0xff] %v2783_v14  ;;  %v2692_v45 = vadd.f32 %v2609_v24, %v2391_v49  ;;  %v2693_v34 = vadd.f32 %v2658_v18, %v2440_v2  ;;  %v2614_v24 = vpop.f32.mrf.mxu0  ;;  %v2663_v18 = vpop.f32.mrf.mxu1  ;;  %v4487_v49 = vld [vmem:[%s7092_s7 + $0x10] sm:$0xf]  ;;  %v4894_v2 = vld [vmem:[%s7092_s7 + $0x14] sm:$0xf0] }
 0x3e1   : > { %3173 = vmatpush.bf16.msra.mxu3 %v4524_v0  ;;  %3145 = vmatpush.bf16.msra.mxu2 %v4512_v29 }
 0x3e2   : > { %v2716_v58 = vmul.f32 %v6539_v1, %v2692_v45  ;;  %v2752_v11 = vmul.f32 %v6539_v1, %v2693_v34  ;;  %v4488_v45 = vor.u32 %v4894_v2, %v4487_v49 }
 0x3e3   : > { %v3204_v31 = vld [vmem:[#allocation4 + $0x42] sm:$0xff] }
 0x3e4   : > { %v2736_v26 = vadd.f32 %v6570_v5, %v2716_v58  ;;  %v2768_v37 = vadd.f32 %v6570_v5, %v2752_v11 }
 0x3e5   : > { %v2392_v57 = vpop.f32.mrf.mxu2  ;;  %v2441_v25 = vpop.f32.mrf.mxu3  ;;  %3174 = vmatpush.bf16.msra.mxu3 %v4516_v62  ;;  %3146 = vmatpush.bf16.msra.mxu2 %v4504_v15 }
 0x3e6   : > { %v2784_v23 = vmax.f32 %v2736_v26, %v2768_v37  ;;  %v2393_v63 = vadd.f32 %v2392_v57, %v6466_v61  ;;  %v2442_v56 = vadd.f32 %v2441_v25, %v6468_v6  ;;  %v4895_v61 = vld [vmem:[%s7092_s7 + $0x24] sm:$0xf]  ;;  %v4497_v6 = vld [vmem:[%s7092_s7 + $0x28] sm:$0xf0] }
 0x3e7   : > { %v2814_v44 = vld [vmem:[#allocation5 + $0x50] ss:$2 sm:$0xff]  ;;  %v2824_v39 = vld [vmem:[#allocation5 + $0x51] ss:$2 sm:$0xff]  ;;  %v4500_v19 = vor.u32 %v4895_v61, %v4497_v6 }
 0x3e8   : > { %2800 = vst [vmem:[#allocation5 + $0x60] sm:$0xff] %v2784_v23  ;;  %v2694_v17 = vadd.f32 %v2611_v36, %v2393_v63  ;;  %v2695_v55 = vadd.f32 %v2660_v40, %v2442_v56  ;;  %v2832_v41 = vmax.f32 %v2814_v44, %v2824_v39  ;;  %v4892_v36 = vld [vmem:[%s7092_s7 + $0x4] sm:$0xf0]  ;;  %v4891_v40 = vld [vmem:[%s7092_s7 + $0x4] sm:$0xf]  ;;  %v2616_v26 = vpop.f32.mrf.mxu0  ;;  %v2665_v37 = vpop.f32.mrf.mxu1  ;;  %v2868_v6 = vld [vmem:[#allocation4 + $0x10] sm:$0xff] }
 0x3e9   : > { %3175 = vmatpush.bf16.msra.mxu3 %v4508_v53  ;;  %3147 = vmatpush.bf16.msra.mxu2 %v4496_v54  ;;  %v4480_v20 = vor.u32 %v4892_v36, %v4479_v8  ;;  %v6901_v36 = vld [vmem:[%s7094_s9] ss:$0 sm:$0xff] }
 0x3ea   : > { %v2717_v52 = vmul.f32 %v6539_v1, %v2694_v17  ;;  %v2753_v47 = vmul.f32 %v6539_v1, %v2695_v55  ;;  %v2840_v13 = vmax.f32 %v2832_v41, 0.0 }
 0x3ec   : > { %v2737_v27 = vadd.f32 %v6570_v5, %v2717_v52  ;;  %v2769_v32 = vadd.f32 %v6570_v5, %v2753_v47  ;;  %2864 = vst [vmem:[#allocation4 + $0x51] sm:$0xff] %v2840_v13  ;;  %v2905_v33 = vpack.c.bf16 %v2840_v13, %v6771_v7  ;;  %v4893_v7 = vld [vmem:[%s7092_s7 + $0x14] sm:$0xf]  ;;  %v2867_v52 = vld [vmem:[#allocation4] sm:$0xff] }
 0x3ed   : > { %v2395_v22 = vpop.f32.mrf.mxu2  ;;  %v2444_v48 = vpop.f32.mrf.mxu3  ;;  %3176 = vmatpush.bf16.msra.mxu3 %v4500_v19  ;;  %3148 = vmatpush.bf16.msra.mxu2 %v4488_v45  ;;  %v2875_v47 = vpack.c.bf16 %v2868_v6, %v2867_v52  ;;  %v2869_v13 = vld [vmem:[#allocation4 + $0x20] sm:$0xff] }
 0x3ee   : > { %v2785_v16 = vmax.f32 %v2737_v27, %v2769_v32  ;;  %v2396_v51 = vadd.f32 %v2395_v22, %v6472_v10  ;;  %v2445_v14 = vadd.f32 %v2444_v48, %v6474_v43  ;;  %3022 = vmatmul.bf16.gmra.mxu2 %v2905_v33  ;;  %3051 = vmatmul.bf16.gmra.mxu3 %v2905_v33  ;;  %v4489_v10 = vld [vmem:[%s7092_s7 + $0x18] sm:$0xf0] }
 0x3ef   : > { %v4492_v28 = vor.u32 %v4893_v7, %v4489_v10 }
 0x3f0   : > { %2801 = vst [vmem:[#allocation5 + $0x68] sm:$0xff] %v2785_v16  ;;  %v2696_v43 = vadd.f32 %v2614_v24, %v2396_v51  ;;  %v2697_v34 = vadd.f32 %v2663_v18, %v2445_v14  ;;  %v2871_v24 = vld [vmem:[#allocation4 + $0x40] sm:$0xff] }
 0x3f1   : > { %3177 = vmatpush.bf16.msra.mxu3 %v4492_v28  ;;  %3149 = vmatpush.bf16.msra.mxu2 %v4480_v20 }
 0x3f2   : > { %v2718_v3 = vmul.f32 %v6539_v1, %v2696_v43  ;;  %v2754_v4 = vmul.f32 %v6539_v1, %v2697_v34 }
 0x3f3   : > { %v3205_v12 = vld [vmem:[#allocation4 + $0x52] sm:$0xff] }
 0x3f4   : > { %v2738_v60 = vadd.f32 %v6570_v5, %v2718_v3  ;;  %v2770_v58 = vadd.f32 %v6570_v5, %v2754_v4  ;;  %v3210_v11 = vpack.c.bf16 %v3205_v12, %v3204_v31  ;;  %v2872_v19 = vld [vmem:[#allocation4 + $0x50] sm:$0xff] }
 0x3f5   : > { %v2397_v0 = vpop.f32.mrf.mxu2  ;;  %v2446_v38 = vpop.f32.mrf.mxu3  ;;  %v2877_v18 = vpack.c.bf16 %v2872_v19, %v2871_v24 }
 0x3f6   : > { %v2786_v50 = vmax.f32 %v2738_v60, %v2770_v58  ;;  %v2398_v21 = vadd.f32 %v2397_v0, %v6492_v59  ;;  %v2447_v29 = vadd.f32 %v2446_v38, %v6494_v42  ;;  %3327 = vmatmul.bf16.gmra.mxu0 %v3210_v11  ;;  %3356 = vmatmul.bf16.gmra.mxu1 %v3210_v11  ;;  %v4481_v42 = vld [vmem:[%s7092_s7 + $0x8] sm:$0xf0]  ;;  %v6896_v38 = vld [vmem:[%s7093_s8] ss:$0 sm:$0xff] }
 0x3f7   : > { %v2816_v62 = vld [vmem:[#allocation5 + $0x60] ss:$2 sm:$0xff]  ;;  %v2825_v59 = vld [vmem:[#allocation5 + $0x61] ss:$2 sm:$0xff]  ;;  %v4484_v25 = vor.u32 %v4891_v40, %v4481_v42 }
 0x3f8   : > { %2802 = vst [vmem:[#allocation5 + $0x70] sm:$0xff] %v2786_v50  ;;  %v2698_v30 = vadd.f32 %v2616_v26, %v2398_v21  ;;  %v2699_v35 = vadd.f32 %v2665_v37, %v2447_v29  ;;  %v2833_v57 = vmax.f32 %v2816_v62, %v2825_v59  ;;  %v4954_v26 = vld [vmem:[%s7095_s10 + $0x78] sm:$0xff] }
 0x3f9   : > { %3178 = vmatpush.bf16.msra.mxu3 %v4484_v25  ;;  %v4946_v37 = vld [vmem:[%s7095_s10 + $0x38] sm:$0xff]  ;;  %3545 = vmatpush.bf16.msrb.mxu2 %v4954_v26 }
 0x3fa   : > { %v2719_v23 = vmul.f32 %v6539_v1, %v2698_v30  ;;  %v2755_v63 = vmul.f32 %v6539_v1, %v2699_v35  ;;  %v2841_v56 = vmax.f32 %v2833_v57, 0.0 }
 0x3fc   : > { %v2739_v46 = vadd.f32 %v6570_v5, %v2719_v23  ;;  %v2771_v44 = vadd.f32 %v6570_v5, %v2755_v63  ;;  %2865 = vst [vmem:[#allocation4 + $0x61] sm:$0xff] %v2841_v56  ;;  %v2870_v5 = vld [vmem:[#allocation4 + $0x30] sm:$0xff] }
 0x3fd   : > { %v2876_v54 = vpack.c.bf16 %v2870_v5, %v2869_v13  ;;  %3606 = vmatpush.bf16.msrb.mxu3 %v4946_v37  ;;  %v4952_v13 = vld [vmem:[%s7095_s10 + $0x68] sm:$0xff] }
 0x3fe   : > { %v2787_v39 = vmax.f32 %v2739_v46, %v2771_v44 }
 0x400   : > { %2803 = vst [vmem:[#allocation5 + $0x78] sm:$0xff] %v2787_v39  ;;  %v4953_v39 = vld [vmem:[%s7095_s10 + $0x70] sm:$0xff] }
 0x401   : > { %3546 = vmatpush.bf16.msrb.mxu2 %v4953_v39 }
 0x403   : > { %v3206_v41 = vld [vmem:[#allocation4 + $0x62] sm:$0xff] }
 0x404   : > { %v2873_v32 = vld [vmem:[#allocation4 + $0x60] sm:$0xff] }
 0x405   : > { %3547 = vmatpush.bf16.msrb.mxu2 %v4952_v13 }
 0x407   : > { %v2818_v15 = vld [vmem:[#allocation5 + $0x70] ss:$2 sm:$0xff]  ;;  %v2826_v53 = vld [vmem:[#allocation5 + $0x71] ss:$2 sm:$0xff] }
 0x408   : > { %v2834_v9 = vmax.f32 %v2818_v15, %v2826_v53  ;;  %v4945_v15 = vld [vmem:[%s7095_s10 + $0x30] sm:$0xff] }
 0x409   : > { %3607 = vmatpush.bf16.msrb.mxu3 %v4945_v15 }
 0x40a   : > { %v2842_v17 = vmax.f32 %v2834_v9, 0.0 }
 0x40c   : > { %2866 = vst [vmem:[#allocation4 + $0x71] sm:$0xff] %v2842_v17  ;;  %v2906_v55 = vpack.c.bf16 %v2842_v17, %v2841_v56 }
 0x40e   : > { %3027 = vmatmul.bf16.gmra.mxu2 %v2906_v55  ;;  %3056 = vmatmul.bf16.gmra.mxu3 %v2906_v55 }
 0x413   : > { %v3207_v61 = vld [vmem:[#allocation4 + $0x72] sm:$0xff] }
 0x414   : > { %v3211_v1 = vpack.c.bf16 %v3207_v61, %v3206_v41  ;;  %v2874_v27 = vld [vmem:[#allocation4 + $0x70] sm:$0xff] }
 0x415   : > { %v2878_v33 = vpack.c.bf16 %v2874_v27, %v2873_v32 }
 0x416   : > { %3332 = vmatmul.bf16.gmra.mxu0 %v3211_v1  ;;  %3361 = vmatmul.bf16.gmra.mxu1 %v3211_v1 }
 0x41e   : > { %3150 = vmatmul.bf16.vlgmr.msra.gmra.mxu2 %v2875_v47  ;;  %3179 = vmatmul.bf16.vlgmr.msra.gmra.mxu3 %v2875_v47 }
 0x42e   : > { %3155 = vmatmul.bf16.gmra.mxu2 %v2876_v54  ;;  %3184 = vmatmul.bf16.gmra.mxu3 %v2876_v54  ;;  %v4944_v54 = vld [vmem:[%s7095_s10 + $0x28] sm:$0xff] }
 0x42f   : > { %3608 = vmatpush.bf16.msrb.mxu3 %v4944_v54 }
 0x431   : > { %v3013_v22 = vpop.f32.mrf.mxu2  ;;  %v3042_v48 = vpop.f32.mrf.mxu3 }
 0x433   : > { %v3318_v12 = vpop.f32.mrf.mxu0  ;;  %v3347_v60 = vpop.f32.mrf.mxu1 }
 0x439   : > { %v3015_v16 = vpop.f32.mrf.mxu2  ;;  %v3044_v51 = vpop.f32.mrf.mxu3 }
 0x43b   : > { %v3320_v21 = vpop.f32.mrf.mxu0  ;;  %v3349_v29 = vpop.f32.mrf.mxu1 }
 0x43e   : > { %3160 = vmatmul.bf16.gmra.mxu2 %v2877_v18  ;;  %3189 = vmatmul.bf16.gmra.mxu3 %v2877_v18 }
 0x44e   : > { %3165 = vmatmul.bf16.gmra.mxu2 %v2878_v33  ;;  %3194 = vmatmul.bf16.gmra.mxu3 %v2878_v33 }
 0x451   : > { %v3018_v14 = vpop.f32.mrf.mxu2  ;;  %v3047_v49 = vpop.f32.mrf.mxu3 }
 0x453   : > { %v3323_v63 = vpop.f32.mrf.mxu0  ;;  %v3352_v56 = vpop.f32.mrf.mxu1 }
 0x459   : > { %v6873_v2 = vpop.f32.mrf.mxu2  ;;  %v6875_v7 = vpop.f32.mrf.mxu3 }
 0x45b   : > { %v3325_v19 = vpop.f32.mrf.mxu0  ;;  %v3354_v24 = vpop.f32.mrf.mxu1 }
 0x471   : > { %v6877_v45 = vpop.f32.mrf.mxu2  ;;  %v6879_v10 = vpop.f32.mrf.mxu3 }
 0x479   : > { %v6881_v43 = vpop.f32.mrf.mxu2  ;;  %v6883_v34 = vpop.f32.mrf.mxu3 }
 0x491   : > { %v6885_v28 = vpop.f32.mrf.mxu2  ;;  %v6887_v3 = vpop.f32.mrf.mxu3 }
 0x499   : > { %v6889_v4 = vpop.f32.mrf.mxu2  ;;  %v6891_v31 = vpop.f32.mrf.mxu3 }
 0x4a1   : > { %v3151_v58 = vpop.f32.mrf.mxu2  ;;  %v3180_v11 = vpop.f32.mrf.mxu3 }
 0x4a2   : > { %v3152_v0 = vadd.f32 %v3151_v58, %v3013_v22  ;;  %v3181_v50 = vadd.f32 %v3180_v11, %v3042_v48 }
 0x4a4   : > { %v3367_v8 = vadd.f32 %v3318_v12, %v3152_v0  ;;  %v3368_v40 = vadd.f32 %v3347_v60, %v3181_v50  ;;  %v4943_v12 = vld [vmem:[%s7095_s10 + $0x20] sm:$0xff] }
 0x4a5   : > { %3609 = vmatpush.bf16.msrb.mxu3 %v4943_v12 }
 0x4a6   : > { %v3387_v62 = vmul.f32 %v6896_v38, %v3367_v8  ;;  %v3407_v59 = vmul.f32 %v6896_v38, %v3368_v40  ;;  %v4950_v8 = vld [vmem:[%s7095_s10 + $0x58] sm:$0xff] }
 0x4a7   : > { %v4942_v40 = vld [vmem:[%s7095_s10 + $0x18] sm:$0xff] }
 0x4a8   : > { %v3399_v20 = vadd.f32 %v6901_v36, %v3387_v62  ;;  %v3415_v42 = vadd.f32 %v6901_v36, %v3407_v59 }
 0x4a9   : > { %v3153_v30 = vpop.f32.mrf.mxu2  ;;  %v3182_v35 = vpop.f32.mrf.mxu3  ;;  %3610 = vmatpush.bf16.msrb.mxu3 %v4942_v40 }
 0x4aa   : > { %v3423_v57 = vmax.f32 %v3399_v20, %v3415_v42  ;;  %v3154_v25 = vadd.f32 %v3153_v30, %v3015_v16  ;;  %v3183_v23 = vadd.f32 %v3182_v35, %v3044_v51 }
 0x4ac   : > { %3431 = vst [vmem:[#allocation5] sm:$0xff] %v3423_v57  ;;  %v3369_v46 = vadd.f32 %v3320_v21, %v3154_v25  ;;  %v3370_v44 = vadd.f32 %v3349_v29, %v3183_v23  ;;  %v3328_v21 = vpop.f32.mrf.mxu0  ;;  %v4949_v57 = vld [vmem:[%s7095_s10 + $0x50] sm:$0xff] }
 0x4ad   : > { %v4941_v25 = vld [vmem:[%s7095_s10 + $0x10] sm:$0xff] }
 0x4ae   : > { %v3388_v53 = vmul.f32 %v6896_v38, %v3369_v46  ;;  %v3408_v9 = vmul.f32 %v6896_v38, %v3370_v44  ;;  %3611 = vmatpush.bf16.msrb.mxu3 %v4941_v25 }
 0x4b0   : > { %v3400_v17 = vadd.f32 %v6901_v36, %v3388_v53  ;;  %v3416_v55 = vadd.f32 %v6901_v36, %v3408_v9 }
 0x4b1   : > { %v3156_v41 = vpop.f32.mrf.mxu2  ;;  %v3185_v61 = vpop.f32.mrf.mxu3 }
 0x4b2   : > { %v3424_v1 = vmax.f32 %v3400_v17, %v3416_v55  ;;  %v3157_v6 = vadd.f32 %v3156_v41, %v3018_v14  ;;  %v3186_v52 = vadd.f32 %v3185_v61, %v3047_v49  ;;  %v4951_v49 = vld [vmem:[%s7095_s10 + $0x60] sm:$0xff] }
 0x4b3   : > { %3548 = vmatpush.bf16.msrb.mxu2 %v4951_v49  ;;  %v4947_v55 = vld [vmem:[%s7095_s10 + $0x40] sm:$0xff] }
 0x4b4   : > { %3432 = vst [vmem:[#allocation5 + $0x8] sm:$0xff] %v3424_v1  ;;  %v3371_v47 = vadd.f32 %v3323_v63, %v3157_v6  ;;  %v3372_v5 = vadd.f32 %v3352_v56, %v3186_v52  ;;  %v4948_v56 = vld [vmem:[%s7095_s10 + $0x48] sm:$0xff]  ;;  %v3330_v44 = vpop.f32.mrf.mxu0  ;;  %v4939_v41 = vld [vmem:[%s7095_s10] sm:$0xff]  ;;  %v4962_v52 = vld [vmem:[%s7095_s10 + $0xb8] sm:$0xff] }
 0x4b6   : > { %v3389_v18 = vmul.f32 %v6896_v38, %v3371_v47  ;;  %v3409_v27 = vmul.f32 %v6896_v38, %v3372_v5  ;;  %v4970_v47 = vld [vmem:[%s7095_s10 + $0xf8] sm:$0xff] }
 0x4b7   : > { %3549 = vmatpush.bf16.msrb.mxu2 %v4950_v8 }
 0x4b8   : > { %v3401_v32 = vadd.f32 %v6901_v36, %v3389_v18  ;;  %v3417_v33 = vadd.f32 %v6901_v36, %v3409_v27  ;;  %v4961_v18 = vld [vmem:[%s7095_s10 + $0xb0] sm:$0xff] }
 0x4b9   : > { %v3158_v22 = vpop.f32.mrf.mxu2  ;;  %v3187_v48 = vpop.f32.mrf.mxu3  ;;  %v4969_v27 = vld [vmem:[%s7095_s10 + $0xf0] sm:$0xff] }
 0x4ba   : > { %v3425_v16 = vmax.f32 %v3401_v32, %v3417_v33  ;;  %v3159_v51 = vadd.f32 %v3158_v22, %v6873_v2  ;;  %v3188_v14 = vadd.f32 %v3187_v48, %v6875_v7  ;;  %v3357_v2 = vpop.f32.mrf.mxu1 }
 0x4bb   : > { %v3439_v60 = vld [vmem:[#allocation5] ss:$2 sm:$0xff]  ;;  %v3443_v0 = vld [vmem:[#allocation5 + $0x1] ss:$2 sm:$0xff]  ;;  %3550 = vmatpush.bf16.msrb.mxu2 %v4949_v57 }
 0x4bc   : > { %3433 = vst [vmem:[#allocation5 + $0x10] sm:$0xff] %v3425_v16  ;;  %v3373_v58 = vadd.f32 %v3325_v19, %v3159_v51  ;;  %v3374_v11 = vadd.f32 %v3354_v24, %v3188_v14  ;;  %v3447_v50 = vmax.f32 %v3439_v60, %v3443_v0  ;;  %v3333_v33 = vpop.f32.mrf.mxu0 }
 0x4be   : > { %v3390_v7 = vmul.f32 %v6896_v38, %v3373_v58  ;;  %v3410_v29 = vmul.f32 %v6896_v38, %v3374_v11  ;;  %v3451_v26 = vmax.f32 %v3447_v50, 0.0  ;;  %v4960_v58 = vld [vmem:[%s7095_s10 + $0xa8] sm:$0xff] }
 0x4bf   : > { %3551 = vmatpush.bf16.msrb.mxu2 %v4948_v56  ;;  %v4968_v11 = vld [vmem:[%s7095_s10 + $0xe8] sm:$0xff] }
 0x4c0   : > { %v3402_v37 = vadd.f32 %v6901_v36, %v3390_v7  ;;  %v3418_v62 = vadd.f32 %v6901_v36, %v3410_v29  ;;  %3455 = vst [vmem:[#allocation6] sm:$0xff] %v3451_v26 }
 0x4c1   : > { %v3161_v59 = vpop.f32.mrf.mxu2  ;;  %v3190_v20 = vpop.f32.mrf.mxu3 }
 0x4c2   : > { %v3426_v42 = vmax.f32 %v3402_v37, %v3418_v62  ;;  %v3162_v30 = vadd.f32 %v3161_v59, %v6877_v45  ;;  %v3191_v35 = vadd.f32 %v3190_v20, %v6879_v10  ;;  %v4940_v45 = vld [vmem:[%s7095_s10 + $0x8] sm:$0xff]  ;;  %v3359_v39 = vpop.f32.mrf.mxu1  ;;  %v4958_v59 = vld [vmem:[%s7095_s10 + $0x98] sm:$0xff] }
 0x4c3   : > { %3612 = vmatpush.bf16.msrb.mxu3 %v4940_v45  ;;  %3552 = vmatpush.bf16.msrb.mxu2 %v4947_v55  ;;  %v4966_v20 = vld [vmem:[%s7095_s10 + $0xd8] sm:$0xff]  ;;  %v4957_v45 = vld [vmem:[%s7095_s10 + $0x90] sm:$0xff] }
 0x4c4   : > { %3434 = vst [vmem:[#allocation5 + $0x18] sm:$0xff] %v3426_v42  ;;  %v3375_v23 = vadd.f32 %v3328_v21, %v3162_v30  ;;  %v3376_v63 = vadd.f32 %v3357_v2, %v3191_v35  ;;  %v3335_v42 = vpop.f32.mrf.mxu0 }
 0x4c6   : > { %v3391_v10 = vmul.f32 %v6896_v38, %v3375_v23  ;;  %v3411_v46 = vmul.f32 %v6896_v38, %v3376_v63 }
 0x4c7   : > { %3613 = vmatpush.bf16.msrb.mxu3 %v4939_v41  ;;  %3687 = vmatpush.bf16.msra.mxu2 %v4962_v52 }
 0x4c8   : > { %v3403_v15 = vadd.f32 %v6901_v36, %v3391_v10  ;;  %v3419_v53 = vadd.f32 %v6901_v36, %v3411_v46  ;;  %v4965_v10 = vld [vmem:[%s7095_s10 + $0xd0] sm:$0xff] }
 0x4c9   : > { %v3163_v9 = vpop.f32.mrf.mxu2  ;;  %v3192_v17 = vpop.f32.mrf.mxu3 }
 0x4ca   : > { %v3427_v61 = vmax.f32 %v3403_v15, %v3419_v53  ;;  %v3164_v1 = vadd.f32 %v3163_v9, %v6881_v43  ;;  %v3193_v6 = vadd.f32 %v3192_v17, %v6883_v34  ;;  %v3362_v22 = vpop.f32.mrf.mxu1  ;;  %v4964_v15 = vld [vmem:[%s7095_s10 + $0xc8] sm:$0xff]  ;;  %v4955_v53 = vld [vmem:[%s7095_s10 + $0x80] sm:$0xff] }
 0x4cb   : > { %v3440_v5 = vld [vmem:[#allocation5 + $0x10] ss:$2 sm:$0xff]  ;;  %v3444_v13 = vld [vmem:[#allocation5 + $0x11] ss:$2 sm:$0xff]  ;;  %3769 = vmatpush.bf16.msra.mxu3 %v4970_v47  ;;  %3688 = vmatpush.bf16.msra.mxu2 %v4961_v18 }
 0x4cc   : > { %3435 = vst [vmem:[#allocation5 + $0x20] sm:$0xff] %v3427_v61  ;;  %v3377_v54 = vadd.f32 %v3330_v44, %v3164_v1  ;;  %v3378_v19 = vadd.f32 %v3359_v39, %v3193_v6  ;;  %v3448_v24 = vmax.f32 %v3440_v5, %v3444_v13 }
 0x4ce   : > { %v3392_v43 = vmul.f32 %v6896_v38, %v3377_v54  ;;  %v3412_v34 = vmul.f32 %v6896_v38, %v3378_v19  ;;  %v3452_v32 = vmax.f32 %v3448_v24, 0.0  ;;  %v4971_v19 = vld [vmem:[%s7098_s13] sm:$0xff] }
 0x4cf   : > { %3770 = vmatpush.bf16.msra.mxu3 %v4969_v27  ;;  %3689 = vmatpush.bf16.msra.mxu2 %v4960_v58 }
 0x4d0   : > { %v3404_v48 = vadd.f32 %v6901_v36, %v3392_v43  ;;  %v3420_v16 = vadd.f32 %v6901_v36, %v3412_v34  ;;  %3456 = vst [vmem:[#allocation6 + $0x8] sm:$0xff] %v3452_v32 }
 0x4d1   : > { %v3166_v51 = vpop.f32.mrf.mxu2  ;;  %v3195_v14 = vpop.f32.mrf.mxu3 }
 0x4d2   : > { %v3428_v49 = vmax.f32 %v3404_v48, %v3420_v16  ;;  %v3167_v12 = vadd.f32 %v3166_v51, %v6885_v28  ;;  %v3196_v60 = vadd.f32 %v3195_v14, %v6887_v3  ;;  %v4959_v28 = vld [vmem:[%s7095_s10 + $0xa0] sm:$0xff]  ;;  %v3364_v30 = vpop.f32.mrf.mxu1 }
 0x4d3   : > { %3771 = vmatpush.bf16.msra.mxu3 %v4968_v11  ;;  %v4967_v3 = vld [vmem:[%s7095_s10 + $0xe0] sm:$0xff]  ;;  %3690 = vmatpush.bf16.msra.mxu2 %v4959_v28 }
 0x4d4   : > { %3436 = vst [vmem:[#allocation5 + $0x28] sm:$0xff] %v3428_v49  ;;  %v3379_v0 = vadd.f32 %v3333_v33, %v3167_v12  ;;  %v3380_v50 = vadd.f32 %v3362_v22, %v3196_v60  ;;  %v5018_v48 = vld [vmem:[%s7096_s11] ss:$0 sm:$0xff] }
 0x4d5   : > { %v5019_v51 = vld [vmem:[%s7097_s12] ss:$0 sm:$0xff] }
 0x4d6   : > { %v3393_v21 = vmul.f32 %v6896_v38, %v3379_v0  ;;  %v3413_v2 = vmul.f32 %v6896_v38, %v3380_v50  ;;  %v5020_v0 = vld [vmem:[%s7099_s14] ss:$0 sm:$0xff] }
 0x4d7   : > { %3772 = vmatpush.bf16.msra.mxu3 %v4967_v3  ;;  %3691 = vmatpush.bf16.msra.mxu2 %v4958_v59 }
 0x4d8   : > { %v3405_v7 = vadd.f32 %v6901_v36, %v3393_v21  ;;  %v3421_v29 = vadd.f32 %v6901_v36, %v3413_v2 }
 0x4d9   : > { %v3168_v8 = vpop.f32.mrf.mxu2  ;;  %v3197_v40 = vpop.f32.mrf.mxu3 }
 0x4da   : > { %v3429_v26 = vmax.f32 %v3405_v7, %v3421_v29  ;;  %v3169_v37 = vadd.f32 %v3168_v8, %v6889_v4  ;;  %v3198_v62 = vadd.f32 %v3197_v40, %v6891_v31 }
 0x4db   : > { %v3441_v35 = vld [vmem:[#allocation5 + $0x20] ss:$2 sm:$0xff]  ;;  %v3445_v57 = vld [vmem:[#allocation5 + $0x21] ss:$2 sm:$0xff]  ;;  %3773 = vmatpush.bf16.msra.mxu3 %v4966_v20  ;;  %3692 = vmatpush.bf16.msra.mxu2 %v4957_v45 }
 0x4dc   : > { %3437 = vst [vmem:[#allocation5 + $0x30] sm:$0xff] %v3429_v26  ;;  %v3381_v25 = vadd.f32 %v3335_v42, %v3169_v37  ;;  %v3382_v23 = vadd.f32 %v3364_v30, %v3198_v62  ;;  %v3449_v4 = vmax.f32 %v3441_v35, %v3445_v57 }
 0x4de   : > { %v3394_v31 = vmul.f32 %v6896_v38, %v3381_v25  ;;  %v3414_v63 = vmul.f32 %v6896_v38, %v3382_v23  ;;  %v3453_v56 = vmax.f32 %v3449_v4, 0.0  ;;  %v4956_v38 = vld [vmem:[%s7095_s10 + $0x88] sm:$0xff] }
 0x4df   : > { %3774 = vmatpush.bf16.msra.mxu3 %v4965_v10  ;;  %3693 = vmatpush.bf16.msra.mxu2 %v4956_v38 }
 0x4e0   : > { %v3406_v46 = vadd.f32 %v6901_v36, %v3394_v31  ;;  %v3422_v44 = vadd.f32 %v6901_v36, %v3414_v63  ;;  %3457 = vst [vmem:[#allocation6 + $0x10] sm:$0xff] %v3453_v56  ;;  %v4963_v36 = vld [vmem:[%s7095_s10 + $0xc0] sm:$0xff] }
 0x4e2   : > { %v3430_v39 = vmax.f32 %v3406_v46, %v3422_v44 }
 0x4e3   : > { %3775 = vmatpush.bf16.msra.mxu3 %v4964_v15  ;;  %3694 = vmatpush.bf16.msra.mxu2 %v4955_v53 }
 0x4e4   : > { %3438 = vst [vmem:[#allocation5 + $0x38] sm:$0xff] %v3430_v39 }
 0x4e7   : > { %3776 = vmatpush.bf16.msra.mxu3 %v4963_v36 }
 0x4eb   : > { %v3442_v9 = vld [vmem:[#allocation5 + $0x30] ss:$2 sm:$0xff]  ;;  %v3446_v17 = vld [vmem:[#allocation5 + $0x31] ss:$2 sm:$0xff] }
 0x4ec   : > { %v3450_v55 = vmax.f32 %v3442_v9, %v3446_v17 }
 0x4ee   : > { %v3454_v41 = vmax.f32 %v3450_v55, 0.0 }
 0x4f0   : > { %3458 = vst [vmem:[#allocation6 + $0x18] sm:$0xff] %v3454_v41 }
 0x4f7   : > { %v3478_v61 = vld [vmem:[#allocation6 + $0x1] ss:$4 sm:$0xff]  ;;  %v3459_v1 = vld [vmem:[#allocation6] ss:$4 sm:$0xff]  ;;  %v3620_v47 = vld [vmem:[#allocation6 + $0x2] ss:$4 sm:$0xff] }
 0x4f8   : > { %v3479_v6 = vpack.c.bf16 %v3478_v61, %v3478_v61  ;;  %v3460_v52 = vpack.c.bf16 %v3459_v1, %v3459_v1  ;;  %v3702_v5 = vld [vmem:[#allocation6 + $0x3] ss:$4 sm:$0xff]  ;;  %v3621_v13 = vpack.c.bf16 %v3620_v47, %v3620_v47 }
 0x4f9   : > { %v3703_v54 = vpack.c.bf16 %v3702_v5, %v3702_v5 }
 0x4fa   : > { %3553 = vmatmul.bf16.vlgmr.msrb.gmra.mxu2 %v3479_v6  ;;  %3614 = vmatmul.bf16.vlgmr.msrb.gmra.mxu3 %v3460_v52 }
 0x4fb   : > { %3818 = vmatpush.bf16.msrb.mxu2 %v4971_v19 }
 0x50a   : > { %3695 = vmatmul.bf16.vlgmr.msra.gmra.mxu2 %v3621_v13  ;;  %3777 = vmatmul.bf16.vlgmr.msra.gmra.mxu3 %v3703_v54 }
 0x57d   : > { %v3554_v24 = vpop.f32.mrf.mxu2  ;;  %v3615_v43 = vpop.f32.mrf.mxu3 }
 0x57e   : > { %v3616_v27 = vadd.f32 %v3615_v43, %v3554_v24 }
 0x585   : > { %v3556_v34 = vpop.f32.mrf.mxu2  ;;  %v3617_v18 = vpop.f32.mrf.mxu3 }
 0x58d   : > { %v3696_v32 = vpop.f32.mrf.mxu2  ;;  %v3778_v33 = vpop.f32.mrf.mxu3 }
 0x58e   : > { %v3700_v22 = vadd.f32 %v3696_v32, %v3616_v27 }
 0x590   : > { %v3782_v16 = vadd.f32 %v3778_v33, %v3700_v22 }
 0x592   : > { %v3787_v14 = vmul.f32 %v5018_v48, %v3782_v16 }
 0x594   : > { %v3792_v49 = vadd.f32 %v5019_v51, %v3787_v14 }
 0x595   : > { %v3698_v12 = vpop.f32.mrf.mxu2  ;;  %v3780_v60 = vpop.f32.mrf.mxu3 }
 0x596   : > { %v3793_v58 = vmax.f32 %v3792_v49, 0.0 }
 0x598   : > { %v3794_v11 = vpack.c.bf16 %v3793_v58, %v3793_v58 }
 0x59a   : > { %4801 = vmatmul.msk.bf16.vlgmr.msrb.gmra.mxu2 %vm3807_vm2, %v3794_v11 }
 0x61d   : > { %v3820_v50 = vpop.f32.mrf.mxu2 }
 0x61e   : > { %v3821_v21 = vadd.f32 %v5020_v0, %v3820_v50 }
 0x620   : > { %3825 = vst.msk [vmem:[%s490_s25] sm:$0xff] %vm3824_vm3, %v3821_v21 }
 0x621   : > { %5050 = shalt.err (!%p5047_p3)
}
 0x622   : > { %4972 = dma.vmem_to_hbm [thread:$0]  (%p5205_p5), %s3840_s22, 128, %s3842_s27, %s3827_s0  }
 0x625   : > { %v3822_v2 = vpop.f32.mrf.mxu2 }
 0x626 PF: > { %p4978_p4 = scmp.ge.s32.totalorder %s5085_s21, 2  ;;  %s3853_s16 = sand.u32 1, %s5073_s18  }
 0x627   : > { %s3854_s17 = scalar_lea.sflag [#allocation8], %s3853_s16 }
 0x628   : > { %p4975_p7 = pnand %p4978_p4, %p5209_p6 }
 0x62a   : > { %p4976_p8 = pneg %p4975_p7 }
 0x62c   : > { %5068 = dma.done.wait (%p4976_p8), %s3854_s17, 128  }
 0x62d   : > { %5070 = vsyncadd (%p4976_p8), %s3854_s17, 4294967168  ;;  %s7154_s21 = sld [smem:[#allocation11_spill]]  ;;  %s7157_s18 = smov %s5077_s19 }
 0x62e   : > { %s7155_s1 = sld [smem:[#allocation10_spill]] }
 0x62f   : > { %s7156_s20 = sld [smem:[#allocation12_spill]] }
 0x633   : > { %p25_p9 = scmp.ge.s32.totalorder %s7154_s21, 4  }
 0x634   : > { %s7158_s19 = smov %s7155_s1 }
 0x635   :  { %27 = sbr.rel (!%p25_p9) target bundleno = 7 (0x7), region = 165 }
 0x63a   :  { %3860 = vsyncpa [#allocation8], 1 }
 0x63b   :  { %3862 = vsyncpa [#allocation8 + $0x1], 1 }

</bundles_post_ra>
